<compile_context>
chip_gen: v7x
topology: tpu7x:2x2x1
jax: 0.10.0
libtpu: 0.0.40
codegen_flags: <defaults>
</compile_context>

<pallas_src>
import functools

import jax
import jax.numpy as jnp
from jax.experimental import pallas as pl
from jax.experimental.pallas import tpu as pltpu


def _is_multi_tensorcore_chip():
    """True only for chips exposing 2 TensorCores to one Pallas program (v7x)."""
    try:
        kind = jax.devices()[0].device_kind.lower()
    except Exception:
        return False
    return "v7" in kind


# ---------------------------------------------------------------------------
# Pallas kernel 1: conv-as-GEMM, transposed so spatial M is lane-dense.
#   o[n] = relu( W(Cout,K) @ A[n](K,M) + b(Cout,1) )
# ---------------------------------------------------------------------------
def _conv_gemm_t_kernel(a_ref, w_ref, b_ref, o_ref):
    for n in range(a_ref.shape[0]):          # static unroll over the batch block
        acc = jnp.dot(w_ref[...], a_ref[n], preferred_element_type=jnp.float32)
        o_ref[n] = jnp.maximum(acc + b_ref[...], 0.0).astype(o_ref.dtype)


def conv_gemm_t(a_t, w_t, b_col, *, n_blocks=1):
    """a_t: (N, K, M), w_t: (Cout, K), b_col: (Cout, 1) -> (N, Cout, M)."""
    N, K, M = a_t.shape
    Cout, Kw = w_t.shape
    assert K == Kw and b_col.shape == (Cout, 1)
    assert N % n_blocks == 0
    nb = N // n_blocks
    return pl.pallas_call(
        _conv_gemm_t_kernel,
        out_shape=jax.ShapeDtypeStruct((N, Cout, M), a_t.dtype),
        grid_spec=pltpu.PrefetchScalarGridSpec(
            num_scalar_prefetch=0,
            grid=(n_blocks,),
            in_specs=[
                pl.BlockSpec((nb, K, M), lambda i: (i, 0, 0)),   # patches, lane-dense
                pl.BlockSpec((Cout, K), lambda i: (0, 0)),       # weight, resident
                pl.BlockSpec((Cout, 1), lambda i: (0, 0)),       # bias column
            ],
            out_specs=pl.BlockSpec((nb, Cout, M), lambda i: (i, 0, 0)),
        ),
        compiler_params=pltpu.CompilerParams(dimension_semantics=("parallel",)),
    )(a_t, w_t, b_col)


# ---------------------------------------------------------------------------
# Pallas kernel 2: fused conv2 GEMM + FC1 + ReLU + FC2, with the fc1_w DMA
# started first so it overlaps the conv2 compute.
# ---------------------------------------------------------------------------
def _fused_conv2_mlp_kernel(a2t_ref, w2c_ref, b2c_ref, w1_hbm, b1_ref,
                            w2fc_ref, b2fc_ref, o_ref, w1_vmem, w1_sem):
    # 1) Kick off the big FC1-weight DMA (2.25 MB, ~90% of HBM bytes) first.
    w1_copy = pltpu.make_async_copy(w1_hbm, w1_vmem, w1_sem)
    w1_copy.start()

    n_batch = a2t_ref.shape[0]
    n_ch = w2c_ref.shape[0]

    # 2) conv2 as a transposed GEMM per sample: (Cout,K)@(K,M), spatial on lanes.
    o2t = []
    for n in range(n_batch):
        acc = jnp.dot(w2c_ref[...], a2t_ref[n],
                      preferred_element_type=jnp.float32)
        o2t.append(jnp.maximum(acc + b2c_ref[...], 0.0))        # (Cout, S)

    # 3) Wait for fc1_w, then FC1 as a per-channel contraction.  The (C,S,H)
    #    weight layout absorbs PyTorch's NCDHW flatten, so no in-kernel
    #    reshape/transpose of activations is needed.
    w1_copy.wait()
    h = None
    for c in range(n_ch):
        xc = jnp.concatenate([o[c:c + 1, :] for o in o2t], axis=0)   # (N, S)
        t = jnp.dot(xc, w1_vmem[c], preferred_element_type=jnp.float32)
        h = t if h is None else h + t
    h = jnp.maximum(h + b1_ref[...], 0.0)                            # (N, hidden)

    # 4) FC2
    out = jnp.dot(h, w2fc_ref[...], preferred_element_type=jnp.float32)
    o_ref[...] = (out + b2fc_ref[...]).astype(o_ref.dtype)


def fused_conv2_mlp_head(a2t, w2c, b2c, w1, b1, w2fc, b2fc):
    """a2t: (N, K2, S) conv2 patches; w1: (C, S, hidden); returns (N, numClasses)."""
    N, K2, S = a2t.shape
    Cout, K2b = w2c.shape
    Cw, Sw, Hd = w1.shape
    Hd2, NC = w2fc.shape
    assert K2 == K2b and Cw == Cout and Sw == S and Hd == Hd2
    assert b2c.shape == (Cout, 1) and b1.shape == (1, Hd) and b2fc.shape == (1, NC)
    return pl.pallas_call(
        _fused_conv2_mlp_kernel,
        out_shape=jax.ShapeDtypeStruct((N, NC), a2t.dtype),
        grid_spec=pltpu.PrefetchScalarGridSpec(
            num_scalar_prefetch=0,
            grid=(1,),
            in_specs=[
                pl.BlockSpec((N, K2, S), lambda i: (0, 0, 0)),   # conv2 patches
                pl.BlockSpec((Cout, K2), lambda i: (0, 0)),      # conv2 weight
                pl.BlockSpec((Cout, 1), lambda i: (0, 0)),       # conv2 bias
                pl.BlockSpec(memory_space=pl.ANY),               # fc1_w stays in HBM
                pl.BlockSpec((1, Hd), lambda i: (0, 0)),         # fc1 bias
                pl.BlockSpec((Hd, NC), lambda i: (0, 0)),        # fc2 weight
                pl.BlockSpec((1, NC), lambda i: (0, 0)),         # fc2 bias
            ],
            out_specs=pl.BlockSpec((N, NC), lambda i: (0, 0)),
            scratch_shapes=[
                pltpu.VMEM((Cw, Sw, Hd), jnp.float32),           # fc1_w landing buf
                pltpu.SemaphoreType.DMA(()),
            ],
        ),
        compiler_params=pltpu.CompilerParams(dimension_semantics=("arbitrary",)),
    )(a2t, w2c, b2c, w1, b1, w2fc, b2fc)


# ---------------------------------------------------------------------------
# im2col (tiny XLA glue, fused under jit) producing transposed patch matrices.
# ---------------------------------------------------------------------------
def _im2col_t(x_ncdhw, kshape, stride):
    """x: (N, C, D, H, W), VALID padding -> (N, kt*kh*kw*C, Do*Ho*Wo)."""
    N, C, D, H, W = x_ncdhw.shape
    kt, kh, kw = kshape
    Do = (D - kt) // stride + 1
    Ho = (H - kh) // stride + 1
    Wo = (W - kw) // stride + 1
    cols = []
    for dt in range(kt):
        for dh in range(kh):
            for dw in range(kw):
                cols.append(
                    x_ncdhw[:, :, dt:dt + stride * Do:stride,
                                  dh:dh + stride * Ho:stride,
                                  dw:dw + stride * Wo:stride])
    p = jnp.stack(cols, axis=1)                          # (N, taps, C, Do, Ho, Wo)
    return p.reshape(N, kt * kh * kw * C, Do * Ho * Wo), (Do, Ho, Wo)


# ---------------------------------------------------------------------------
# One-time parameter preparation (all weight layout work lives here).
# ---------------------------------------------------------------------------
def prepare_params(p, conv2_out_cdhw=(8, 2, 6, 6)):
    def conv_w_t(w):  # (Cout, Cin, kt, kh, kw) -> (Cout, kt*kh*kw*Cin), tap-major
        Cout, Cin, kt, kh, kw = w.shape
        return jnp.transpose(w, (0, 2, 3, 4, 1)).reshape(Cout, kt * kh * kw * Cin)

    C, D, H, W = conv2_out_cdhw
    S = D * H * W
    hidden = p["fc1_w"].shape[0]
    # torch fc1_w is (out, in) with `in` indexed in NCDHW-flatten order c*S + s.
    # The fused kernel contracts per channel, so reshape W1^T to (C, S, hidden).
    w1 = p["fc1_w"].T.reshape(C, S, hidden)

    return {
        "conv1_w": conv_w_t(p["conv1_w"]),            # (4, 27)
        "conv1_b": p["conv1_b"].reshape(-1, 1),       # (4, 1)
        "conv2_w": conv_w_t(p["conv2_w"]),            # (8, 108)
        "conv2_b": p["conv2_b"].reshape(-1, 1),       # (8, 1)
        "fc1_w": w1,                                  # (8, 72, 1024)
        "fc1_b": p["fc1_b"].reshape(1, -1),           # (1, 1024)
        "fc2_w": p["fc2_w"].T,                        # (1024, 5)
        "fc2_b": p["fc2_b"].reshape(1, -1),           # (1, 5)
    }


# ---------------------------------------------------------------------------
# CNN3dLe forward (useGAP=False, decouplet2=False branch)
# ---------------------------------------------------------------------------
def cnn3dle_forward(x_ncdhw, p, *, batch_grid=1):
    N = x_ncdhw.shape[0]
    # conv1: im2col (XLA glue) + transposed Pallas GEMM (+ReLU), lane-dense output
    a1t, (d1, h1, w1) = _im2col_t(x_ncdhw, (3, 3, 3), 1)          # (N, 27, 1176)
    o1t = conv_gemm_t(a1t, p["conv1_w"], p["conv1_b"],
                      n_blocks=batch_grid)                        # (N, 4, 1176)
    y1 = o1t.reshape(N, o1t.shape[1], d1, h1, w1)                 # (N, 4, 6, 14, 14)
    # conv2 patches (XLA glue, fused under jit)
    a2t, _ = _im2col_t(y1, (3, 3, 3), 2)                          # (N, 108, 72)
    # fused conv2 + FC1 + ReLU + FC2 in a single pallas_call
    return fused_conv2_mlp_head(a2t, p["conv2_w"], p["conv2_b"],
                                p["fc1_w"], p["fc1_b"],
                                p["fc2_w"], p["fc2_b"])           # (N, numClasses)


# ---------------------------------------------------------------------------
# Pure-JAX reference (PyTorch-layout params, same math) for correctness check.
# ---------------------------------------------------------------------------
def _ref_forward(x, params):
    def conv(x, w, b, s):
        y = jax.lax.conv_general_dilated(
            x, w, (s, s, s), "VALID",
            dimension_numbers=("NCDHW", "OIDHW", "NCDHW"))
        return jnp.maximum(y + b.reshape(1, -1, 1, 1, 1), 0.0)
    y = conv(x, params["conv1_w"], params["conv1_b"], 1)
    y = conv(y, params["conv2_w"], params["conv2_b"], 2)
    y = y.reshape(y.shape[0], -1)
    y = jnp.maximum(y @ params["fc1_w"].T + params["fc1_b"], 0.0)
    return y @ params["fc2_w"].T + params["fc2_b"]


# ---------------------------------------------------------------------------
# Deterministic parameter init (PyTorch-style uniform(-1/sqrt(fan_in), ...))
# ---------------------------------------------------------------------------
def _uniform(key, shape, fan_in):
    bound = 1.0 / float(fan_in) ** 0.5
    return jax.random.uniform(key, shape, jnp.float32, -bound, bound)


def init_params(key, num_classes=5):
    ks = jax.random.split(key, 8)
    p = {}
    p["conv1_w"] = _uniform(ks[0], (4, 1, 3, 3, 3), 1 * 27)
    p["conv1_b"] = _uniform(ks[1], (4,), 1 * 27)
    p["conv2_w"] = _uniform(ks[2], (8, 4, 3, 3, 3), 4 * 27)
    p["conv2_b"] = _uniform(ks[3], (8,), 4 * 27)
    p["fc1_w"] = _uniform(ks[4], (1024, 576), 576)     # torch Linear (out, in)
    p["fc1_b"] = _uniform(ks[5], (1024,), 576)
    p["fc2_w"] = _uniform(ks[6], (num_classes, 1024), 1024)
    p["fc2_b"] = _uniform(ks[7], (num_classes,), 1024)
    return p


if __name__ == "__main__":
    key = jax.random.PRNGKey(0)
    kx, kp = jax.random.split(key)
    x = jax.random.normal(kx, (2, 1, 8, 16, 16), jnp.float32)   # (N, C=1, t2, w1, w3)
    params = init_params(kp, num_classes=5)
    prep = prepare_params(params)                               # one-time layout work

    # Batch-level grid split only where a 2nd TensorCore exists (v7x); on
    # single-TC v5e/v6e an extra grid step is pure overhead.
    batch_grid = x.shape[0] if _is_multi_tensorcore_chip() else 1

    fwd = jax.jit(functools.partial(cnn3dle_forward, batch_grid=batch_grid))
    out = jax.block_until_ready(fwd(x, prep))
    assert out.shape == (2, 5), out.shape

    ref = jax.block_until_ready(_ref_forward(x, params))
    assert jnp.allclose(out, ref, rtol=1e-3, atol=1e-3), (
        float(jnp.max(jnp.abs(out - ref))))

    print("KERNEL_OK")
</pallas_src>

<mosaic_0001>
module attributes {stable_mosaic.version = 11 : i64} {
  func.func @_conv_gemm_t_kernel(%arg0: i32, %arg1: memref<2x27x1176xf32, #tpu.memory_space<vmem>>, %arg2: memref<4x27xf32, #tpu.memory_space<vmem>>, %arg3: memref<4x1xf32, #tpu.memory_space<vmem>>, %arg4: memref<2x4x1176xf32, #tpu.memory_space<vmem>>) attributes {dimension_semantics = [#tpu.dimension_semantics<parallel>], iteration_bounds = array<i64: 1>, scalar_prefetch = 0 : i64, scratch_operands = 0 : i64, tpu.core_type = #tpu.core_type<tc>, window_params = [{transform_indices = @transform_0, window_bounds = array<i64: 2, 27, 1176>}, {pipeline_mode = #tpu.pipeline_mode<synchronous>, transform_indices = @transform_1, window_bounds = array<i64: 4, 27>}, {pipeline_mode = #tpu.pipeline_mode<synchronous>, transform_indices = @transform_2, window_bounds = array<i64: 4, 1>}, {transform_indices = @transform_3, window_bounds = array<i64: 2, 4, 1176>}]} {
    %c0 = arith.constant 0 : index
    %c0_0 = arith.constant 0 : index
    %0 = vector.load %arg2[%c0, %c0_0] : memref<4x27xf32, #tpu.memory_space<vmem>>, vector<4x27xf32>
    %c0_1 = arith.constant 0 : index
    %c0_2 = arith.constant 0 : index
    %c0_3 = arith.constant 0 : index
    %1 = vector.load %arg1[%c0_1, %c0_2, %c0_3] : memref<2x27x1176xf32, #tpu.memory_space<vmem>>, vector<1x27x1176xf32>
    %2 = vector.shape_cast %1 : vector<1x27x1176xf32> to vector<27x1176xf32>
    %cst = arith.constant dense<0.000000e+00> : vector<4x1176xf32>
    %3 = tpu.matmul %0, %2, %cst {dimension_numbers = #tpu.dot_dimension_numbers<[1], [0], [0], [1], [0, 0, 1, 1], [], []>} : vector<4x27xf32>, vector<27x1176xf32>, vector<4x1176xf32> -> vector<4x1176xf32>
    %c0_4 = arith.constant 0 : index
    %c0_5 = arith.constant 0 : index
    %4 = vector.load %arg3[%c0_4, %c0_5] : memref<4x1xf32, #tpu.memory_space<vmem>>, vector<4x1xf32>
    %5 = vector.broadcast %4 : vector<4x1xf32> to vector<4x1176xf32>
    %6 = arith.addf %3, %5 : vector<4x1176xf32>
    %cst_6 = arith.constant 0.000000e+00 : f32
    %7 = vector.broadcast %cst_6 : f32 to vector<4x1176xf32>
    %8 = arith.maximumf %6, %7 : vector<4x1176xf32>
    %c0_7 = arith.constant 0 : index
    %c0_8 = arith.constant 0 : index
    %c0_9 = arith.constant 0 : index
    %9 = vector.load %arg4[%c0_7, %c0_8, %c0_9] : memref<2x4x1176xf32, #tpu.memory_space<vmem>>, vector<1x4x1176xf32>
    %10 = vector.shape_cast %9 : vector<1x4x1176xf32> to vector<4x1176xf32>
    %11 = vector.shape_cast %8 : vector<4x1176xf32> to vector<1x4x1176xf32>
    tpu.vector_store %arg4[%c0_7, %c0_8, %c0_9], %11 {strides = array<i32>} : memref<2x4x1176xf32, #tpu.memory_space<vmem>>, vector<1x4x1176xf32>,
    %c0_10 = arith.constant 0 : index
    %c0_11 = arith.constant 0 : index
    %12 = vector.load %arg2[%c0_10, %c0_11] : memref<4x27xf32, #tpu.memory_space<vmem>>, vector<4x27xf32>
    %c1 = arith.constant 1 : index
    %c0_12 = arith.constant 0 : index
    %c0_13 = arith.constant 0 : index
    %13 = vector.load %arg1[%c1, %c0_12, %c0_13] : memref<2x27x1176xf32, #tpu.memory_space<vmem>>, vector<1x27x1176xf32>
    %14 = vector.shape_cast %13 : vector<1x27x1176xf32> to vector<27x1176xf32>
    %cst_14 = arith.constant dense<0.000000e+00> : vector<4x1176xf32>
    %15 = tpu.matmul %12, %14, %cst_14 {dimension_numbers = #tpu.dot_dimension_numbers<[1], [0], [0], [1], [0, 0, 1, 1], [], []>} : vector<4x27xf32>, vector<27x1176xf32>, vector<4x1176xf32> -> vector<4x1176xf32>
    %c0_15 = arith.constant 0 : index
    %c0_16 = arith.constant 0 : index
    %16 = vector.load %arg3[%c0_15, %c0_16] : memref<4x1xf32, #tpu.memory_space<vmem>>, vector<4x1xf32>
    %17 = vector.broadcast %16 : vector<4x1xf32> to vector<4x1176xf32>
    %18 = arith.addf %15, %17 : vector<4x1176xf32>
    %cst_17 = arith.constant 0.000000e+00 : f32
    %19 = vector.broadcast %cst_17 : f32 to vector<4x1176xf32>
    %20 = arith.maximumf %18, %19 : vector<4x1176xf32>
    %c1_18 = arith.constant 1 : index
    %c0_19 = arith.constant 0 : index
    %c0_20 = arith.constant 0 : index
    %21 = vector.load %arg4[%c1_18, %c0_19, %c0_20] : memref<2x4x1176xf32, #tpu.memory_space<vmem>>, vector<1x4x1176xf32>
    %22 = vector.shape_cast %21 : vector<1x4x1176xf32> to vector<4x1176xf32>
    %23 = vector.shape_cast %20 : vector<4x1176xf32> to vector<1x4x1176xf32>
    tpu.vector_store %arg4[%c1_18, %c0_19, %c0_20], %23 {strides = array<i32>} : memref<2x4x1176xf32, #tpu.memory_space<vmem>>, vector<1x4x1176xf32>,
    return
  }
  func.func @transform_0(%arg0: i32) -> (i32, i32, i32) {
    %c0_i32 = arith.constant 0 : i32
    %c0_i32_0 = arith.constant 0 : i32
    %c0_i32_1 = arith.constant 0 : i32
    return %arg0, %c0_i32, %c0_i32_0 : i32, i32, i32
  }
  func.func @transform_1(%arg0: i32) -> (i32, i32) {
    %c0_i32 = arith.constant 0 : i32
    %c0_i32_0 = arith.constant 0 : i32
    %c0_i32_1 = arith.constant 0 : i32
    return %c0_i32, %c0_i32_0 : i32, i32
  }
  func.func @transform_2(%arg0: i32) -> (i32, i32) {
    %c0_i32 = arith.constant 0 : i32
    %c0_i32_0 = arith.constant 0 : i32
    %c0_i32_1 = arith.constant 0 : i32
    return %c0_i32, %c0_i32_0 : i32, i32
  }
  func.func @transform_3(%arg0: i32) -> (i32, i32, i32) {
    %c0_i32 = arith.constant 0 : i32
    %c0_i32_0 = arith.constant 0 : i32
    %c0_i32_1 = arith.constant 0 : i32
    return %arg0, %c0_i32, %c0_i32_0 : i32, i32, i32
  }
}

module attributes {stable_mosaic.version = 11 : i64} {
  func.func @_fused_conv2_mlp_kernel(%arg0: i32, %arg1: memref<2x108x72xf32, #tpu.memory_space<vmem>>, %arg2: memref<8x108xf32, #tpu.memory_space<vmem>>, %arg3: memref<8x1xf32, #tpu.memory_space<vmem>>, %arg4: memref<8x72x1024xf32, #tpu.memory_space<any>>, %arg5: memref<1x1024xf32, #tpu.memory_space<vmem>>, %arg6: memref<1024x5xf32, #tpu.memory_space<vmem>>, %arg7: memref<1x5xf32, #tpu.memory_space<vmem>>, %arg8: memref<2x5xf32, #tpu.memory_space<vmem>>, %arg9: memref<8x72x1024xf32, #tpu.memory_space<vmem>>, %arg10: memref<!tpu.dma_semaphore, #tpu.memory_space<semaphore_mem>>) attributes {dimension_semantics = [#tpu.dimension_semantics<arbitrary>], iteration_bounds = array<i64: 1>, scalar_prefetch = 0 : i64, scratch_operands = 2 : i64, tpu.core_type = #tpu.core_type<tc>, window_params = [{pipeline_mode = #tpu.pipeline_mode<synchronous>, transform_indices = @transform_0, window_bounds = array<i64: 2, 108, 72>}, {pipeline_mode = #tpu.pipeline_mode<synchronous>, transform_indices = @transform_1, window_bounds = array<i64: 8, 108>}, {pipeline_mode = #tpu.pipeline_mode<synchronous>, transform_indices = @transform_2, window_bounds = array<i64: 8, 1>}, {}, {pipeline_mode = #tpu.pipeline_mode<synchronous>, transform_indices = @transform_4, window_bounds = array<i64: 1, 1024>}, {pipeline_mode = #tpu.pipeline_mode<synchronous>, transform_indices = @transform_5, window_bounds = array<i64: 1024, 5>}, {pipeline_mode = #tpu.pipeline_mode<synchronous>, transform_indices = @transform_6, window_bounds = array<i64: 1, 5>}, {pipeline_mode = #tpu.pipeline_mode<synchronous>, transform_indices = @transform_7, window_bounds = array<i64: 2, 5>}]} {
    tpu.enqueue_dma source(%arg4 : memref<8x72x1024xf32, #tpu.memory_space<any>>) target(%arg9 : memref<8x72x1024xf32, #tpu.memory_space<vmem>>) target_semaphore(%arg10 : memref<!tpu.dma_semaphore, #tpu.memory_space<semaphore_mem>>)
    %c0 = arith.constant 0 : index
    %c0_0 = arith.constant 0 : index
    %0 = vector.load %arg2[%c0, %c0_0] : memref<8x108xf32, #tpu.memory_space<vmem>>, vector<8x108xf32>
    %c0_1 = arith.constant 0 : index
    %c0_2 = arith.constant 0 : index
    %c0_3 = arith.constant 0 : index
    %1 = vector.load %arg1[%c0_1, %c0_2, %c0_3] : memref<2x108x72xf32, #tpu.memory_space<vmem>>, vector<1x108x72xf32>
    %2 = vector.shape_cast %1 : vector<1x108x72xf32> to vector<108x72xf32>
    %cst = arith.constant dense<0.000000e+00> : vector<8x72xf32>
    %3 = tpu.matmul %0, %2, %cst {dimension_numbers = #tpu.dot_dimension_numbers<[1], [0], [0], [1], [0, 0, 1, 1], [], []>} : vector<8x108xf32>, vector<108x72xf32>, vector<8x72xf32> -> vector<8x72xf32>
    %c0_4 = arith.constant 0 : index
    %c0_5 = arith.constant 0 : index
    %4 = vector.load %arg3[%c0_4, %c0_5] : memref<8x1xf32, #tpu.memory_space<vmem>>, vector<8x1xf32>
    %5 = vector.broadcast %4 : vector<8x1xf32> to vector<8x72xf32>
    %6 = arith.addf %3, %5 : vector<8x72xf32>
    %cst_6 = arith.constant 0.000000e+00 : f32
    %7 = vector.broadcast %cst_6 : f32 to vector<8x72xf32>
    %8 = arith.maximumf %6, %7 : vector<8x72xf32>
    %c0_7 = arith.constant 0 : index
    %c0_8 = arith.constant 0 : index
    %9 = vector.load %arg2[%c0_7, %c0_8] : memref<8x108xf32, #tpu.memory_space<vmem>>, vector<8x108xf32>
    %c1 = arith.constant 1 : index
    %c0_9 = arith.constant 0 : index
    %c0_10 = arith.constant 0 : index
    %10 = vector.load %arg1[%c1, %c0_9, %c0_10] : memref<2x108x72xf32, #tpu.memory_space<vmem>>, vector<1x108x72xf32>
    %11 = vector.shape_cast %10 : vector<1x108x72xf32> to vector<108x72xf32>
    %cst_11 = arith.constant dense<0.000000e+00> : vector<8x72xf32>
    %12 = tpu.matmul %9, %11, %cst_11 {dimension_numbers = #tpu.dot_dimension_numbers<[1], [0], [0], [1], [0, 0, 1, 1], [], []>} : vector<8x108xf32>, vector<108x72xf32>, vector<8x72xf32> -> vector<8x72xf32>
    %c0_12 = arith.constant 0 : index
    %c0_13 = arith.constant 0 : index
    %13 = vector.load %arg3[%c0_12, %c0_13] : memref<8x1xf32, #tpu.memory_space<vmem>>, vector<8x1xf32>
    %14 = vector.broadcast %13 : vector<8x1xf32> to vector<8x72xf32>
    %15 = arith.addf %12, %14 : vector<8x72xf32>
    %cst_14 = arith.constant 0.000000e+00 : f32
    %16 = vector.broadcast %cst_14 : f32 to vector<8x72xf32>
    %17 = arith.maximumf %15, %16 : vector<8x72xf32>
    tpu.wait_dma2 semaphore(%arg10 : memref<!tpu.dma_semaphore, #tpu.memory_space<semaphore_mem>>) src(%arg4 : memref<8x72x1024xf32, #tpu.memory_space<any>>) dst(%arg9 : memref<8x72x1024xf32, #tpu.memory_space<vmem>>)
    %18 = vector.extract_strided_slice %8 {offsets = [0, 0], sizes = [1, 72], strides = [1, 1]} : vector<8x72xf32> to vector<1x72xf32>
    %19 = vector.extract_strided_slice %17 {offsets = [0, 0], sizes = [1, 72], strides = [1, 1]} : vector<8x72xf32> to vector<1x72xf32>
    %20 = tpu.concatenate %18, %19 in 0 : vector<1x72xf32>, vector<1x72xf32> -> vector<2x72xf32>
    %c0_15 = arith.constant 0 : index
    %c0_16 = arith.constant 0 : index
    %c0_17 = arith.constant 0 : index
    %21 = vector.load %arg9[%c0_15, %c0_16, %c0_17] : memref<8x72x1024xf32, #tpu.memory_space<vmem>>, vector<1x72x1024xf32>
    %22 = vector.shape_cast %21 : vector<1x72x1024xf32> to vector<72x1024xf32>
    %cst_18 = arith.constant dense<0.000000e+00> : vector<2x1024xf32>
    %23 = tpu.matmul %20, %22, %cst_18 {dimension_numbers = #tpu.dot_dimension_numbers<[1], [0], [0], [1], [0, 0, 1, 1], [], []>} : vector<2x72xf32>, vector<72x1024xf32>, vector<2x1024xf32> -> vector<2x1024xf32>
    %24 = vector.extract_strided_slice %8 {offsets = [1, 0], sizes = [1, 72], strides = [1, 1]} : vector<8x72xf32> to vector<1x72xf32>
    %25 = vector.extract_strided_slice %17 {offsets = [1, 0], sizes = [1, 72], strides = [1, 1]} : vector<8x72xf32> to vector<1x72xf32>
    %26 = tpu.concatenate %24, %25 in 0 : vector<1x72xf32>, vector<1x72xf32> -> vector<2x72xf32>
    %c1_19 = arith.constant 1 : index
    %c0_20 = arith.constant 0 : index
    %c0_21 = arith.constant 0 : index
    %27 = vector.load %arg9[%c1_19, %c0_20, %c0_21] : memref<8x72x1024xf32, #tpu.memory_space<vmem>>, vector<1x72x1024xf32>
    %28 = vector.shape_cast %27 : vector<1x72x1024xf32> to vector<72x1024xf32>
    %cst_22 = arith.constant dense<0.000000e+00> : vector<2x1024xf32>
    %29 = tpu.matmul %26, %28, %cst_22 {dimension_numbers = #tpu.dot_dimension_numbers<[1], [0], [0], [1], [0, 0, 1, 1], [], []>} : vector<2x72xf32>, vector<72x1024xf32>, vector<2x1024xf32> -> vector<2x1024xf32>
    %30 = arith.addf %23, %29 : vector<2x1024xf32>
    %31 = vector.extract_strided_slice %8 {offsets = [2, 0], sizes = [1, 72], strides = [1, 1]} : vector<8x72xf32> to vector<1x72xf32>
    %32 = vector.extract_strided_slice %17 {offsets = [2, 0], sizes = [1, 72], strides = [1, 1]} : vector<8x72xf32> to vector<1x72xf32>
    %33 = tpu.concatenate %31, %32 in 0 : vector<1x72xf32>, vector<1x72xf32> -> vector<2x72xf32>
    %c2 = arith.constant 2 : index
    %c0_23 = arith.constant 0 : index
    %c0_24 = arith.constant 0 : index
    %34 = vector.load %arg9[%c2, %c0_23, %c0_24] : memref<8x72x1024xf32, #tpu.memory_space<vmem>>, vector<1x72x1024xf32>
    %35 = vector.shape_cast %34 : vector<1x72x1024xf32> to vector<72x1024xf32>
    %cst_25 = arith.constant dense<0.000000e+00> : vector<2x1024xf32>
    %36 = tpu.matmul %33, %35, %cst_25 {dimension_numbers = #tpu.dot_dimension_numbers<[1], [0], [0], [1], [0, 0, 1, 1], [], []>} : vector<2x72xf32>, vector<72x1024xf32>, vector<2x1024xf32> -> vector<2x1024xf32>
    %37 = arith.addf %30, %36 : vector<2x1024xf32>
    %38 = vector.extract_strided_slice %8 {offsets = [3, 0], sizes = [1, 72], strides = [1, 1]} : vector<8x72xf32> to vector<1x72xf32>
    %39 = vector.extract_strided_slice %17 {offsets = [3, 0], sizes = [1, 72], strides = [1, 1]} : vector<8x72xf32> to vector<1x72xf32>
    %40 = tpu.concatenate %38, %39 in 0 : vector<1x72xf32>, vector<1x72xf32> -> vector<2x72xf32>
    %c3 = arith.constant 3 : index
    %c0_26 = arith.constant 0 : index
    %c0_27 = arith.constant 0 : index
    %41 = vector.load %arg9[%c3, %c0_26, %c0_27] : memref<8x72x1024xf32, #tpu.memory_space<vmem>>, vector<1x72x1024xf32>
    %42 = vector.shape_cast %41 : vector<1x72x1024xf32> to vector<72x1024xf32>
    %cst_28 = arith.constant dense<0.000000e+00> : vector<2x1024xf32>
    %43 = tpu.matmul %40, %42, %cst_28 {dimension_numbers = #tpu.dot_dimension_numbers<[1], [0], [0], [1], [0, 0, 1, 1], [], []>} : vector<2x72xf32>, vector<72x1024xf32>, vector<2x1024xf32> -> vector<2x1024xf32>
    %44 = arith.addf %37, %43 : vector<2x1024xf32>
    %45 = vector.extract_strided_slice %8 {offsets = [4, 0], sizes = [1, 72], strides = [1, 1]} : vector<8x72xf32> to vector<1x72xf32>
    %46 = vector.extract_strided_slice %17 {offsets = [4, 0], sizes = [1, 72], strides = [1, 1]} : vector<8x72xf32> to vector<1x72xf32>
    %47 = tpu.concatenate %45, %46 in 0 : vector<1x72xf32>, vector<1x72xf32> -> vector<2x72xf32>
    %c4 = arith.constant 4 : index
    %c0_29 = arith.constant 0 : index
    %c0_30 = arith.constant 0 : index
    %48 = vector.load %arg9[%c4, %c0_29, %c0_30] : memref<8x72x1024xf32, #tpu.memory_space<vmem>>, vector<1x72x1024xf32>
    %49 = vector.shape_cast %48 : vector<1x72x1024xf32> to vector<72x1024xf32>
    %cst_31 = arith.constant dense<0.000000e+00> : vector<2x1024xf32>
    %50 = tpu.matmul %47, %49, %cst_31 {dimension_numbers = #tpu.dot_dimension_numbers<[1], [0], [0], [1], [0, 0, 1, 1], [], []>} : vector<2x72xf32>, vector<72x1024xf32>, vector<2x1024xf32> -> vector<2x1024xf32>
    %51 = arith.addf %44, %50 : vector<2x1024xf32>
    %52 = vector.extract_strided_slice %8 {offsets = [5, 0], sizes = [1, 72], strides = [1, 1]} : vector<8x72xf32> to vector<1x72xf32>
    %53 = vector.extract_strided_slice %17 {offsets = [5, 0], sizes = [1, 72], strides = [1, 1]} : vector<8x72xf32> to vector<1x72xf32>
    %54 = tpu.concatenate %52, %53 in 0 : vector<1x72xf32>, vector<1x72xf32> -> vector<2x72xf32>
    %c5 = arith.constant 5 : index
    %c0_32 = arith.constant 0 : index
    %c0_33 = arith.constant 0 : index
    %55 = vector.load %arg9[%c5, %c0_32, %c0_33] : memref<8x72x1024xf32, #tpu.memory_space<vmem>>, vector<1x72x1024xf32>
    %56 = vector.shape_cast %55 : vector<1x72x1024xf32> to vector<72x1024xf32>
    %cst_34 = arith.constant dense<0.000000e+00> : vector<2x1024xf32>
    %57 = tpu.matmul %54, %56, %cst_34 {dimension_numbers = #tpu.dot_dimension_numbers<[1], [0], [0], [1], [0, 0, 1, 1], [], []>} : vector<2x72xf32>, vector<72x1024xf32>, vector<2x1024xf32> -> vector<2x1024xf32>
    %58 = arith.addf %51, %57 : vector<2x1024xf32>
    %59 = vector.extract_strided_slice %8 {offsets = [6, 0], sizes = [1, 72], strides = [1, 1]} : vector<8x72xf32> to vector<1x72xf32>
    %60 = vector.extract_strided_slice %17 {offsets = [6, 0], sizes = [1, 72], strides = [1, 1]} : vector<8x72xf32> to vector<1x72xf32>
    %61 = tpu.concatenate %59, %60 in 0 : vector<1x72xf32>, vector<1x72xf32> -> vector<2x72xf32>
    %c6 = arith.constant 6 : index
    %c0_35 = arith.constant 0 : index
    %c0_36 = arith.constant 0 : index
    %62 = vector.load %arg9[%c6, %c0_35, %c0_36] : memref<8x72x1024xf32, #tpu.memory_space<vmem>>, vector<1x72x1024xf32>
    %63 = vector.shape_cast %62 : vector<1x72x1024xf32> to vector<72x1024xf32>
    %cst_37 = arith.constant dense<0.000000e+00> : vector<2x1024xf32>
    %64 = tpu.matmul %61, %63, %cst_37 {dimension_numbers = #tpu.dot_dimension_numbers<[1], [0], [0], [1], [0, 0, 1, 1], [], []>} : vector<2x72xf32>, vector<72x1024xf32>, vector<2x1024xf32> -> vector<2x1024xf32>
    %65 = arith.addf %58, %64 : vector<2x1024xf32>
    %66 = vector.extract_strided_slice %8 {offsets = [7, 0], sizes = [1, 72], strides = [1, 1]} : vector<8x72xf32> to vector<1x72xf32>
    %67 = vector.extract_strided_slice %17 {offsets = [7, 0], sizes = [1, 72], strides = [1, 1]} : vector<8x72xf32> to vector<1x72xf32>
    %68 = tpu.concatenate %66, %67 in 0 : vector<1x72xf32>, vector<1x72xf32> -> vector<2x72xf32>
    %c7 = arith.constant 7 : index
    %c0_38 = arith.constant 0 : index
    %c0_39 = arith.constant 0 : index
    %69 = vector.load %arg9[%c7, %c0_38, %c0_39] : memref<8x72x1024xf32, #tpu.memory_space<vmem>>, vector<1x72x1024xf32>
    %70 = vector.shape_cast %69 : vector<1x72x1024xf32> to vector<72x1024xf32>
    %cst_40 = arith.constant dense<0.000000e+00> : vector<2x1024xf32>
    %71 = tpu.matmul %68, %70, %cst_40 {dimension_numbers = #tpu.dot_dimension_numbers<[1], [0], [0], [1], [0, 0, 1, 1], [], []>} : vector<2x72xf32>, vector<72x1024xf32>, vector<2x1024xf32> -> vector<2x1024xf32>
    %72 = arith.addf %65, %71 : vector<2x1024xf32>
    %c0_41 = arith.constant 0 : index
    %c0_42 = arith.constant 0 : index
    %73 = vector.load %arg5[%c0_41, %c0_42] : memref<1x1024xf32, #tpu.memory_space<vmem>>, vector<1x1024xf32>
    %74 = vector.broadcast %73 : vector<1x1024xf32> to vector<2x1024xf32>
    %75 = arith.addf %72, %74 : vector<2x1024xf32>
    %cst_43 = arith.constant 0.000000e+00 : f32
    %76 = vector.broadcast %cst_43 : f32 to vector<2x1024xf32>
    %77 = arith.maximumf %75, %76 : vector<2x1024xf32>
    %c0_44 = arith.constant 0 : index
    %c0_45 = arith.constant 0 : index
    %78 = vector.load %arg6[%c0_44, %c0_45] : memref<1024x5xf32, #tpu.memory_space<vmem>>, vector<1024x5xf32>
    %cst_46 = arith.constant dense<0.000000e+00> : vector<2x5xf32>
    %79 = tpu.matmul %77, %78, %cst_46 {dimension_numbers = #tpu.dot_dimension_numbers<[1], [0], [0], [1], [0, 0, 1, 1], [], []>} : vector<2x1024xf32>, vector<1024x5xf32>, vector<2x5xf32> -> vector<2x5xf32>
    %c0_47 = arith.constant 0 : index
    %c0_48 = arith.constant 0 : index
    %80 = vector.load %arg7[%c0_47, %c0_48] : memref<1x5xf32, #tpu.memory_space<vmem>>, vector<1x5xf32>
    %81 = vector.broadcast %80 : vector<1x5xf32> to vector<2x5xf32>
    %82 = arith.addf %79, %81 : vector<2x5xf32>
    %c0_49 = arith.constant 0 : index
    %c0_50 = arith.constant 0 : index
    %83 = vector.load %arg8[%c0_49, %c0_50] : memref<2x5xf32, #tpu.memory_space<vmem>>, vector<2x5xf32>
    tpu.vector_store %arg8[%c0_49, %c0_50], %82 {strides = array<i32>} : memref<2x5xf32, #tpu.memory_space<vmem>>, vector<2x5xf32>,
    return
  }
  func.func @transform_0(%arg0: i32) -> (i32, i32, i32) {
    %c0_i32 = arith.constant 0 : i32
    %c0_i32_0 = arith.constant 0 : i32
    %c0_i32_1 = arith.constant 0 : i32
    %c0_i32_2 = arith.constant 0 : i32
    return %c0_i32, %c0_i32_0, %c0_i32_1 : i32, i32, i32
  }
  func.func @transform_1(%arg0: i32) -> (i32, i32) {
    %c0_i32 = arith.constant 0 : i32
    %c0_i32_0 = arith.constant 0 : i32
    %c0_i32_1 = arith.constant 0 : i32
    return %c0_i32, %c0_i32_0 : i32, i32
  }
  func.func @transform_2(%arg0: i32) -> (i32, i32) {
    %c0_i32 = arith.constant 0 : i32
    %c0_i32_0 = arith.constant 0 : i32
    %c0_i32_1 = arith.constant 0 : i32
    return %c0_i32, %c0_i32_0 : i32, i32
  }
  func.func @transform_4(%arg0: i32) -> (i32, i32) {
    %c0_i32 = arith.constant 0 : i32
    %c0_i32_0 = arith.constant 0 : i32
    %c0_i32_1 = arith.constant 0 : i32
    return %c0_i32, %c0_i32_0 : i32, i32
  }
  func.func @transform_5(%arg0: i32) -> (i32, i32) {
    %c0_i32 = arith.constant 0 : i32
    %c0_i32_0 = arith.constant 0 : i32
    %c0_i32_1 = arith.constant 0 : i32
    return %c0_i32, %c0_i32_0 : i32, i32
  }
  func.func @transform_6(%arg0: i32) -> (i32, i32) {
    %c0_i32 = arith.constant 0 : i32
    %c0_i32_0 = arith.constant 0 : i32
    %c0_i32_1 = arith.constant 0 : i32
    return %c0_i32, %c0_i32_0 : i32, i32
  }
  func.func @transform_7(%arg0: i32) -> (i32, i32) {
    %c0_i32 = arith.constant 0 : i32
    %c0_i32_0 = arith.constant 0 : i32
    %c0_i32_1 = arith.constant 0 : i32
    return %c0_i32, %c0_i32_0 : i32, i32
  }
}

</mosaic_0001>

<bundles_post_ra>
// kernel: cnn3dle_forward.2
= control target key start
LH: loop header
LB: loop body
LE: loop exit
PB: predicated region body
PF: predicated region fallthrough
CT: control target
= control target key end

     0   :  { %vm65_vm0 = vcmask 1042432   ;;  %v1144_v3 = vmov 0.0   ;;  %v1145_v8 = vmov 0   ;;  %vm1146_vm1 = vmmov 1   ;;  %s1536_s0 = inlined_call_operand.vmem [shape: f32[2,27,1176], index: 0, kind: input, shape index: {}]   ;;  %s1537_s1 = inlined_call_operand.vmem [shape: f32[4,27], index: 1, kind: input, shape index: {}]   ;;  %s1538_s2 = inlined_call_operand.vmem [shape: f32[4,1], index: 2, kind: input, shape index: {}]   ;;  %s1539_s3 = inlined_call_operand.vmem [shape: f32[2,4,1176], index: 3, kind: output, shape index: {}]  }
   0x1   :  { %v16_v0 = vld [vmem:[%s1536_s0 + $0x8] sm:$0xff]  ;;  %v26_v1 = vld [vmem:[%s1536_s0 + $0x58] sm:$0xff]  ;;  %160 = vmatprep.mubr.f32.mxu0 %v1144_v3  ;;  %231 = vmatprep.mubr.f32.mxu1 %v1144_v3  ;;  %v15_v6 = vld [vmem:[%s1536_s0] sm:$0xff]  ;;  %vm61_vm3 = vcmask 220160   ;;  %vm485_vm4 = vcmask 1043456   ;;  %vm486_vm5 = vcmask 195588  }
   0x2   :  { %v18_v2 = vld [vmem:[%s1536_s0 + $0x18] sm:$0xff]  ;;  %v1040_v4 = vpack.c.bf16 %v26_v1, %v16_v0  ;;  %v28_v5 = vld [vmem:[%s1536_s0 + $0x68] sm:$0xff]  ;;  %v25_v7 = vld [vmem:[%s1536_s0 + $0x50] sm:$0xff]  ;;  %1143 = vset.pattern.permute.xlu0 %v1145_v8 }
   0x3   :  { %v1050_v9 = vpack.c.bf16 %v28_v5, %v18_v2  ;;  %v1042_v10 = vpack.c.bf16 %v25_v7, %v15_v6  ;;  %v17_v11 = vld [vmem:[%s1536_s0 + $0x10] sm:$0xff]  ;;  %v27_v12 = vld [vmem:[%s1536_s0 + $0x60] sm:$0xff]  ;;  %v36_v13 = vld [vmem:[%s1536_s0 + $0xa8] sm:$0xff] }
   0x4   :  { %1041 = vmatprep.subr.bf16.mxu0 %v1040_v4  ;;  %v1052_v14 = vpack.c.bf16 %v27_v12, %v17_v11  ;;  %v46_v15 = vld [vmem:[%s1536_s0 + $0xf8] sm:$0x7]  ;;  %vm1200_vm2 = vmpackc.low %vm65_vm0, %vm1146_vm1  ;;  %v48_v19 = vld [vmem:[%s1536_s0 + $0x108] sm:$0x7] }
   0x5   :  { %v38_v17 = vld [vmem:[%s1536_s0 + $0xb8] sm:$0xff]  ;;  %1051 = vmatprep.subr.bf16.mxu1 %v1050_v9  ;;  %1043 = vmatpush1.bf16.msra.mxu0 %v1042_v10  ;;  %v1044_v18 = vpack.c.bf16 %v46_v15, %v36_v13  ;;  %v35_v20 = vld [vmem:[%s1536_s0 + $0xa0] sm:$0xff]  ;;  %v45_v21 = vld [vmem:[%s1536_s0 + $0xf0] sm:$0x7] }
   0x6   :  { %1053 = vmatpush1.bf16.msra.mxu1 %v1052_v14  ;;  %v1054_v22 = vpack.c.bf16 %v48_v19, %v38_v17  ;;  %v1047_v23 = vpack.c.bf16 %v45_v21, %v35_v20  ;;  %v37_v24 = vld [vmem:[%s1536_s0 + $0xb0] sm:$0xff]  ;;  %v47_v25 = vld [vmem:[%s1536_s0 + $0x100] sm:$0x7]  ;;  %v20_v28 = vld [vmem:[%s1536_s0 + $0x28] sm:$0xff] }
   0x7   :  { %1046 = vmatprep.subr.msk.bf16.mxu0 %vm1200_vm2, %v1044_v18  ;;  %v1057_v26 = vpack.c.bf16 %v47_v25, %v37_v24  ;;  %v1227_v27 = vld [vmem:[%s1537_s1] sm:$0xf]  ;;  %v30_v29 = vld [vmem:[%s1536_s0 + $0x78] sm:$0xff]  ;;  %v32_v32 = vld [vmem:[%s1536_s0 + $0x88] sm:$0xff] }
   0x8   :  { %v22_v30 = vld [vmem:[%s1536_s0 + $0x38] sm:$0xff]  ;;  %1056 = vmatprep.subr.msk.bf16.mxu1 %vm1200_vm2, %v1054_v22  ;;  %v1060_v31 = vpack.c.bf16 %v30_v29, %v20_v28  ;;  %v19_v33 = vld [vmem:[%s1536_s0 + $0x20] sm:$0xff]  ;;  %v29_v34 = vld [vmem:[%s1536_s0 + $0x70] sm:$0xff] }
   0x9   :  { %1049 = vmatpush1.bf16.msk.msra.mxu0 %vm1200_vm2, %v1047_v23  ;;  %v1070_v35 = vpack.c.bf16 %v32_v32, %v22_v30  ;;  %v1062_v36 = vpack.c.bf16 %v29_v34, %v19_v33  ;;  %v21_v37 = vld [vmem:[%s1536_s0 + $0x30] sm:$0xff]  ;;  %v31_v38 = vld [vmem:[%s1536_s0 + $0x80] sm:$0xff]  ;;  %v40_v39 = vld [vmem:[%s1536_s0 + $0xc8] sm:$0xff] }
   0xa   :  { %1059 = vmatpush1.bf16.msk.msra.mxu1 %vm1200_vm2, %v1057_v26  ;;  %1061 = vmatprep.subr.bf16.mxu0 %v1060_v31  ;;  %v1072_v40 = vpack.c.bf16 %v31_v38, %v21_v37  ;;  %v50_v41 = vld [vmem:[%s1536_s0 + $0x118] sm:$0x7]  ;;  %v52_v43 = vld [vmem:[%s1536_s0 + $0x128] sm:$0x7]  ;;  %v39_v46 = vld [vmem:[%s1536_s0 + $0xc0] sm:$0xff] }
   0xb   :  { %v42_v42 = vld [vmem:[%s1536_s0 + $0xd8] sm:$0xff]  ;;  %1071 = vmatprep.subr.bf16.mxu1 %v1070_v35  ;;  %v1064_v44 = vpack.c.bf16 %v50_v41, %v40_v39  ;;  %v49_v47 = vld [vmem:[%s1536_s0 + $0x110] sm:$0x7]  ;;  %v51_v49 = vld [vmem:[%s1536_s0 + $0x120] sm:$0x7] }
   0xc   :  { %v1074_v45 = vpack.c.bf16 %v52_v43, %v42_v42  ;;  %v41_v48 = vld [vmem:[%s1536_s0 + $0xd0] sm:$0xff]  ;;  %967 = vmatmul.mubr.msk.f32.vlgmr.msra.gmra.mrb[0].mxu0 %vm61_vm3, %v1227_v27  ;;  %v24_v50 = vld [vmem:[%s1536_s0 + $0x48] sm:$0xff]  ;;  %v34_v51 = vld [vmem:[%s1536_s0 + $0x98] sm:$0xff]  ;;  %v1067_v52 = vpack.c.bf16 %v49_v47, %v39_v46 }
   0xd   :  { %970 = vmatmul.mubr.msk.f32.vlgmr.msra.gmra.mrb[0].mxu1 %vm61_vm3, %v1227_v27  ;;  %1063 = vmatpush1.bf16.msra.mxu0 %v1062_v36  ;;  %v981_v53 = vld [vmem:[%s1536_s0 + $0x148] sm:$0xff]  ;;  %v991_v54 = vld [vmem:[%s1536_s0 + $0x198] sm:$0xff]  ;;  %v1077_v55 = vpack.c.bf16 %v51_v49, %v41_v48  ;;  %v1080_v56 = vpack.c.bf16 %v34_v51, %v24_v50  ;;  %v23_v57 = vld [vmem:[%s1536_s0 + $0x40] sm:$0xff] }
   0xe   :  { %1073 = vmatpush1.bf16.msra.mxu1 %v1072_v40  ;;  %1066 = vmatprep.subr.msk.bf16.mxu0 %vm1200_vm2, %v1064_v44  ;;  %v33_v58 = vld [vmem:[%s1536_s0 + $0x90] sm:$0xff]  ;;  %v980_v59 = vld [vmem:[%s1536_s0 + $0x140] sm:$0xff]  ;;  %v1090_v60 = vpack.c.bf16 %v991_v54, %v981_v53  ;;  %v44_v62 = vld [vmem:[%s1536_s0 + $0xe8] sm:$0xff] }
   0xf   :  { %1076 = vmatprep.subr.msk.bf16.mxu1 %vm1200_vm2, %v1074_v45  ;;  %302 = vmatprep.mubr.f32.mxu0 %v1144_v3  ;;  %v990_v61 = vld [vmem:[%s1536_s0 + $0x190] sm:$0xff]  ;;  %v54_v63 = vld [vmem:[%s1536_s0 + $0x138] sm:$0x7]  ;;  %v1001_v0 = vld [vmem:[%s1536_s0 + $0x1e8] sm:$0xff]  ;;  %v1082_v2 = vpack.c.bf16 %v33_v58, %v23_v57 }
  0x10   :  { %373 = vmatprep.mubr.f32.mxu1 %v1144_v3  ;;  %v1011_v1 = vld [vmem:[%s1536_s0 + $0x238] sm:$0x7]  ;;  %v1092_v4 = vpack.c.bf16 %v990_v61, %v980_v59  ;;  %v1084_v5 = vpack.c.bf16 %v54_v63, %v44_v62  ;;  %v43_v6 = vld [vmem:[%s1536_s0 + $0xe0] sm:$0xff]  ;;  %v53_v7 = vld [vmem:[%s1536_s0 + $0x130] sm:$0x7] }
  0x11   :  { %1069 = vmatpush1.bf16.msk.msra.mxu0 %vm1200_vm2, %v1067_v52  ;;  %v1000_v8 = vld [vmem:[%s1536_s0 + $0x1e0] sm:$0xff]  ;;  %v1094_v9 = vpack.c.bf16 %v1011_v1, %v1001_v0  ;;  %v1010_v10 = vld [vmem:[%s1536_s0 + $0x230] sm:$0x7]  ;;  %v983_v11 = vld [vmem:[%s1536_s0 + $0x158] sm:$0xff]  ;;  %v1087_v15 = vpack.c.bf16 %v53_v7, %v43_v6 }
  0x12   :  { %1079 = vmatpush1.bf16.msk.msra.mxu1 %vm1200_vm2, %v1077_v55  ;;  %1081 = vmatprep.subr.bf16.mxu0 %v1080_v56  ;;  %v993_v12 = vld [vmem:[%s1536_s0 + $0x1a8] sm:$0xff]  ;;  %v995_v14 = vld [vmem:[%s1536_s0 + $0x1b8] sm:$0xff]  ;;  %v1097_v17 = vpack.c.bf16 %v1010_v10, %v1000_v8  ;;  %v982_v19 = vld [vmem:[%s1536_s0 + $0x150] sm:$0xff] }
  0x13   :  { %1091 = vmatprep.subr.bf16.mxu1 %v1090_v60  ;;  %v985_v13 = vld [vmem:[%s1536_s0 + $0x168] sm:$0xff]  ;;  %v1100_v18 = vpack.c.bf16 %v993_v12, %v983_v11  ;;  %v992_v20 = vld [vmem:[%s1536_s0 + $0x1a0] sm:$0xff]  ;;  %v994_v23 = vld [vmem:[%s1536_s0 + $0x1b0] sm:$0xff] }
  0x14   :  { %973 = vmatmul.mubr.msk.f32.vlgmr.msra.gmra.mrb[2].mxu0 %vm61_vm3, %v1227_v27  ;;  %v984_v21 = vld [vmem:[%s1536_s0 + $0x160] sm:$0xff]  ;;  %v1110_v22 = vpack.c.bf16 %v995_v14, %v985_v13  ;;  %v1003_v24 = vld [vmem:[%s1536_s0 + $0x1f8] sm:$0xff]  ;;  %v1013_v25 = vld [vmem:[%s1536_s0 + $0x248] sm:$0x7]  ;;  %v1102_v30 = vpack.c.bf16 %v992_v20, %v982_v19 }
  0x15   :  { %976 = vmatmul.mubr.msk.f32.vlgmr.msra.gmra.mrb[2].mxu1 %vm61_vm3, %v1227_v27  ;;  %1083 = vmatpush1.bf16.msra.mxu0 %v1082_v2  ;;  %v1005_v26 = vld [vmem:[%s1536_s0 + $0x208] sm:$0xff]  ;;  %v1015_v28 = vld [vmem:[%s1536_s0 + $0x258] sm:$0x7]  ;;  %v1396_v29 = vld [vmem:[%s1537_s1] sm:$0xf]  ;;  %v1112_v31 = vpack.c.bf16 %v994_v23, %v984_v21  ;;  %v1104_v32 = vpack.c.bf16 %v1013_v25, %v1003_v24 }
  0x16   :  { %1093 = vmatpush1.bf16.msra.mxu1 %v1092_v4  ;;  %1086 = vmatprep.subr.msk.bf16.mxu0 %vm1200_vm2, %v1084_v5  ;;  %v1002_v33 = vld [vmem:[%s1536_s0 + $0x1f0] sm:$0xff]  ;;  %v1012_v34 = vld [vmem:[%s1536_s0 + $0x240] sm:$0x7]  ;;  %v1114_v36 = vpack.c.bf16 %v1015_v28, %v1005_v26  ;;  %v987_v38 = vld [vmem:[%s1536_s0 + $0x178] sm:$0xff] }
  0x17   :  { %1096 = vmatprep.subr.msk.bf16.mxu1 %vm1200_vm2, %v1094_v9  ;;  %444 = vmatprep.mubr.f32.mxu0 %v1144_v3  ;;  %v1004_v35 = vld [vmem:[%s1536_s0 + $0x200] sm:$0xff]  ;;  %v1014_v37 = vld [vmem:[%s1536_s0 + $0x250] sm:$0x7]  ;;  %v997_v39 = vld [vmem:[%s1536_s0 + $0x1c8] sm:$0xff]  ;;  %v1107_v42 = vpack.c.bf16 %v1012_v34, %v1002_v33 }
  0x18   :  { %634 = vmatprep.mubr.f32.mxu1 %v1144_v3  ;;  %v989_v40 = vld [vmem:[%s1536_s0 + $0x188] sm:$0xff]  ;;  %v999_v41 = vld [vmem:[%s1536_s0 + $0x1d8] sm:$0xff]  ;;  %v55_v43 = vld [vmem:[%s1538_s2] sm:$0xf]  ;;  %v1120_v44 = vpack.c.bf16 %v997_v39, %v987_v38 }
  0x19   :  { %1089 = vmatpush1.bf16.msk.msra.mxu0 %vm1200_vm2, %v1087_v15  ;;  %v986_v45 = vld [vmem:[%s1536_s0 + $0x170] sm:$0xff]  ;;  %v996_v46 = vld [vmem:[%s1536_s0 + $0x1c0] sm:$0xff]  ;;  %v1130_v48 = vpack.c.bf16 %v999_v41, %v989_v40  ;;  %v1007_v50 = vld [vmem:[%s1536_s0 + $0x218] sm:$0xff]  ;;  %58 = vperm.xlu0 %1143, %v55_v43  }
  0x1a   :  { %1099 = vmatpush1.bf16.msk.msra.mxu1 %vm1200_vm2, %v1097_v17  ;;  %1101 = vmatprep.subr.bf16.mxu0 %v1100_v18  ;;  %v988_v47 = vld [vmem:[%s1536_s0 + $0x180] sm:$0xff]  ;;  %v998_v49 = vld [vmem:[%s1536_s0 + $0x1d0] sm:$0xff]  ;;  %v1017_v51 = vld [vmem:[%s1536_s0 + $0x268] sm:$0x7]  ;;  %v1122_v54 = vpack.c.bf16 %v996_v46, %v986_v45 }
  0x1b   :  { %1111 = vmatprep.subr.bf16.mxu1 %v1110_v22  ;;  %v1009_v52 = vld [vmem:[%s1536_s0 + $0x228] sm:$0xff]  ;;  %v1019_v53 = vld [vmem:[%s1536_s0 + $0x278] sm:$0x7]  ;;  %v531_v55 = vld [vmem:[%s1538_s2] sm:$0xf]  ;;  %v1132_v56 = vpack.c.bf16 %v998_v49, %v988_v47  ;;  %v1124_v57 = vpack.c.bf16 %v1017_v51, %v1007_v50 }
  0x1c   :  { %979 = vmatmul.mubr.msk.f32.vlgmr.msra.gmra.mrb[4].mxu0 %vm61_vm3, %v1227_v27  ;;  %v1117_v27 = vpack.c.bf16 %v1014_v37, %v1004_v35  ;;  %v1006_v58 = vld [vmem:[%s1536_s0 + $0x210] sm:$0xff]  ;;  %v1016_v59 = vld [vmem:[%s1536_s0 + $0x260] sm:$0x7]  ;;  %v1134_v60 = vpack.c.bf16 %v1019_v53, %v1009_v52  ;;  %vm1510_vm6 = vmor %vm486_vm5, %vm485_vm4 }
  0x1d   :  { %1022 = vmatmul.mubr.msk.f32.vlgmr.msra.gmra.mrb[4].mxu1 %vm61_vm3, %v1396_v29  ;;  %1103 = vmatpush1.bf16.msra.mxu0 %v1102_v30  ;;  %v1008_v61 = vld [vmem:[%s1536_s0 + $0x220] sm:$0xff]  ;;  %v1018_v62 = vld [vmem:[%s1536_s0 + $0x270] sm:$0x7]  ;;  %v1127_v63 = vpack.c.bf16 %v1016_v59, %v1006_v58 }
  0x1e   :  { %1113 = vmatpush1.bf16.msra.mxu1 %v1112_v31  ;;  %1106 = vmatprep.subr.msk.bf16.mxu0 %vm1200_vm2, %v1104_v32  ;;  %v1137_v0 = vpack.c.bf16 %v1018_v62, %v1008_v61 }
  0x1f   :  { %1116 = vmatprep.subr.msk.bf16.mxu1 %vm1200_vm2, %v1114_v36  ;;  %705 = vmatprep.mubr.f32.mxu0 %v1144_v3 }
  0x20   :  { %776 = vmatprep.mubr.f32.mxu1 %v1144_v3  ;;  %534 = vperm.xlu0 %1143, %v531_v55  }
  0x21   :  { %1109 = vmatpush1.bf16.msk.msra.mxu0 %vm1200_vm2, %v1107_v42 }
  0x22   :  { %1119 = vmatpush1.bf16.msk.msra.mxu1 %vm1200_vm2, %v1117_v27  ;;  %1121 = vmatprep.subr.bf16.mxu0 %v1120_v44 }
  0x23   :  { %1131 = vmatprep.subr.bf16.mxu1 %v1130_v48 }
  0x24   :  { %1025 = vmatmul.mubr.msk.f32.vlgmr.msra.gmra.mrb[6].mxu0 %vm61_vm3, %v1396_v29 }
  0x25   :  { %1028 = vmatmul.mubr.msk.f32.vlgmr.msra.gmra.mrb[6].mxu1 %vm61_vm3, %v1396_v29  ;;  %1123 = vmatpush1.bf16.msra.mxu0 %v1122_v54 }
  0x26   :  { %1133 = vmatpush1.bf16.msra.mxu1 %v1132_v56  ;;  %1126 = vmatprep.subr.msk.bf16.mxu0 %vm1200_vm2, %v1124_v57 }
  0x27   :  { %1136 = vmatprep.subr.msk.bf16.mxu1 %vm1200_vm2, %v1134_v60  ;;  %847 = vmatprep.mubr.f32.mxu0 %v1144_v3 }
  0x28   :  { %918 = vmatprep.mubr.f32.mxu1 %v1144_v3 }
  0x29   :  { %1129 = vmatpush1.bf16.msk.msra.mxu0 %vm1200_vm2, %v1127_v63 }
  0x2a   :  { %1139 = vmatpush1.bf16.msk.msra.mxu1 %vm1200_vm2, %v1137_v0 }
  0x2c   :  { %1031 = vmatmul.mubr.msk.f32.vlgmr.msra.gmra.mrb[8].mxu0 %vm61_vm3, %v1396_v29 }
  0x2d   :  { %1034 = vmatmul.mubr.msk.f32.vlgmr.msra.gmra.mrb[8].mxu1 %vm61_vm3, %v1396_v29 }
  0x98   :  { %v59_v1 = vpop.permute.xlu0 %58 }
  0x9f   :  { %v535_v31 = vpop.permute.xlu0 %534 }
  0xdf   :  { %v162_v2 = vpop.f32.mrb[0].mxu0 }
  0xe0   :  { %v233_v4 = vpop.f32.mrb[0].mxu1  ;;  %v163_v5 = vadd.f32 %v162_v2, %v59_v1  ;;  %v164_v6 = vpop.f32.mrb[1].mxu0 }
  0xe1   :  { %v165_v7 = vadd.f32 %v164_v6, %v59_v1  ;;  %v234_v8 = vadd.f32 %v233_v4, %v59_v1  ;;  %v235_v3 = vpop.f32.mrb[1].mxu1 }
  0xe2   :  { %v451_v9 = vmax.f32 %v163_v5, 0.0  ;;  %v236_v10 = vadd.f32 %v235_v3, %v59_v1 }
  0xe3   :  { %v452_v11 = vmax.f32 %v165_v7, 0.0  ;;  %v453_v12 = vmax.f32 %v234_v8, 0.0 }
  0xe4   :  { %v454_v16 = vmax.f32 %v236_v10, 0.0 }
  0xe5   :  { %v471_v13 = vcombine.low %v451_v9, %v452_v11 }
  0xe6   :  { %v472_v14 = vcombine.low %v453_v12, %v454_v16 }
  0xe7   :  { %481 = vst [vmem:[%s1539_s3] sm:$0xff] %v471_v13  ;;  %v304_v15 = vpop.f32.mrb[2].mxu0 }
  0xe8   :  { %482 = vst [vmem:[%s1539_s3 + $0x8] sm:$0xff] %v472_v14  ;;  %v305_v17 = vadd.f32 %v304_v15, %v59_v1  ;;  %v375_v18 = vpop.f32.mrb[2].mxu1  ;;  %v306_v19 = vpop.f32.mrb[3].mxu0 }
  0xe9   :  { %v376_v20 = vadd.f32 %v375_v18, %v59_v1  ;;  %v307_v21 = vadd.f32 %v306_v19, %v59_v1  ;;  %v377_v22 = vpop.f32.mrb[3].mxu1 }
  0xea   :  { %v455_v23 = vmax.f32 %v305_v17, 0.0  ;;  %v378_v24 = vadd.f32 %v377_v22, %v59_v1 }
  0xeb   :  { %v457_v25 = vmax.f32 %v376_v20, 0.0  ;;  %v456_v26 = vmax.f32 %v307_v21, 0.0 }
  0xec   :  { %v458_v28 = vmax.f32 %v378_v24, 0.0 }
  0xed   :  { %v473_v29 = vcombine.low %v455_v23, %v456_v26 }
  0xee   :  { %v474_v30 = vcombine.low %v457_v25, %v458_v28 }
  0xef   :  { %483 = vst [vmem:[%s1539_s3 + $0x10] sm:$0xff] %v473_v29  ;;  %v446_v32 = vpop.f32.mrb[4].mxu0 }
  0xf0   :  { %484 = vst [vmem:[%s1539_s3 + $0x18] sm:$0xff] %v474_v30  ;;  %v447_v33 = vadd.f32 %v446_v32, %v59_v1  ;;  %v636_v34 = vpop.f32.mrb[4].mxu1  ;;  %v448_v35 = vpop.f32.mrb[5].mxu0 }
  0xf1   :  { %v449_v36 = vadd.f32 %v448_v35, %v59_v1  ;;  %v637_v37 = vadd.f32 %v636_v34, %v535_v31  ;;  %v638_v38 = vpop.f32.mrb[5].mxu1 }
  0xf2   :  { %v459_v39 = vmax.f32 %v447_v33, 0.0  ;;  %v639_v40 = vadd.f32 %v638_v38, %v535_v31 }
  0xf3   :  { %v460_v41 = vmax.f32 %v449_v36, 0.0  ;;  %v925_v42 = vmax.f32 %v637_v37, 0.0 }
  0xf4   :  { %v926_v27 = vmax.f32 %v639_v40, 0.0 }
  0xf5   :  { %v475_v44 = vcombine.low %v459_v39, %v460_v41 }
  0xf6   :  { %v945_v45 = vcombine.low %v925_v42, %v926_v27 }
  0xf7   :  { %488 = vst.msk [vmem:[%s1539_s3 + $0x20] sm:$0xff] %vm1510_vm6, %v475_v44  ;;  %v707_v46 = vpop.f32.mrb[6].mxu0 }
  0xf8   :  { %1035 = vst [vmem:[%s1539_s3 + $0x28] sm:$0xff] %v945_v45  ;;  %v708_v47 = vadd.f32 %v707_v46, %v535_v31  ;;  %v778_v48 = vpop.f32.mrb[6].mxu1  ;;  %v709_v49 = vpop.f32.mrb[7].mxu0 }
  0xf9   :  { %v779_v50 = vadd.f32 %v778_v48, %v535_v31  ;;  %v710_v51 = vadd.f32 %v709_v49, %v535_v31  ;;  %v780_v52 = vpop.f32.mrb[7].mxu1 }
  0xfa   :  { %v927_v53 = vmax.f32 %v708_v47, 0.0  ;;  %v781_v54 = vadd.f32 %v780_v52, %v535_v31 }
  0xfb   :  { %v929_v55 = vmax.f32 %v779_v50, 0.0  ;;  %v928_v56 = vmax.f32 %v710_v51, 0.0 }
  0xfc   :  { %v930_v57 = vmax.f32 %v781_v54, 0.0 }
  0xfd   :  { %v946_v58 = vcombine.low %v927_v53, %v928_v56 }
  0xfe   :  { %v947_v59 = vcombine.low %v929_v55, %v930_v57 }
  0xff   :  { %1036 = vst [vmem:[%s1539_s3 + $0x30] sm:$0xff] %v946_v58  ;;  %v849_v60 = vpop.f32.mrb[8].mxu0 }
 0x100   :  { %1037 = vst [vmem:[%s1539_s3 + $0x38] sm:$0xff] %v947_v59  ;;  %v850_v61 = vadd.f32 %v849_v60, %v535_v31  ;;  %v920_v62 = vpop.f32.mrb[8].mxu1  ;;  %v851_v63 = vpop.f32.mrb[9].mxu0 }
 0x101   :  { %v921_v0 = vadd.f32 %v920_v62, %v535_v31  ;;  %v852_v1 = vadd.f32 %v851_v63, %v535_v31  ;;  %v922_v2 = vpop.f32.mrb[9].mxu1 }
 0x102   :  { %v931_v4 = vmax.f32 %v850_v61, 0.0  ;;  %v923_v5 = vadd.f32 %v922_v2, %v535_v31 }
 0x103   :  { %v933_v6 = vmax.f32 %v921_v0, 0.0  ;;  %v932_v7 = vmax.f32 %v852_v1, 0.0 }
 0x104   :  { %v934_v8 = vmax.f32 %v923_v5, 0.0 }
 0x105   :  { %v948_v3 = vcombine.low %v931_v4, %v932_v7 }
 0x106   :  { %v949_v9 = vcombine.low %v933_v6, %v934_v8 }
 0x107   :  { %1038 = vst [vmem:[%s1539_s3 + $0x40] sm:$0xff] %v948_v3 }
 0x108   :  { %1039 = vst.msk [vmem:[%s1539_s3 + $0x48] sm:$0xff] %vm1510_vm6, %v949_v9 }

// kernel: cnn3dle_forward.3
= control target key start
LH: loop header
LB: loop body
LE: loop exit
PB: predicated region body
PF: predicated region fallthrough
CT: control target
= control target key end

     0   :  { %12 = vsyncpa [#allocation5], 0  ;;  %s10072_s0 = inlined_call_operand.vmem [shape: f32[2,108,72], index: 0, kind: input, shape index: {}]   ;;  %s10073_s1 = inlined_call_operand.vmem [shape: f32[8,108], index: 1, kind: input, shape index: {}]   ;;  %s10074_s2 = inlined_call_operand.vmem [shape: f32[8,1], index: 2, kind: input, shape index: {}]   ;;  %s10075_s3 = inlined_call_operand.vmem [shape: f32[8,72,1024], index: 3, kind: input, shape index: {}]   ;;  %s10076_s4 = inlined_call_operand.vmem [shape: f32[1,1024], index: 4, kind: input, shape index: {}]   ;;  %s10077_s5 = inlined_call_operand.vmem [shape: f32[1024,5], index: 5, kind: input, shape index: {}]   ;;  %s10078_s6 = inlined_call_operand.vmem [shape: f32[1,5], index: 6, kind: input, shape index: {}]   ;;  %s10079_s7 = inlined_call_operand.hbm [shape: f32[2,5], index: 7, kind: output, shape index: {}]  }
   0x1   :  { %v5987_v0 = vld [vmem:[%s10075_s3] sm:$0xff]  ;;  %v5992_v1 = vld [vmem:[%s10075_s3 + $0x8] sm:$0xff]  ;;  %v5997_v2 = vld [vmem:[%s10075_s3 + $0x10] sm:$0xff] }
   0x2   :  { %10084 = vst [vmem:[#allocation9_spill] sm:$0xff] %v5987_v0  ;;  %10085 = vst [vmem:[#allocation10_spill] sm:$0xff] %v5992_v1  ;;  %v6002_v3 = vld [vmem:[%s10075_s3 + $0x18] sm:$0xff]  ;;  %v6007_v4 = vld [vmem:[%s10075_s3 + $0x20] sm:$0xff] }
   0x3   :  { %10086 = vst [vmem:[#allocation11_spill] sm:$0xff] %v5997_v2  ;;  %10087 = vst [vmem:[#allocation12_spill] sm:$0xff] %v6002_v3  ;;  %v6012_v5 = vld [vmem:[%s10075_s3 + $0x28] sm:$0xff]  ;;  %v6017_v6 = vld [vmem:[%s10075_s3 + $0x30] sm:$0xff] }
   0x4   :  { %10088 = vst [vmem:[#allocation13_spill] sm:$0xff] %v6007_v4  ;;  %10089 = vst [vmem:[#allocation14_spill] sm:$0xff] %v6012_v5  ;;  %v6022_v7 = vld [vmem:[%s10075_s3 + $0x38] sm:$0xff]  ;;  %v6027_v8 = vld [vmem:[%s10075_s3 + $0x40] sm:$0xff] }
   0x5   :  { %10090 = vst [vmem:[#allocation15_spill] sm:$0xff] %v6017_v6  ;;  %10091 = vst [vmem:[#allocation16_spill] sm:$0xff] %v6022_v7  ;;  %v6032_v9 = vld [vmem:[%s10075_s3 + $0x48] sm:$0xff]  ;;  %v6037_v10 = vld [vmem:[%s10075_s3 + $0x50] sm:$0xff] }
   0x6   :  { %10092 = vst [vmem:[#allocation17_spill] sm:$0xff] %v6027_v8  ;;  %10093 = vst [vmem:[#allocation18_spill] sm:$0xff] %v6032_v9  ;;  %v6042_v11 = vld [vmem:[%s10075_s3 + $0x58] sm:$0xff]  ;;  %v6047_v12 = vld [vmem:[%s10075_s3 + $0x60] sm:$0xff] }
   0x7   :  { %10094 = vst [vmem:[#allocation19_spill] sm:$0xff] %v6037_v10  ;;  %10095 = vst [vmem:[#allocation20_spill] sm:$0xff] %v6042_v11  ;;  %v6052_v13 = vld [vmem:[%s10075_s3 + $0x68] sm:$0xff]  ;;  %v6057_v14 = vld [vmem:[%s10075_s3 + $0x70] sm:$0xff] }
   0x8   :  { %10096 = vst [vmem:[#allocation21_spill] sm:$0xff] %v6047_v12  ;;  %10097 = vst [vmem:[#allocation22_spill] sm:$0xff] %v6052_v13  ;;  %v6062_v15 = vld [vmem:[%s10075_s3 + $0x78] sm:$0xff]  ;;  %v6067_v16 = vld [vmem:[%s10075_s3 + $0x80] sm:$0xff] }
   0x9   :  { %10098 = vst [vmem:[#allocation23_spill] sm:$0xff] %v6057_v14  ;;  %10099 = vst [vmem:[#allocation24_spill] sm:$0xff] %v6062_v15  ;;  %v6072_v17 = vld [vmem:[%s10075_s3 + $0x88] sm:$0xff]  ;;  %v6077_v18 = vld [vmem:[%s10075_s3 + $0x90] sm:$0xff] }
   0xa   :  { %10100 = vst [vmem:[#allocation25_spill] sm:$0xff] %v6067_v16  ;;  %10101 = vst [vmem:[#allocation26_spill] sm:$0xff] %v6072_v17  ;;  %v6082_v19 = vld [vmem:[%s10075_s3 + $0x98] sm:$0xff]  ;;  %v6087_v20 = vld [vmem:[%s10075_s3 + $0xa0] sm:$0xff] }
   0xb   :  { %10102 = vst [vmem:[#allocation27_spill] sm:$0xff] %v6077_v18  ;;  %10103 = vst [vmem:[#allocation28_spill] sm:$0xff] %v6082_v19  ;;  %v6092_v21 = vld [vmem:[%s10075_s3 + $0xa8] sm:$0xff]  ;;  %v6097_v22 = vld [vmem:[%s10075_s3 + $0xb0] sm:$0xff] }
   0xc   :  { %10104 = vst [vmem:[#allocation29_spill] sm:$0xff] %v6087_v20  ;;  %10105 = vst [vmem:[#allocation30_spill] sm:$0xff] %v6092_v21  ;;  %v6102_v23 = vld [vmem:[%s10075_s3 + $0xb8] sm:$0xff]  ;;  %v6107_v24 = vld [vmem:[%s10075_s3 + $0xc0] sm:$0xff] }
   0xd   :  { %10106 = vst [vmem:[#allocation31_spill] sm:$0xff] %v6097_v22  ;;  %10107 = vst [vmem:[#allocation32_spill] sm:$0xff] %v6102_v23  ;;  %v6112_v25 = vld [vmem:[%s10075_s3 + $0xc8] sm:$0xff]  ;;  %v6117_v26 = vld [vmem:[%s10075_s3 + $0xd0] sm:$0xff] }
   0xe   :  { %10108 = vst [vmem:[#allocation33_spill] sm:$0xff] %v6107_v24  ;;  %10109 = vst [vmem:[#allocation34_spill] sm:$0xff] %v6112_v25  ;;  %v6122_v27 = vld [vmem:[%s10075_s3 + $0xd8] sm:$0xff]  ;;  %v6127_v28 = vld [vmem:[%s10075_s3 + $0xe0] sm:$0xff] }
   0xf   :  { %10110 = vst [vmem:[#allocation35_spill] sm:$0xff] %v6117_v26  ;;  %10111 = vst [vmem:[#allocation36_spill] sm:$0xff] %v6122_v27  ;;  %v6132_v29 = vld [vmem:[%s10075_s3 + $0xe8] sm:$0xff]  ;;  %v6137_v30 = vld [vmem:[%s10075_s3 + $0xf0] sm:$0xff] }
  0x10   :  { %10112 = vst [vmem:[#allocation37_spill] sm:$0xff] %v6127_v28  ;;  %10113 = vst [vmem:[#allocation38_spill] sm:$0xff] %v6132_v29  ;;  %v6142_v31 = vld [vmem:[%s10075_s3 + $0xf8] sm:$0xff]  ;;  %v6147_v32 = vld [vmem:[%s10075_s3 + $0x100] sm:$0xff] }
  0x11   :  { %10114 = vst [vmem:[#allocation39_spill] sm:$0xff] %v6137_v30  ;;  %10115 = vst [vmem:[#allocation40_spill] sm:$0xff] %v6142_v31  ;;  %v6152_v33 = vld [vmem:[%s10075_s3 + $0x108] sm:$0xff]  ;;  %v6157_v34 = vld [vmem:[%s10075_s3 + $0x110] sm:$0xff] }
  0x12   :  { %10116 = vst [vmem:[#allocation41_spill] sm:$0xff] %v6147_v32  ;;  %10117 = vst [vmem:[#allocation42_spill] sm:$0xff] %v6152_v33  ;;  %v6162_v35 = vld [vmem:[%s10075_s3 + $0x118] sm:$0xff]  ;;  %v6167_v36 = vld [vmem:[%s10075_s3 + $0x120] sm:$0xff] }
  0x13   :  { %10118 = vst [vmem:[#allocation43_spill] sm:$0xff] %v6157_v34  ;;  %10119 = vst [vmem:[#allocation44_spill] sm:$0xff] %v6162_v35  ;;  %v6172_v37 = vld [vmem:[%s10075_s3 + $0x128] sm:$0xff]  ;;  %v6177_v38 = vld [vmem:[%s10075_s3 + $0x130] sm:$0xff] }
  0x14   :  { %10120 = vst [vmem:[#allocation45_spill] sm:$0xff] %v6167_v36  ;;  %10121 = vst [vmem:[#allocation46_spill] sm:$0xff] %v6172_v37  ;;  %v6182_v39 = vld [vmem:[%s10075_s3 + $0x138] sm:$0xff]  ;;  %v6187_v40 = vld [vmem:[%s10075_s3 + $0x140] sm:$0xff] }
  0x15   :  { %10122 = vst [vmem:[#allocation47_spill] sm:$0xff] %v6177_v38  ;;  %10123 = vst [vmem:[#allocation48_spill] sm:$0xff] %v6182_v39  ;;  %v6192_v41 = vld [vmem:[%s10075_s3 + $0x148] sm:$0xff]  ;;  %v6197_v42 = vld [vmem:[%s10075_s3 + $0x150] sm:$0xff] }
  0x16   :  { %10124 = vst [vmem:[#allocation49_spill] sm:$0xff] %v6187_v40  ;;  %10125 = vst [vmem:[#allocation50_spill] sm:$0xff] %v6192_v41  ;;  %v6202_v43 = vld [vmem:[%s10075_s3 + $0x158] sm:$0xff]  ;;  %v6207_v44 = vld [vmem:[%s10075_s3 + $0x160] sm:$0xff] }
  0x17   :  { %10126 = vst [vmem:[#allocation51_spill] sm:$0xff] %v6197_v42  ;;  %10127 = vst [vmem:[#allocation52_spill] sm:$0xff] %v6202_v43  ;;  %v6212_v45 = vld [vmem:[%s10075_s3 + $0x168] sm:$0xff]  ;;  %v6217_v46 = vld [vmem:[%s10075_s3 + $0x170] sm:$0xff] }
  0x18   :  { %10128 = vst [vmem:[#allocation53_spill] sm:$0xff] %v6207_v44  ;;  %10129 = vst [vmem:[#allocation54_spill] sm:$0xff] %v6212_v45  ;;  %v6222_v47 = vld [vmem:[%s10075_s3 + $0x178] sm:$0xff]  ;;  %v6227_v48 = vld [vmem:[%s10075_s3 + $0x180] sm:$0xff] }
  0x19   :  { %10130 = vst [vmem:[#allocation55_spill] sm:$0xff] %v6217_v46  ;;  %10131 = vst [vmem:[#allocation56_spill] sm:$0xff] %v6222_v47  ;;  %v6232_v49 = vld [vmem:[%s10075_s3 + $0x188] sm:$0xff]  ;;  %v6237_v50 = vld [vmem:[%s10075_s3 + $0x190] sm:$0xff] }
  0x1a   :  { %10132 = vst [vmem:[#allocation57_spill] sm:$0xff] %v6227_v48  ;;  %10133 = vst [vmem:[#allocation58_spill] sm:$0xff] %v6232_v49  ;;  %v6242_v51 = vld [vmem:[%s10075_s3 + $0x198] sm:$0xff]  ;;  %v6247_v52 = vld [vmem:[%s10075_s3 + $0x1a0] sm:$0xff] }
  0x1b   :  { %10134 = vst [vmem:[#allocation59_spill] sm:$0xff] %v6237_v50  ;;  %10135 = vst [vmem:[#allocation60_spill] sm:$0xff] %v6242_v51  ;;  %v6252_v53 = vld [vmem:[%s10075_s3 + $0x1a8] sm:$0xff]  ;;  %v6257_v54 = vld [vmem:[%s10075_s3 + $0x1b0] sm:$0xff] }
  0x1c   :  { %10136 = vst [vmem:[#allocation61_spill] sm:$0xff] %v6247_v52  ;;  %10137 = vst [vmem:[#allocation62_spill] sm:$0xff] %v6252_v53  ;;  %v6262_v55 = vld [vmem:[%s10075_s3 + $0x1b8] sm:$0xff]  ;;  %v6267_v56 = vld [vmem:[%s10075_s3 + $0x1c0] sm:$0xff] }
  0x1d   :  { %10138 = vst [vmem:[#allocation63_spill] sm:$0xff] %v6257_v54  ;;  %10139 = vst [vmem:[#allocation64_spill] sm:$0xff] %v6262_v55  ;;  %v6272_v57 = vld [vmem:[%s10075_s3 + $0x1c8] sm:$0xff]  ;;  %v6277_v58 = vld [vmem:[%s10075_s3 + $0x1d0] sm:$0xff] }
  0x1e   :  { %10140 = vst [vmem:[#allocation65_spill] sm:$0xff] %v6267_v56  ;;  %10141 = vst [vmem:[#allocation66_spill] sm:$0xff] %v6272_v57  ;;  %v6282_v59 = vld [vmem:[%s10075_s3 + $0x1d8] sm:$0xff]  ;;  %v6287_v60 = vld [vmem:[%s10075_s3 + $0x1e0] sm:$0xff] }
  0x1f   :  { %10142 = vst [vmem:[#allocation67_spill] sm:$0xff] %v6277_v58  ;;  %10143 = vst [vmem:[#allocation68_spill] sm:$0xff] %v6282_v59  ;;  %v6292_v61 = vld [vmem:[%s10075_s3 + $0x1e8] sm:$0xff]  ;;  %v6297_v62 = vld [vmem:[%s10075_s3 + $0x1f0] sm:$0xff] }
  0x20   :  { %10144 = vst [vmem:[#allocation69_spill] sm:$0xff] %v6287_v60  ;;  %10145 = vst [vmem:[#allocation70_spill] sm:$0xff] %v6292_v61  ;;  %v6302_v63 = vld [vmem:[%s10075_s3 + $0x1f8] sm:$0xff]  ;;  %v6307_v54 = vld [vmem:[%s10075_s3 + $0x200] sm:$0xff] }
  0x21   :  { %10146 = vst [vmem:[#allocation71_spill] sm:$0xff] %v6297_v62  ;;  %10147 = vst [vmem:[#allocation72_spill] sm:$0xff] %v6302_v63  ;;  %v6312_v60 = vld [vmem:[%s10075_s3 + $0x208] sm:$0xff]  ;;  %v6317_v52 = vld [vmem:[%s10075_s3 + $0x210] sm:$0xff] }
  0x22   :  { %10148 = vst [vmem:[#allocation73_spill] sm:$0xff] %v6307_v54  ;;  %10149 = vst [vmem:[#allocation74_spill] sm:$0xff] %v6312_v60  ;;  %v6322_v62 = vld [vmem:[%s10075_s3 + $0x218] sm:$0xff]  ;;  %v6327_v63 = vld [vmem:[%s10075_s3 + $0x220] sm:$0xff] }
  0x23   :  { %10150 = vst [vmem:[#allocation75_spill] sm:$0xff] %v6317_v52  ;;  %10151 = vst [vmem:[#allocation76_spill] sm:$0xff] %v6322_v62  ;;  %v6332_v55 = vld [vmem:[%s10075_s3 + $0x228] sm:$0xff]  ;;  %v6337_v61 = vld [vmem:[%s10075_s3 + $0x230] sm:$0xff] }
  0x24   :  { %10152 = vst [vmem:[#allocation77_spill] sm:$0xff] %v6327_v63  ;;  %10153 = vst [vmem:[#allocation78_spill] sm:$0xff] %v6332_v55  ;;  %v6342_v53 = vld [vmem:[%s10075_s3 + $0x238] sm:$0xff]  ;;  %v6347_v46 = vld [vmem:[%s10075_s3 + $0x240] sm:$0xff] }
  0x25   :  { %10154 = vst [vmem:[#allocation79_spill] sm:$0xff] %v6337_v61  ;;  %10155 = vst [vmem:[#allocation80_spill] sm:$0xff] %v6342_v53  ;;  %v6352_v63 = vld [vmem:[%s10075_s3 + $0x248] sm:$0xff]  ;;  %v6357_v55 = vld [vmem:[%s10075_s3 + $0x250] sm:$0xff] }
  0x26   :  { %v6362_v61 = vld [vmem:[%s10075_s3 + $0x258] sm:$0xff]  ;;  %v6367_v53 = vld [vmem:[%s10075_s3 + $0x260] sm:$0xff]  ;;  %v6372_v38 = vld [vmem:[%s10075_s3 + $0x268] sm:$0xff] }
  0x27   :  { %v6377_v44 = vld [vmem:[%s10075_s3 + $0x270] sm:$0xff]  ;;  %v6382_v36 = vld [vmem:[%s10075_s3 + $0x278] sm:$0xff]  ;;  %v6387_v47 = vld [vmem:[%s10075_s3 + $0x280] sm:$0xff] }
  0x28   :  { %v6392_v39 = vld [vmem:[%s10075_s3 + $0x288] sm:$0xff]  ;;  %v6397_v45 = vld [vmem:[%s10075_s3 + $0x290] sm:$0xff]  ;;  %v6402_v37 = vld [vmem:[%s10075_s3 + $0x298] sm:$0xff] }
  0x29   :  { %v6407_v30 = vld [vmem:[%s10075_s3 + $0x2a0] sm:$0xff]  ;;  %v6412_v22 = vld [vmem:[%s10075_s3 + $0x2a8] sm:$0xff]  ;;  %v6417_v28 = vld [vmem:[%s10075_s3 + $0x2b0] sm:$0xff] }
  0x2a   :  { %v6422_v20 = vld [vmem:[%s10075_s3 + $0x2b8] sm:$0xff]  ;;  %v6427_v31 = vld [vmem:[%s10075_s3 + $0x2c0] sm:$0xff]  ;;  %v6432_v23 = vld [vmem:[%s10075_s3 + $0x2c8] sm:$0xff] }
  0x2b   :  { %v6437_v29 = vld [vmem:[%s10075_s3 + $0x2d0] sm:$0xff]  ;;  %v6442_v21 = vld [vmem:[%s10075_s3 + $0x2d8] sm:$0xff]  ;;  %v6447_v52 = vld [vmem:[%s10075_s3 + $0x2e0] sm:$0xff] }
  0x2c   :  { %v6452_v54 = vld [vmem:[%s10075_s3 + $0x2e8] sm:$0xff]  ;;  %v6457_v14 = vld [vmem:[%s10075_s3 + $0x2f0] sm:$0xff]  ;;  %v6462_v6 = vld [vmem:[%s10075_s3 + $0x2f8] sm:$0xff] }
  0x2d   :  { %10156 = vst [vmem:[#allocation81_spill] sm:$0xff] %v6457_v14  ;;  %v6467_v12 = vld [vmem:[%s10075_s3 + $0x300] sm:$0xff]  ;;  %v6472_v4 = vld [vmem:[%s10075_s3 + $0x308] sm:$0xff]  ;;  %v6477_v15 = vld [vmem:[%s10075_s3 + $0x310] sm:$0xff] }
  0x2e   :  { %v6482_v7 = vld [vmem:[%s10075_s3 + $0x318] sm:$0xff]  ;;  %v6487_v13 = vld [vmem:[%s10075_s3 + $0x320] sm:$0xff]  ;;  %v6492_v5 = vld [vmem:[%s10075_s3 + $0x328] sm:$0xff] }
  0x2f   :  { %v6497_v62 = vld [vmem:[%s10075_s3 + $0x330] sm:$0xff]  ;;  %v6502_v60 = vld [vmem:[%s10075_s3 + $0x338] sm:$0xff]  ;;  %v6507_v58 = vld [vmem:[%s10075_s3 + $0x340] sm:$0xff] }
  0x30   :  { %10157 = vst [vmem:[#allocation82_spill] sm:$0xff] %v6497_v62  ;;  %v6512_v50 = vld [vmem:[%s10075_s3 + $0x348] sm:$0xff]  ;;  %v6517_v56 = vld [vmem:[%s10075_s3 + $0x350] sm:$0xff]  ;;  %v6522_v48 = vld [vmem:[%s10075_s3 + $0x358] sm:$0xff] }
  0x31   :  { %v6527_v59 = vld [vmem:[%s10075_s3 + $0x360] sm:$0xff]  ;;  %v6532_v51 = vld [vmem:[%s10075_s3 + $0x368] sm:$0xff]  ;;  %v6537_v57 = vld [vmem:[%s10075_s3 + $0x370] sm:$0xff] }
  0x32   :  { %10158 = vst [vmem:[#allocation83_spill] sm:$0xff] %v6527_v59  ;;  %10159 = vst [vmem:[#allocation84_spill] sm:$0xff] %v6532_v51  ;;  %v6542_v49 = vld [vmem:[%s10075_s3 + $0x378] sm:$0xff]  ;;  %v6547_v42 = vld [vmem:[%s10075_s3 + $0x380] sm:$0xff] }
  0x33   :  { %10160 = vst [vmem:[#allocation85_spill] sm:$0xff] %v6537_v57  ;;  %10161 = vst [vmem:[#allocation86_spill] sm:$0xff] %v6542_v49  ;;  %v6552_v34 = vld [vmem:[%s10075_s3 + $0x388] sm:$0xff]  ;;  %v6557_v40 = vld [vmem:[%s10075_s3 + $0x390] sm:$0xff] }
  0x34   :  { %v6562_v32 = vld [vmem:[%s10075_s3 + $0x398] sm:$0xff]  ;;  %v6567_v43 = vld [vmem:[%s10075_s3 + $0x3a0] sm:$0xff]  ;;  %v6572_v35 = vld [vmem:[%s10075_s3 + $0x3a8] sm:$0xff] }
  0x35   :  { %10162 = vst [vmem:[#allocation87_spill] sm:$0xff] %v6567_v43  ;;  %10163 = vst [vmem:[#allocation88_spill] sm:$0xff] %v6572_v35  ;;  %v6577_v41 = vld [vmem:[%s10075_s3 + $0x3b0] sm:$0xff]  ;;  %v6582_v33 = vld [vmem:[%s10075_s3 + $0x3b8] sm:$0xff] }
  0x36   :  { %10164 = vst [vmem:[#allocation89_spill] sm:$0xff] %v6577_v41  ;;  %10165 = vst [vmem:[#allocation90_spill] sm:$0xff] %v6582_v33  ;;  %v6587_v26 = vld [vmem:[%s10075_s3 + $0x3c0] sm:$0xff]  ;;  %v6592_v18 = vld [vmem:[%s10075_s3 + $0x3c8] sm:$0xff] }
  0x37   :  { %v6597_v24 = vld [vmem:[%s10075_s3 + $0x3d0] sm:$0xff]  ;;  %v6602_v16 = vld [vmem:[%s10075_s3 + $0x3d8] sm:$0xff]  ;;  %v6607_v27 = vld [vmem:[%s10075_s3 + $0x3e0] sm:$0xff] }
  0x38   :  { %10166 = vst [vmem:[#allocation91_spill] sm:$0xff] %v6607_v27  ;;  %v6612_v19 = vld [vmem:[%s10075_s3 + $0x3e8] sm:$0xff]  ;;  %v6617_v25 = vld [vmem:[%s10075_s3 + $0x3f0] sm:$0xff]  ;;  %v6622_v17 = vld [vmem:[%s10075_s3 + $0x3f8] sm:$0xff] }
  0x39   :  { %10167 = vst [vmem:[#allocation92_spill] sm:$0xff] %v6612_v19  ;;  %10168 = vst [vmem:[#allocation93_spill] sm:$0xff] %v6617_v25  ;;  %v6627_v10 = vld [vmem:[%s10075_s3 + $0x400] sm:$0xff]  ;;  %v6632_v2 = vld [vmem:[%s10075_s3 + $0x408] sm:$0xff] }
  0x3a   :  { %10169 = vst [vmem:[#allocation94_spill] sm:$0xff] %v6622_v17  ;;  %v6637_v8 = vld [vmem:[%s10075_s3 + $0x410] sm:$0xff]  ;;  %v6642_v0 = vld [vmem:[%s10075_s3 + $0x418] sm:$0xff]  ;;  %v6647_v11 = vld [vmem:[%s10075_s3 + $0x420] sm:$0xff] }
  0x3b   :  { %10170 = vst [vmem:[#allocation95_spill] sm:$0xff] %v6647_v11  ;;  %v6652_v3 = vld [vmem:[%s10075_s3 + $0x428] sm:$0xff]  ;;  %v6657_v9 = vld [vmem:[%s10075_s3 + $0x430] sm:$0xff]  ;;  %v6662_v1 = vld [vmem:[%s10075_s3 + $0x438] sm:$0xff] }
  0x3c   :  { %10171 = vst [vmem:[#allocation96_spill] sm:$0xff] %v6652_v3  ;;  %10172 = vst [vmem:[#allocation97_spill] sm:$0xff] %v6657_v9  ;;  %v6667_v25 = vld [vmem:[%s10075_s3 + $0x440] sm:$0xff]  ;;  %v6672_v11 = vld [vmem:[%s10075_s3 + $0x448] sm:$0xff] }
  0x3d   :  { %10173 = vst [vmem:[#allocation98_spill] sm:$0xff] %v6662_v1  ;;  %v6677_v27 = vld [vmem:[%s10075_s3 + $0x450] sm:$0xff]  ;;  %v6682_v9 = vld [vmem:[%s10075_s3 + $0x458] sm:$0xff]  ;;  %v6687_v1 = vld [vmem:[%s10075_s3 + $0x460] sm:$0xff] }
  0x3e   :  { %10174 = vst [vmem:[#allocation99_spill] sm:$0xff] %v6687_v1  ;;  %v6692_v17 = vld [vmem:[%s10075_s3 + $0x468] sm:$0xff]  ;;  %v6697_v3 = vld [vmem:[%s10075_s3 + $0x470] sm:$0xff]  ;;  %v6702_v19 = vld [vmem:[%s10075_s3 + $0x478] sm:$0xff] }
  0x3f   :  { %10175 = vst [vmem:[#allocation100_spill] sm:$0xff] %v6692_v17  ;;  %10176 = vst [vmem:[#allocation101_spill] sm:$0xff] %v6697_v3  ;;  %v6707_v41 = vld [vmem:[%s10075_s3 + $0x480] sm:$0xff]  ;;  %v6712_v1 = vld [vmem:[%s10075_s3 + $0x488] sm:$0xff] }
  0x40   :  { %10177 = vst [vmem:[#allocation102_spill] sm:$0xff] %v6702_v19  ;;  %10178 = vst [vmem:[#allocation103_spill] sm:$0xff] %v6707_v41  ;;  %v6717_v17 = vld [vmem:[%s10075_s3 + $0x490] sm:$0xff]  ;;  %v6722_v3 = vld [vmem:[%s10075_s3 + $0x498] sm:$0xff] }
  0x41   :  { %10179 = vst [vmem:[#allocation104_spill] sm:$0xff] %v6712_v1  ;;  %10180 = vst [vmem:[#allocation105_spill] sm:$0xff] %v6717_v17  ;;  %v6727_v19 = vld [vmem:[%s10075_s3 + $0x4a0] sm:$0xff]  ;;  %v6732_v41 = vld [vmem:[%s10075_s3 + $0x4a8] sm:$0xff] }
  0x42   :  { %10181 = vst [vmem:[#allocation106_spill] sm:$0xff] %v6722_v3  ;;  %10182 = vst [vmem:[#allocation107_spill] sm:$0xff] %v6727_v19  ;;  %v6737_v1 = vld [vmem:[%s10075_s3 + $0x4b0] sm:$0xff]  ;;  %v6742_v17 = vld [vmem:[%s10075_s3 + $0x4b8] sm:$0xff] }
  0x43   :  { %10183 = vst [vmem:[#allocation108_spill] sm:$0xff] %v6732_v41  ;;  %10184 = vst [vmem:[#allocation109_spill] sm:$0xff] %v6737_v1  ;;  %v6747_v3 = vld [vmem:[%s10075_s3 + $0x4c0] sm:$0xff]  ;;  %v6752_v19 = vld [vmem:[%s10075_s3 + $0x4c8] sm:$0xff] }
  0x44   :  { %10185 = vst [vmem:[#allocation110_spill] sm:$0xff] %v6742_v17  ;;  %10186 = vst [vmem:[#allocation111_spill] sm:$0xff] %v6747_v3  ;;  %v6757_v41 = vld [vmem:[%s10075_s3 + $0x4d0] sm:$0xff]  ;;  %v6762_v1 = vld [vmem:[%s10075_s3 + $0x4d8] sm:$0xff] }
  0x45   :  { %10187 = vst [vmem:[#allocation112_spill] sm:$0xff] %v6752_v19  ;;  %10188 = vst [vmem:[#allocation113_spill] sm:$0xff] %v6757_v41  ;;  %v6767_v17 = vld [vmem:[%s10075_s3 + $0x4e0] sm:$0xff]  ;;  %v6772_v3 = vld [vmem:[%s10075_s3 + $0x4e8] sm:$0xff] }
  0x46   :  { %10189 = vst [vmem:[#allocation114_spill] sm:$0xff] %v6762_v1  ;;  %10190 = vst [vmem:[#allocation115_spill] sm:$0xff] %v6767_v17  ;;  %v6777_v19 = vld [vmem:[%s10075_s3 + $0x4f0] sm:$0xff]  ;;  %v6782_v41 = vld [vmem:[%s10075_s3 + $0x4f8] sm:$0xff] }
  0x47   :  { %10191 = vst [vmem:[#allocation116_spill] sm:$0xff] %v6772_v3  ;;  %10192 = vst [vmem:[#allocation117_spill] sm:$0xff] %v6777_v19  ;;  %v6787_v1 = vld [vmem:[%s10075_s3 + $0x500] sm:$0xff]  ;;  %v6792_v17 = vld [vmem:[%s10075_s3 + $0x508] sm:$0xff] }
  0x48   :  { %10193 = vst [vmem:[#allocation118_spill] sm:$0xff] %v6782_v41  ;;  %10194 = vst [vmem:[#allocation119_spill] sm:$0xff] %v6787_v1  ;;  %v6797_v3 = vld [vmem:[%s10075_s3 + $0x510] sm:$0xff]  ;;  %v6802_v19 = vld [vmem:[%s10075_s3 + $0x518] sm:$0xff] }
  0x49   :  { %10195 = vst [vmem:[#allocation120_spill] sm:$0xff] %v6792_v17  ;;  %10196 = vst [vmem:[#allocation121_spill] sm:$0xff] %v6797_v3  ;;  %v6807_v41 = vld [vmem:[%s10075_s3 + $0x520] sm:$0xff]  ;;  %v6812_v1 = vld [vmem:[%s10075_s3 + $0x528] sm:$0xff] }
  0x4a   :  { %10197 = vst [vmem:[#allocation122_spill] sm:$0xff] %v6802_v19  ;;  %10198 = vst [vmem:[#allocation123_spill] sm:$0xff] %v6807_v41  ;;  %v6817_v17 = vld [vmem:[%s10075_s3 + $0x530] sm:$0xff]  ;;  %v6822_v3 = vld [vmem:[%s10075_s3 + $0x538] sm:$0xff] }
  0x4b   :  { %10199 = vst [vmem:[#allocation124_spill] sm:$0xff] %v6812_v1  ;;  %10200 = vst [vmem:[#allocation125_spill] sm:$0xff] %v6817_v17  ;;  %v6827_v19 = vld [vmem:[%s10075_s3 + $0x540] sm:$0xff]  ;;  %v6832_v41 = vld [vmem:[%s10075_s3 + $0x548] sm:$0xff] }
  0x4c   :  { %10201 = vst [vmem:[#allocation126_spill] sm:$0xff] %v6822_v3  ;;  %10202 = vst [vmem:[#allocation127_spill] sm:$0xff] %v6827_v19  ;;  %v6837_v1 = vld [vmem:[%s10075_s3 + $0x550] sm:$0xff]  ;;  %v6842_v17 = vld [vmem:[%s10075_s3 + $0x558] sm:$0xff] }
  0x4d   :  { %10203 = vst [vmem:[#allocation128_spill] sm:$0xff] %v6832_v41  ;;  %10204 = vst [vmem:[#allocation129_spill] sm:$0xff] %v6837_v1  ;;  %v6847_v3 = vld [vmem:[%s10075_s3 + $0x560] sm:$0xff]  ;;  %v6852_v19 = vld [vmem:[%s10075_s3 + $0x568] sm:$0xff] }
  0x4e   :  { %10205 = vst [vmem:[#allocation130_spill] sm:$0xff] %v6842_v17  ;;  %10206 = vst [vmem:[#allocation131_spill] sm:$0xff] %v6847_v3  ;;  %v6857_v41 = vld [vmem:[%s10075_s3 + $0x570] sm:$0xff]  ;;  %v6862_v1 = vld [vmem:[%s10075_s3 + $0x578] sm:$0xff] }
  0x4f   :  { %10207 = vst [vmem:[#allocation132_spill] sm:$0xff] %v6852_v19  ;;  %10208 = vst [vmem:[#allocation133_spill] sm:$0xff] %v6857_v41  ;;  %v6867_v17 = vld [vmem:[%s10075_s3 + $0x580] sm:$0xff]  ;;  %v6872_v3 = vld [vmem:[%s10075_s3 + $0x588] sm:$0xff] }
  0x50   :  { %10209 = vst [vmem:[#allocation134_spill] sm:$0xff] %v6862_v1  ;;  %10210 = vst [vmem:[#allocation135_spill] sm:$0xff] %v6867_v17  ;;  %v6877_v19 = vld [vmem:[%s10075_s3 + $0x590] sm:$0xff]  ;;  %v6882_v41 = vld [vmem:[%s10075_s3 + $0x598] sm:$0xff] }
  0x51   :  { %10211 = vst [vmem:[#allocation136_spill] sm:$0xff] %v6872_v3  ;;  %10212 = vst [vmem:[#allocation137_spill] sm:$0xff] %v6877_v19  ;;  %v6887_v1 = vld [vmem:[%s10075_s3 + $0x5a0] sm:$0xff]  ;;  %v6892_v17 = vld [vmem:[%s10075_s3 + $0x5a8] sm:$0xff] }
  0x52   :  { %10213 = vst [vmem:[#allocation138_spill] sm:$0xff] %v6882_v41  ;;  %10214 = vst [vmem:[#allocation139_spill] sm:$0xff] %v6887_v1  ;;  %v6897_v3 = vld [vmem:[%s10075_s3 + $0x5b0] sm:$0xff]  ;;  %v6902_v19 = vld [vmem:[%s10075_s3 + $0x5b8] sm:$0xff] }
  0x53   :  { %10215 = vst [vmem:[#allocation140_spill] sm:$0xff] %v6892_v17  ;;  %10216 = vst [vmem:[#allocation141_spill] sm:$0xff] %v6897_v3  ;;  %v6907_v41 = vld [vmem:[%s10075_s3 + $0x5c0] sm:$0xff]  ;;  %v6912_v1 = vld [vmem:[%s10075_s3 + $0x5c8] sm:$0xff] }
  0x54   :  { %10217 = vst [vmem:[#allocation142_spill] sm:$0xff] %v6902_v19  ;;  %10218 = vst [vmem:[#allocation143_spill] sm:$0xff] %v6907_v41  ;;  %v6917_v17 = vld [vmem:[%s10075_s3 + $0x5d0] sm:$0xff]  ;;  %v6922_v3 = vld [vmem:[%s10075_s3 + $0x5d8] sm:$0xff] }
  0x55   :  { %10219 = vst [vmem:[#allocation144_spill] sm:$0xff] %v6912_v1  ;;  %10220 = vst [vmem:[#allocation145_spill] sm:$0xff] %v6917_v17  ;;  %v6927_v19 = vld [vmem:[%s10075_s3 + $0x5e0] sm:$0xff]  ;;  %v6932_v41 = vld [vmem:[%s10075_s3 + $0x5e8] sm:$0xff] }
  0x56   :  { %10221 = vst [vmem:[#allocation146_spill] sm:$0xff] %v6922_v3  ;;  %10222 = vst [vmem:[#allocation147_spill] sm:$0xff] %v6927_v19  ;;  %v6937_v1 = vld [vmem:[%s10075_s3 + $0x5f0] sm:$0xff]  ;;  %v6942_v17 = vld [vmem:[%s10075_s3 + $0x5f8] sm:$0xff] }
  0x57   :  { %10223 = vst [vmem:[#allocation148_spill] sm:$0xff] %v6932_v41  ;;  %10224 = vst [vmem:[#allocation149_spill] sm:$0xff] %v6937_v1  ;;  %v6947_v3 = vld [vmem:[%s10075_s3 + $0x600] sm:$0xff]  ;;  %v6952_v19 = vld [vmem:[%s10075_s3 + $0x608] sm:$0xff] }
  0x58   :  { %10225 = vst [vmem:[#allocation150_spill] sm:$0xff] %v6942_v17  ;;  %10226 = vst [vmem:[#allocation151_spill] sm:$0xff] %v6947_v3  ;;  %v6957_v41 = vld [vmem:[%s10075_s3 + $0x610] sm:$0xff]  ;;  %v6962_v1 = vld [vmem:[%s10075_s3 + $0x618] sm:$0xff] }
  0x59   :  { %10227 = vst [vmem:[#allocation152_spill] sm:$0xff] %v6952_v19  ;;  %10228 = vst [vmem:[#allocation153_spill] sm:$0xff] %v6957_v41  ;;  %v6967_v17 = vld [vmem:[%s10075_s3 + $0x620] sm:$0xff]  ;;  %v6972_v3 = vld [vmem:[%s10075_s3 + $0x628] sm:$0xff] }
  0x5a   :  { %10229 = vst [vmem:[#allocation154_spill] sm:$0xff] %v6962_v1  ;;  %10230 = vst [vmem:[#allocation155_spill] sm:$0xff] %v6967_v17  ;;  %v6977_v19 = vld [vmem:[%s10075_s3 + $0x630] sm:$0xff]  ;;  %v6982_v41 = vld [vmem:[%s10075_s3 + $0x638] sm:$0xff] }
  0x5b   :  { %10231 = vst [vmem:[#allocation156_spill] sm:$0xff] %v6972_v3  ;;  %10232 = vst [vmem:[#allocation157_spill] sm:$0xff] %v6977_v19  ;;  %v6987_v1 = vld [vmem:[%s10075_s3 + $0x640] sm:$0xff]  ;;  %v6992_v17 = vld [vmem:[%s10075_s3 + $0x648] sm:$0xff] }
  0x5c   :  { %10233 = vst [vmem:[#allocation158_spill] sm:$0xff] %v6982_v41  ;;  %10234 = vst [vmem:[#allocation159_spill] sm:$0xff] %v6987_v1  ;;  %v6997_v3 = vld [vmem:[%s10075_s3 + $0x650] sm:$0xff]  ;;  %v7002_v19 = vld [vmem:[%s10075_s3 + $0x658] sm:$0xff] }
  0x5d   :  { %10235 = vst [vmem:[#allocation160_spill] sm:$0xff] %v6992_v17  ;;  %10236 = vst [vmem:[#allocation161_spill] sm:$0xff] %v6997_v3  ;;  %v7007_v41 = vld [vmem:[%s10075_s3 + $0x660] sm:$0xff]  ;;  %v7012_v1 = vld [vmem:[%s10075_s3 + $0x668] sm:$0xff] }
  0x5e   :  { %10237 = vst [vmem:[#allocation162_spill] sm:$0xff] %v7002_v19  ;;  %10238 = vst [vmem:[#allocation163_spill] sm:$0xff] %v7007_v41  ;;  %v7017_v17 = vld [vmem:[%s10075_s3 + $0x670] sm:$0xff]  ;;  %v7022_v3 = vld [vmem:[%s10075_s3 + $0x678] sm:$0xff] }
  0x5f   :  { %10239 = vst [vmem:[#allocation164_spill] sm:$0xff] %v7012_v1  ;;  %10240 = vst [vmem:[#allocation165_spill] sm:$0xff] %v7017_v17  ;;  %v7027_v19 = vld [vmem:[%s10075_s3 + $0x680] sm:$0xff]  ;;  %v7032_v41 = vld [vmem:[%s10075_s3 + $0x688] sm:$0xff] }
  0x60   :  { %10241 = vst [vmem:[#allocation166_spill] sm:$0xff] %v7022_v3  ;;  %10242 = vst [vmem:[#allocation167_spill] sm:$0xff] %v7027_v19  ;;  %v7037_v1 = vld [vmem:[%s10075_s3 + $0x690] sm:$0xff]  ;;  %v7042_v17 = vld [vmem:[%s10075_s3 + $0x698] sm:$0xff] }
  0x61   :  { %10243 = vst [vmem:[#allocation168_spill] sm:$0xff] %v7032_v41  ;;  %10244 = vst [vmem:[#allocation169_spill] sm:$0xff] %v7037_v1  ;;  %v7047_v3 = vld [vmem:[%s10075_s3 + $0x6a0] sm:$0xff]  ;;  %v7052_v19 = vld [vmem:[%s10075_s3 + $0x6a8] sm:$0xff] }
  0x62   :  { %10245 = vst [vmem:[#allocation170_spill] sm:$0xff] %v7042_v17  ;;  %10246 = vst [vmem:[#allocation171_spill] sm:$0xff] %v7047_v3  ;;  %v7057_v41 = vld [vmem:[%s10075_s3 + $0x6b0] sm:$0xff]  ;;  %v7062_v1 = vld [vmem:[%s10075_s3 + $0x6b8] sm:$0xff] }
  0x63   :  { %10247 = vst [vmem:[#allocation172_spill] sm:$0xff] %v7052_v19  ;;  %10248 = vst [vmem:[#allocation173_spill] sm:$0xff] %v7057_v41  ;;  %v7067_v17 = vld [vmem:[%s10075_s3 + $0x6c0] sm:$0xff]  ;;  %v7072_v3 = vld [vmem:[%s10075_s3 + $0x6c8] sm:$0xff] }
  0x64   :  { %10249 = vst [vmem:[#allocation174_spill] sm:$0xff] %v7062_v1  ;;  %10250 = vst [vmem:[#allocation175_spill] sm:$0xff] %v7067_v17  ;;  %v7077_v19 = vld [vmem:[%s10075_s3 + $0x6d0] sm:$0xff]  ;;  %v7082_v41 = vld [vmem:[%s10075_s3 + $0x6d8] sm:$0xff] }
  0x65   :  { %10251 = vst [vmem:[#allocation176_spill] sm:$0xff] %v7072_v3  ;;  %10252 = vst [vmem:[#allocation177_spill] sm:$0xff] %v7077_v19  ;;  %v7087_v1 = vld [vmem:[%s10075_s3 + $0x6e0] sm:$0xff]  ;;  %v7092_v17 = vld [vmem:[%s10075_s3 + $0x6e8] sm:$0xff] }
  0x66   :  { %10253 = vst [vmem:[#allocation178_spill] sm:$0xff] %v7082_v41  ;;  %10254 = vst [vmem:[#allocation179_spill] sm:$0xff] %v7087_v1  ;;  %v7097_v3 = vld [vmem:[%s10075_s3 + $0x6f0] sm:$0xff]  ;;  %v7102_v19 = vld [vmem:[%s10075_s3 + $0x6f8] sm:$0xff] }
  0x67   :  { %10255 = vst [vmem:[#allocation180_spill] sm:$0xff] %v7092_v17  ;;  %10256 = vst [vmem:[#allocation181_spill] sm:$0xff] %v7097_v3  ;;  %v7107_v41 = vld [vmem:[%s10075_s3 + $0x700] sm:$0xff]  ;;  %v7112_v1 = vld [vmem:[%s10075_s3 + $0x708] sm:$0xff] }
  0x68   :  { %10257 = vst [vmem:[#allocation182_spill] sm:$0xff] %v7102_v19  ;;  %10258 = vst [vmem:[#allocation183_spill] sm:$0xff] %v7107_v41  ;;  %v7117_v17 = vld [vmem:[%s10075_s3 + $0x710] sm:$0xff]  ;;  %v7122_v3 = vld [vmem:[%s10075_s3 + $0x718] sm:$0xff] }
  0x69   :  { %10259 = vst [vmem:[#allocation184_spill] sm:$0xff] %v7112_v1  ;;  %10260 = vst [vmem:[#allocation185_spill] sm:$0xff] %v7117_v17  ;;  %v7127_v19 = vld [vmem:[%s10075_s3 + $0x720] sm:$0xff]  ;;  %v7132_v41 = vld [vmem:[%s10075_s3 + $0x728] sm:$0xff] }
  0x6a   :  { %10261 = vst [vmem:[#allocation186_spill] sm:$0xff] %v7122_v3  ;;  %10262 = vst [vmem:[#allocation187_spill] sm:$0xff] %v7127_v19  ;;  %v7137_v1 = vld [vmem:[%s10075_s3 + $0x730] sm:$0xff]  ;;  %v7142_v17 = vld [vmem:[%s10075_s3 + $0x738] sm:$0xff] }
  0x6b   :  { %10263 = vst [vmem:[#allocation188_spill] sm:$0xff] %v7132_v41  ;;  %10264 = vst [vmem:[#allocation189_spill] sm:$0xff] %v7137_v1  ;;  %v7147_v3 = vld [vmem:[%s10075_s3 + $0x740] sm:$0xff]  ;;  %v7152_v19 = vld [vmem:[%s10075_s3 + $0x748] sm:$0xff] }
  0x6c   :  { %10265 = vst [vmem:[#allocation190_spill] sm:$0xff] %v7142_v17  ;;  %10266 = vst [vmem:[#allocation191_spill] sm:$0xff] %v7147_v3  ;;  %v7157_v41 = vld [vmem:[%s10075_s3 + $0x750] sm:$0xff]  ;;  %v7162_v1 = vld [vmem:[%s10075_s3 + $0x758] sm:$0xff] }
  0x6d   :  { %10267 = vst [vmem:[#allocation192_spill] sm:$0xff] %v7152_v19  ;;  %10268 = vst [vmem:[#allocation193_spill] sm:$0xff] %v7157_v41  ;;  %v7167_v17 = vld [vmem:[%s10075_s3 + $0x760] sm:$0xff]  ;;  %v7172_v3 = vld [vmem:[%s10075_s3 + $0x768] sm:$0xff] }
  0x6e   :  { %10269 = vst [vmem:[#allocation194_spill] sm:$0xff] %v7162_v1  ;;  %10270 = vst [vmem:[#allocation195_spill] sm:$0xff] %v7167_v17  ;;  %v7177_v19 = vld [vmem:[%s10075_s3 + $0x770] sm:$0xff]  ;;  %v7182_v41 = vld [vmem:[%s10075_s3 + $0x778] sm:$0xff] }
  0x6f   :  { %10271 = vst [vmem:[#allocation196_spill] sm:$0xff] %v7172_v3  ;;  %10272 = vst [vmem:[#allocation197_spill] sm:$0xff] %v7177_v19  ;;  %v7187_v1 = vld [vmem:[%s10075_s3 + $0x780] sm:$0xff]  ;;  %v7192_v17 = vld [vmem:[%s10075_s3 + $0x788] sm:$0xff] }
  0x70   :  { %10273 = vst [vmem:[#allocation198_spill] sm:$0xff] %v7182_v41  ;;  %10274 = vst [vmem:[#allocation199_spill] sm:$0xff] %v7187_v1  ;;  %v7197_v3 = vld [vmem:[%s10075_s3 + $0x790] sm:$0xff]  ;;  %v7202_v19 = vld [vmem:[%s10075_s3 + $0x798] sm:$0xff] }
  0x71   :  { %10275 = vst [vmem:[#allocation200_spill] sm:$0xff] %v7192_v17  ;;  %10276 = vst [vmem:[#allocation201_spill] sm:$0xff] %v7197_v3  ;;  %v7207_v41 = vld [vmem:[%s10075_s3 + $0x7a0] sm:$0xff]  ;;  %v7212_v1 = vld [vmem:[%s10075_s3 + $0x7a8] sm:$0xff] }
  0x72   :  { %10277 = vst [vmem:[#allocation202_spill] sm:$0xff] %v7202_v19  ;;  %10278 = vst [vmem:[#allocation203_spill] sm:$0xff] %v7207_v41  ;;  %v7217_v17 = vld [vmem:[%s10075_s3 + $0x7b0] sm:$0xff]  ;;  %v7222_v3 = vld [vmem:[%s10075_s3 + $0x7b8] sm:$0xff] }
  0x73   :  { %10279 = vst [vmem:[#allocation204_spill] sm:$0xff] %v7212_v1  ;;  %10280 = vst [vmem:[#allocation205_spill] sm:$0xff] %v7217_v17  ;;  %v7227_v19 = vld [vmem:[%s10075_s3 + $0x7c0] sm:$0xff]  ;;  %v7232_v41 = vld [vmem:[%s10075_s3 + $0x7c8] sm:$0xff] }
  0x74   :  { %10281 = vst [vmem:[#allocation206_spill] sm:$0xff] %v7222_v3  ;;  %10282 = vst [vmem:[#allocation207_spill] sm:$0xff] %v7227_v19  ;;  %v7237_v1 = vld [vmem:[%s10075_s3 + $0x7d0] sm:$0xff]  ;;  %v7242_v17 = vld [vmem:[%s10075_s3 + $0x7d8] sm:$0xff] }
  0x75   :  { %10283 = vst [vmem:[#allocation208_spill] sm:$0xff] %v7232_v41  ;;  %10284 = vst [vmem:[#allocation209_spill] sm:$0xff] %v7237_v1  ;;  %v7247_v3 = vld [vmem:[%s10075_s3 + $0x7e0] sm:$0xff]  ;;  %v7252_v19 = vld [vmem:[%s10075_s3 + $0x7e8] sm:$0xff] }
  0x76   :  { %10285 = vst [vmem:[#allocation210_spill] sm:$0xff] %v7242_v17  ;;  %10286 = vst [vmem:[#allocation211_spill] sm:$0xff] %v7247_v3  ;;  %v7257_v41 = vld [vmem:[%s10075_s3 + $0x7f0] sm:$0xff]  ;;  %v7262_v1 = vld [vmem:[%s10075_s3 + $0x7f8] sm:$0xff] }
  0x77   :  { %10287 = vst [vmem:[#allocation212_spill] sm:$0xff] %v7252_v19  ;;  %10288 = vst [vmem:[#allocation213_spill] sm:$0xff] %v7257_v41  ;;  %v7267_v17 = vld [vmem:[%s10075_s3 + $0x800] sm:$0xff]  ;;  %v7272_v3 = vld [vmem:[%s10075_s3 + $0x808] sm:$0xff] }
  0x78   :  { %10289 = vst [vmem:[#allocation214_spill] sm:$0xff] %v7262_v1  ;;  %10290 = vst [vmem:[#allocation215_spill] sm:$0xff] %v7267_v17  ;;  %v7277_v19 = vld [vmem:[%s10075_s3 + $0x810] sm:$0xff]  ;;  %v7282_v41 = vld [vmem:[%s10075_s3 + $0x818] sm:$0xff] }
  0x79   :  { %10291 = vst [vmem:[#allocation216_spill] sm:$0xff] %v7272_v3  ;;  %10292 = vst [vmem:[#allocation217_spill] sm:$0xff] %v7277_v19  ;;  %v7287_v1 = vld [vmem:[%s10075_s3 + $0x820] sm:$0xff]  ;;  %v7292_v17 = vld [vmem:[%s10075_s3 + $0x828] sm:$0xff] }
  0x7a   :  { %10293 = vst [vmem:[#allocation218_spill] sm:$0xff] %v7282_v41  ;;  %10294 = vst [vmem:[#allocation219_spill] sm:$0xff] %v7287_v1  ;;  %v7297_v3 = vld [vmem:[%s10075_s3 + $0x830] sm:$0xff]  ;;  %v7302_v19 = vld [vmem:[%s10075_s3 + $0x838] sm:$0xff] }
  0x7b   :  { %10295 = vst [vmem:[#allocation220_spill] sm:$0xff] %v7292_v17  ;;  %10296 = vst [vmem:[#allocation221_spill] sm:$0xff] %v7297_v3  ;;  %v7307_v41 = vld [vmem:[%s10075_s3 + $0x840] sm:$0xff]  ;;  %v7312_v1 = vld [vmem:[%s10075_s3 + $0x848] sm:$0xff] }
  0x7c   :  { %10297 = vst [vmem:[#allocation222_spill] sm:$0xff] %v7302_v19  ;;  %10298 = vst [vmem:[#allocation223_spill] sm:$0xff] %v7307_v41  ;;  %v7317_v17 = vld [vmem:[%s10075_s3 + $0x850] sm:$0xff]  ;;  %v7322_v3 = vld [vmem:[%s10075_s3 + $0x858] sm:$0xff] }
  0x7d   :  { %10299 = vst [vmem:[#allocation224_spill] sm:$0xff] %v7312_v1  ;;  %10300 = vst [vmem:[#allocation225_spill] sm:$0xff] %v7317_v17  ;;  %v7327_v19 = vld [vmem:[%s10075_s3 + $0x860] sm:$0xff]  ;;  %v7332_v41 = vld [vmem:[%s10075_s3 + $0x868] sm:$0xff] }
  0x7e   :  { %10301 = vst [vmem:[#allocation226_spill] sm:$0xff] %v7322_v3  ;;  %10302 = vst [vmem:[#allocation227_spill] sm:$0xff] %v7327_v19  ;;  %v7337_v1 = vld [vmem:[%s10075_s3 + $0x870] sm:$0xff]  ;;  %v7342_v17 = vld [vmem:[%s10075_s3 + $0x878] sm:$0xff] }
  0x7f   :  { %10303 = vst [vmem:[#allocation228_spill] sm:$0xff] %v7332_v41  ;;  %10304 = vst [vmem:[#allocation229_spill] sm:$0xff] %v7337_v1  ;;  %v7347_v3 = vld [vmem:[%s10075_s3 + $0x880] sm:$0xff]  ;;  %v7352_v19 = vld [vmem:[%s10075_s3 + $0x888] sm:$0xff] }
  0x80   :  { %10305 = vst [vmem:[#allocation230_spill] sm:$0xff] %v7342_v17  ;;  %10306 = vst [vmem:[#allocation231_spill] sm:$0xff] %v7347_v3  ;;  %v7357_v41 = vld [vmem:[%s10075_s3 + $0x890] sm:$0xff]  ;;  %v7362_v1 = vld [vmem:[%s10075_s3 + $0x898] sm:$0xff] }
  0x81   :  { %10307 = vst [vmem:[#allocation232_spill] sm:$0xff] %v7352_v19  ;;  %10308 = vst [vmem:[#allocation233_spill] sm:$0xff] %v7357_v41  ;;  %v7367_v17 = vld [vmem:[%s10075_s3 + $0x8a0] sm:$0xff]  ;;  %v7372_v3 = vld [vmem:[%s10075_s3 + $0x8a8] sm:$0xff] }
  0x82   :  { %10309 = vst [vmem:[#allocation234_spill] sm:$0xff] %v7362_v1  ;;  %10310 = vst [vmem:[#allocation235_spill] sm:$0xff] %v7367_v17  ;;  %v7377_v19 = vld [vmem:[%s10075_s3 + $0x8b0] sm:$0xff]  ;;  %v7382_v41 = vld [vmem:[%s10075_s3 + $0x8b8] sm:$0xff] }
  0x83   :  { %10311 = vst [vmem:[#allocation236_spill] sm:$0xff] %v7372_v3  ;;  %10312 = vst [vmem:[#allocation237_spill] sm:$0xff] %v7377_v19  ;;  %v7387_v1 = vld [vmem:[%s10075_s3 + $0x8c0] sm:$0xff]  ;;  %v7392_v17 = vld [vmem:[%s10075_s3 + $0x8c8] sm:$0xff] }
  0x84   :  { %10313 = vst [vmem:[#allocation238_spill] sm:$0xff] %v7382_v41  ;;  %10314 = vst [vmem:[#allocation239_spill] sm:$0xff] %v7387_v1  ;;  %v7397_v3 = vld [vmem:[%s10075_s3 + $0x8d0] sm:$0xff]  ;;  %v7402_v19 = vld [vmem:[%s10075_s3 + $0x8d8] sm:$0xff] }
  0x85   :  { %10315 = vst [vmem:[#allocation240_spill] sm:$0xff] %v7392_v17  ;;  %10316 = vst [vmem:[#allocation241_spill] sm:$0xff] %v7397_v3  ;;  %v7407_v41 = vld [vmem:[%s10075_s3 + $0x8e0] sm:$0xff]  ;;  %v7412_v1 = vld [vmem:[%s10075_s3 + $0x8e8] sm:$0xff] }
  0x86   :  { %10317 = vst [vmem:[#allocation242_spill] sm:$0xff] %v7402_v19  ;;  %10318 = vst [vmem:[#allocation243_spill] sm:$0xff] %v7407_v41  ;;  %v7417_v17 = vld [vmem:[%s10075_s3 + $0x8f0] sm:$0xff]  ;;  %v7422_v3 = vld [vmem:[%s10075_s3 + $0x8f8] sm:$0xff] }
  0x87   :  { %10319 = vst [vmem:[#allocation244_spill] sm:$0xff] %v7412_v1  ;;  %10320 = vst [vmem:[#allocation245_spill] sm:$0xff] %v7417_v17  ;;  %v7427_v19 = vld [vmem:[%s10075_s3 + $0x900] sm:$0xff]  ;;  %v7432_v41 = vld [vmem:[%s10075_s3 + $0x908] sm:$0xff] }
  0x88   :  { %10321 = vst [vmem:[#allocation246_spill] sm:$0xff] %v7422_v3  ;;  %10322 = vst [vmem:[#allocation247_spill] sm:$0xff] %v7427_v19  ;;  %v7437_v1 = vld [vmem:[%s10075_s3 + $0x910] sm:$0xff]  ;;  %v7442_v17 = vld [vmem:[%s10075_s3 + $0x918] sm:$0xff] }
  0x89   :  { %10323 = vst [vmem:[#allocation248_spill] sm:$0xff] %v7432_v41  ;;  %10324 = vst [vmem:[#allocation249_spill] sm:$0xff] %v7437_v1  ;;  %v7447_v3 = vld [vmem:[%s10075_s3 + $0x920] sm:$0xff]  ;;  %v7452_v19 = vld [vmem:[%s10075_s3 + $0x928] sm:$0xff] }
  0x8a   :  { %10325 = vst [vmem:[#allocation250_spill] sm:$0xff] %v7442_v17  ;;  %10326 = vst [vmem:[#allocation251_spill] sm:$0xff] %v7447_v3  ;;  %v7457_v41 = vld [vmem:[%s10075_s3 + $0x930] sm:$0xff]  ;;  %v7462_v1 = vld [vmem:[%s10075_s3 + $0x938] sm:$0xff] }
  0x8b   :  { %10327 = vst [vmem:[#allocation252_spill] sm:$0xff] %v7452_v19  ;;  %10328 = vst [vmem:[#allocation253_spill] sm:$0xff] %v7457_v41  ;;  %v7467_v17 = vld [vmem:[%s10075_s3 + $0x940] sm:$0xff]  ;;  %v7472_v3 = vld [vmem:[%s10075_s3 + $0x948] sm:$0xff] }
  0x8c   :  { %10329 = vst [vmem:[#allocation254_spill] sm:$0xff] %v7462_v1  ;;  %10330 = vst [vmem:[#allocation255_spill] sm:$0xff] %v7467_v17  ;;  %v7477_v19 = vld [vmem:[%s10075_s3 + $0x950] sm:$0xff]  ;;  %v7482_v41 = vld [vmem:[%s10075_s3 + $0x958] sm:$0xff] }
  0x8d   :  { %10331 = vst [vmem:[#allocation256_spill] sm:$0xff] %v7472_v3  ;;  %10332 = vst [vmem:[#allocation257_spill] sm:$0xff] %v7477_v19  ;;  %v7487_v1 = vld [vmem:[%s10075_s3 + $0x960] sm:$0xff]  ;;  %v7492_v17 = vld [vmem:[%s10075_s3 + $0x968] sm:$0xff] }
  0x8e   :  { %10333 = vst [vmem:[#allocation258_spill] sm:$0xff] %v7482_v41  ;;  %10334 = vst [vmem:[#allocation259_spill] sm:$0xff] %v7487_v1  ;;  %v7497_v3 = vld [vmem:[%s10075_s3 + $0x970] sm:$0xff]  ;;  %v7502_v19 = vld [vmem:[%s10075_s3 + $0x978] sm:$0xff] }
  0x8f   :  { %10335 = vst [vmem:[#allocation260_spill] sm:$0xff] %v7492_v17  ;;  %10336 = vst [vmem:[#allocation261_spill] sm:$0xff] %v7497_v3  ;;  %v7507_v41 = vld [vmem:[%s10075_s3 + $0x980] sm:$0xff]  ;;  %v7512_v1 = vld [vmem:[%s10075_s3 + $0x988] sm:$0xff] }
  0x90   :  { %10337 = vst [vmem:[#allocation262_spill] sm:$0xff] %v7502_v19  ;;  %10338 = vst [vmem:[#allocation263_spill] sm:$0xff] %v7507_v41  ;;  %v7517_v17 = vld [vmem:[%s10075_s3 + $0x990] sm:$0xff]  ;;  %v7522_v3 = vld [vmem:[%s10075_s3 + $0x998] sm:$0xff] }
  0x91   :  { %10339 = vst [vmem:[#allocation264_spill] sm:$0xff] %v7512_v1  ;;  %10340 = vst [vmem:[#allocation265_spill] sm:$0xff] %v7517_v17  ;;  %v7527_v19 = vld [vmem:[%s10075_s3 + $0x9a0] sm:$0xff]  ;;  %v7532_v41 = vld [vmem:[%s10075_s3 + $0x9a8] sm:$0xff] }
  0x92   :  { %10341 = vst [vmem:[#allocation266_spill] sm:$0xff] %v7522_v3  ;;  %10342 = vst [vmem:[#allocation267_spill] sm:$0xff] %v7527_v19  ;;  %v7537_v1 = vld [vmem:[%s10075_s3 + $0x9b0] sm:$0xff]  ;;  %v7542_v17 = vld [vmem:[%s10075_s3 + $0x9b8] sm:$0xff] }
  0x93   :  { %10343 = vst [vmem:[#allocation268_spill] sm:$0xff] %v7532_v41  ;;  %10344 = vst [vmem:[#allocation269_spill] sm:$0xff] %v7537_v1  ;;  %v7547_v3 = vld [vmem:[%s10075_s3 + $0x9c0] sm:$0xff]  ;;  %v7552_v19 = vld [vmem:[%s10075_s3 + $0x9c8] sm:$0xff] }
  0x94   :  { %10345 = vst [vmem:[#allocation270_spill] sm:$0xff] %v7542_v17  ;;  %10346 = vst [vmem:[#allocation271_spill] sm:$0xff] %v7547_v3  ;;  %v7557_v41 = vld [vmem:[%s10075_s3 + $0x9d0] sm:$0xff]  ;;  %v7562_v1 = vld [vmem:[%s10075_s3 + $0x9d8] sm:$0xff] }
  0x95   :  { %10347 = vst [vmem:[#allocation272_spill] sm:$0xff] %v7552_v19  ;;  %10348 = vst [vmem:[#allocation273_spill] sm:$0xff] %v7557_v41  ;;  %v7567_v17 = vld [vmem:[%s10075_s3 + $0x9e0] sm:$0xff]  ;;  %v7572_v3 = vld [vmem:[%s10075_s3 + $0x9e8] sm:$0xff] }
  0x96   :  { %10349 = vst [vmem:[#allocation274_spill] sm:$0xff] %v7562_v1  ;;  %10350 = vst [vmem:[#allocation275_spill] sm:$0xff] %v7567_v17  ;;  %v7577_v19 = vld [vmem:[%s10075_s3 + $0x9f0] sm:$0xff]  ;;  %v7582_v41 = vld [vmem:[%s10075_s3 + $0x9f8] sm:$0xff] }
  0x97   :  { %10351 = vst [vmem:[#allocation276_spill] sm:$0xff] %v7572_v3  ;;  %10352 = vst [vmem:[#allocation277_spill] sm:$0xff] %v7577_v19  ;;  %v7587_v1 = vld [vmem:[%s10075_s3 + $0xa00] sm:$0xff]  ;;  %v7592_v17 = vld [vmem:[%s10075_s3 + $0xa08] sm:$0xff] }
  0x98   :  { %10353 = vst [vmem:[#allocation278_spill] sm:$0xff] %v7582_v41  ;;  %10354 = vst [vmem:[#allocation279_spill] sm:$0xff] %v7587_v1  ;;  %v7597_v3 = vld [vmem:[%s10075_s3 + $0xa10] sm:$0xff]  ;;  %v7602_v19 = vld [vmem:[%s10075_s3 + $0xa18] sm:$0xff] }
  0x99   :  { %10355 = vst [vmem:[#allocation280_spill] sm:$0xff] %v7592_v17  ;;  %10356 = vst [vmem:[#allocation281_spill] sm:$0xff] %v7597_v3  ;;  %v7607_v41 = vld [vmem:[%s10075_s3 + $0xa20] sm:$0xff]  ;;  %v7612_v1 = vld [vmem:[%s10075_s3 + $0xa28] sm:$0xff] }
  0x9a   :  { %10357 = vst [vmem:[#allocation282_spill] sm:$0xff] %v7602_v19  ;;  %10358 = vst [vmem:[#allocation283_spill] sm:$0xff] %v7607_v41  ;;  %v7617_v17 = vld [vmem:[%s10075_s3 + $0xa30] sm:$0xff]  ;;  %v7622_v3 = vld [vmem:[%s10075_s3 + $0xa38] sm:$0xff] }
  0x9b   :  { %10359 = vst [vmem:[#allocation284_spill] sm:$0xff] %v7612_v1  ;;  %10360 = vst [vmem:[#allocation285_spill] sm:$0xff] %v7617_v17  ;;  %v7627_v19 = vld [vmem:[%s10075_s3 + $0xa40] sm:$0xff]  ;;  %v7632_v41 = vld [vmem:[%s10075_s3 + $0xa48] sm:$0xff] }
  0x9c   :  { %10361 = vst [vmem:[#allocation286_spill] sm:$0xff] %v7622_v3  ;;  %10362 = vst [vmem:[#allocation287_spill] sm:$0xff] %v7627_v19  ;;  %v7637_v1 = vld [vmem:[%s10075_s3 + $0xa50] sm:$0xff]  ;;  %v7642_v17 = vld [vmem:[%s10075_s3 + $0xa58] sm:$0xff] }
  0x9d   :  { %10363 = vst [vmem:[#allocation288_spill] sm:$0xff] %v7632_v41  ;;  %10364 = vst [vmem:[#allocation289_spill] sm:$0xff] %v7637_v1  ;;  %v7647_v3 = vld [vmem:[%s10075_s3 + $0xa60] sm:$0xff]  ;;  %v7652_v19 = vld [vmem:[%s10075_s3 + $0xa68] sm:$0xff] }
  0x9e   :  { %10365 = vst [vmem:[#allocation290_spill] sm:$0xff] %v7642_v17  ;;  %10366 = vst [vmem:[#allocation291_spill] sm:$0xff] %v7647_v3  ;;  %v7657_v41 = vld [vmem:[%s10075_s3 + $0xa70] sm:$0xff]  ;;  %v7662_v1 = vld [vmem:[%s10075_s3 + $0xa78] sm:$0xff] }
  0x9f   :  { %10367 = vst [vmem:[#allocation292_spill] sm:$0xff] %v7652_v19  ;;  %10368 = vst [vmem:[#allocation293_spill] sm:$0xff] %v7657_v41  ;;  %v7667_v17 = vld [vmem:[%s10075_s3 + $0xa80] sm:$0xff]  ;;  %v7672_v3 = vld [vmem:[%s10075_s3 + $0xa88] sm:$0xff] }
  0xa0   :  { %10369 = vst [vmem:[#allocation294_spill] sm:$0xff] %v7662_v1  ;;  %10370 = vst [vmem:[#allocation295_spill] sm:$0xff] %v7667_v17  ;;  %v7677_v19 = vld [vmem:[%s10075_s3 + $0xa90] sm:$0xff]  ;;  %v7682_v41 = vld [vmem:[%s10075_s3 + $0xa98] sm:$0xff] }
  0xa1   :  { %10371 = vst [vmem:[#allocation296_spill] sm:$0xff] %v7672_v3  ;;  %10372 = vst [vmem:[#allocation297_spill] sm:$0xff] %v7677_v19  ;;  %v7687_v1 = vld [vmem:[%s10075_s3 + $0xaa0] sm:$0xff]  ;;  %v7692_v17 = vld [vmem:[%s10075_s3 + $0xaa8] sm:$0xff] }
  0xa2   :  { %10373 = vst [vmem:[#allocation298_spill] sm:$0xff] %v7682_v41  ;;  %10374 = vst [vmem:[#allocation299_spill] sm:$0xff] %v7687_v1  ;;  %v7697_v3 = vld [vmem:[%s10075_s3 + $0xab0] sm:$0xff]  ;;  %v7702_v19 = vld [vmem:[%s10075_s3 + $0xab8] sm:$0xff] }
  0xa3   :  { %10375 = vst [vmem:[#allocation300_spill] sm:$0xff] %v7692_v17  ;;  %10376 = vst [vmem:[#allocation301_spill] sm:$0xff] %v7697_v3  ;;  %v7707_v41 = vld [vmem:[%s10075_s3 + $0xac0] sm:$0xff]  ;;  %v7712_v1 = vld [vmem:[%s10075_s3 + $0xac8] sm:$0xff] }
  0xa4   :  { %10377 = vst [vmem:[#allocation302_spill] sm:$0xff] %v7702_v19  ;;  %10378 = vst [vmem:[#allocation303_spill] sm:$0xff] %v7707_v41  ;;  %v7717_v17 = vld [vmem:[%s10075_s3 + $0xad0] sm:$0xff]  ;;  %v7722_v3 = vld [vmem:[%s10075_s3 + $0xad8] sm:$0xff] }
  0xa5   :  { %10379 = vst [vmem:[#allocation304_spill] sm:$0xff] %v7712_v1  ;;  %10380 = vst [vmem:[#allocation305_spill] sm:$0xff] %v7717_v17  ;;  %v7727_v19 = vld [vmem:[%s10075_s3 + $0xae0] sm:$0xff]  ;;  %v7732_v41 = vld [vmem:[%s10075_s3 + $0xae8] sm:$0xff] }
  0xa6   :  { %10381 = vst [vmem:[#allocation306_spill] sm:$0xff] %v7722_v3  ;;  %10382 = vst [vmem:[#allocation307_spill] sm:$0xff] %v7727_v19  ;;  %v7737_v1 = vld [vmem:[%s10075_s3 + $0xaf0] sm:$0xff]  ;;  %v7742_v17 = vld [vmem:[%s10075_s3 + $0xaf8] sm:$0xff] }
  0xa7   :  { %10383 = vst [vmem:[#allocation308_spill] sm:$0xff] %v7732_v41  ;;  %10384 = vst [vmem:[#allocation309_spill] sm:$0xff] %v7737_v1  ;;  %v7747_v3 = vld [vmem:[%s10075_s3 + $0xb00] sm:$0xff]  ;;  %v7752_v19 = vld [vmem:[%s10075_s3 + $0xb08] sm:$0xff] }
  0xa8   :  { %10385 = vst [vmem:[#allocation310_spill] sm:$0xff] %v7742_v17  ;;  %10386 = vst [vmem:[#allocation311_spill] sm:$0xff] %v7747_v3  ;;  %v7757_v41 = vld [vmem:[%s10075_s3 + $0xb10] sm:$0xff]  ;;  %v7762_v1 = vld [vmem:[%s10075_s3 + $0xb18] sm:$0xff] }
  0xa9   :  { %10387 = vst [vmem:[#allocation312_spill] sm:$0xff] %v7752_v19  ;;  %10388 = vst [vmem:[#allocation313_spill] sm:$0xff] %v7757_v41  ;;  %v7767_v17 = vld [vmem:[%s10075_s3 + $0xb20] sm:$0xff]  ;;  %v7772_v3 = vld [vmem:[%s10075_s3 + $0xb28] sm:$0xff] }
  0xaa   :  { %10389 = vst [vmem:[#allocation314_spill] sm:$0xff] %v7762_v1  ;;  %10390 = vst [vmem:[#allocation315_spill] sm:$0xff] %v7767_v17  ;;  %v7777_v19 = vld [vmem:[%s10075_s3 + $0xb30] sm:$0xff]  ;;  %v7782_v41 = vld [vmem:[%s10075_s3 + $0xb38] sm:$0xff] }
  0xab   :  { %10391 = vst [vmem:[#allocation316_spill] sm:$0xff] %v7772_v3  ;;  %10392 = vst [vmem:[#allocation317_spill] sm:$0xff] %v7777_v19  ;;  %v7787_v1 = vld [vmem:[%s10075_s3 + $0xb40] sm:$0xff]  ;;  %v7792_v17 = vld [vmem:[%s10075_s3 + $0xb48] sm:$0xff] }
  0xac   :  { %10393 = vst [vmem:[#allocation318_spill] sm:$0xff] %v7782_v41  ;;  %10394 = vst [vmem:[#allocation319_spill] sm:$0xff] %v7787_v1  ;;  %v7797_v3 = vld [vmem:[%s10075_s3 + $0xb50] sm:$0xff]  ;;  %v7802_v19 = vld [vmem:[%s10075_s3 + $0xb58] sm:$0xff] }
  0xad   :  { %10395 = vst [vmem:[#allocation320_spill] sm:$0xff] %v7792_v17  ;;  %10396 = vst [vmem:[#allocation321_spill] sm:$0xff] %v7797_v3  ;;  %v7807_v41 = vld [vmem:[%s10075_s3 + $0xb60] sm:$0xff]  ;;  %v7812_v1 = vld [vmem:[%s10075_s3 + $0xb68] sm:$0xff] }
  0xae   :  { %10397 = vst [vmem:[#allocation322_spill] sm:$0xff] %v7802_v19  ;;  %10398 = vst [vmem:[#allocation323_spill] sm:$0xff] %v7807_v41  ;;  %v7817_v17 = vld [vmem:[%s10075_s3 + $0xb70] sm:$0xff]  ;;  %v7822_v3 = vld [vmem:[%s10075_s3 + $0xb78] sm:$0xff] }
  0xaf   :  { %10399 = vst [vmem:[#allocation324_spill] sm:$0xff] %v7812_v1  ;;  %10400 = vst [vmem:[#allocation325_spill] sm:$0xff] %v7817_v17  ;;  %v7827_v19 = vld [vmem:[%s10075_s3 + $0xb80] sm:$0xff]  ;;  %v7832_v41 = vld [vmem:[%s10075_s3 + $0xb88] sm:$0xff] }
  0xb0   :  { %10401 = vst [vmem:[#allocation326_spill] sm:$0xff] %v7822_v3  ;;  %10402 = vst [vmem:[#allocation327_spill] sm:$0xff] %v7827_v19  ;;  %v7837_v1 = vld [vmem:[%s10075_s3 + $0xb90] sm:$0xff]  ;;  %v7842_v17 = vld [vmem:[%s10075_s3 + $0xb98] sm:$0xff] }
  0xb1   :  { %10403 = vst [vmem:[#allocation328_spill] sm:$0xff] %v7832_v41  ;;  %10404 = vst [vmem:[#allocation329_spill] sm:$0xff] %v7837_v1  ;;  %v7847_v3 = vld [vmem:[%s10075_s3 + $0xba0] sm:$0xff]  ;;  %v7852_v19 = vld [vmem:[%s10075_s3 + $0xba8] sm:$0xff] }
  0xb2   :  { %10405 = vst [vmem:[#allocation330_spill] sm:$0xff] %v7842_v17  ;;  %10406 = vst [vmem:[#allocation331_spill] sm:$0xff] %v7847_v3  ;;  %v7857_v41 = vld [vmem:[%s10075_s3 + $0xbb0] sm:$0xff]  ;;  %v7862_v1 = vld [vmem:[%s10075_s3 + $0xbb8] sm:$0xff] }
  0xb3   :  { %10407 = vst [vmem:[#allocation332_spill] sm:$0xff] %v7852_v19  ;;  %10408 = vst [vmem:[#allocation333_spill] sm:$0xff] %v7857_v41  ;;  %v7867_v17 = vld [vmem:[%s10075_s3 + $0xbc0] sm:$0xff]  ;;  %v7872_v3 = vld [vmem:[%s10075_s3 + $0xbc8] sm:$0xff] }
  0xb4   :  { %10409 = vst [vmem:[#allocation334_spill] sm:$0xff] %v7862_v1  ;;  %10410 = vst [vmem:[#allocation335_spill] sm:$0xff] %v7867_v17  ;;  %v7877_v19 = vld [vmem:[%s10075_s3 + $0xbd0] sm:$0xff]  ;;  %v7882_v41 = vld [vmem:[%s10075_s3 + $0xbd8] sm:$0xff] }
  0xb5   :  { %10411 = vst [vmem:[#allocation336_spill] sm:$0xff] %v7872_v3  ;;  %10412 = vst [vmem:[#allocation337_spill] sm:$0xff] %v7877_v19  ;;  %v7887_v1 = vld [vmem:[%s10075_s3 + $0xbe0] sm:$0xff]  ;;  %v7892_v17 = vld [vmem:[%s10075_s3 + $0xbe8] sm:$0xff] }
  0xb6   :  { %10413 = vst [vmem:[#allocation338_spill] sm:$0xff] %v7882_v41  ;;  %10414 = vst [vmem:[#allocation339_spill] sm:$0xff] %v7887_v1  ;;  %v7897_v3 = vld [vmem:[%s10075_s3 + $0xbf0] sm:$0xff]  ;;  %v7902_v19 = vld [vmem:[%s10075_s3 + $0xbf8] sm:$0xff] }
  0xb7   :  { %10415 = vst [vmem:[#allocation340_spill] sm:$0xff] %v7892_v17  ;;  %10416 = vst [vmem:[#allocation341_spill] sm:$0xff] %v7897_v3  ;;  %v7907_v41 = vld [vmem:[%s10075_s3 + $0xc00] sm:$0xff]  ;;  %v7912_v1 = vld [vmem:[%s10075_s3 + $0xc08] sm:$0xff] }
  0xb8   :  { %10417 = vst [vmem:[#allocation342_spill] sm:$0xff] %v7902_v19  ;;  %10418 = vst [vmem:[#allocation343_spill] sm:$0xff] %v7907_v41  ;;  %v7917_v17 = vld [vmem:[%s10075_s3 + $0xc10] sm:$0xff]  ;;  %v7922_v3 = vld [vmem:[%s10075_s3 + $0xc18] sm:$0xff] }
  0xb9   :  { %10419 = vst [vmem:[#allocation344_spill] sm:$0xff] %v7912_v1  ;;  %10420 = vst [vmem:[#allocation345_spill] sm:$0xff] %v7917_v17  ;;  %v7927_v19 = vld [vmem:[%s10075_s3 + $0xc20] sm:$0xff]  ;;  %v7932_v41 = vld [vmem:[%s10075_s3 + $0xc28] sm:$0xff] }
  0xba   :  { %10421 = vst [vmem:[#allocation346_spill] sm:$0xff] %v7922_v3  ;;  %10422 = vst [vmem:[#allocation347_spill] sm:$0xff] %v7927_v19  ;;  %v7937_v1 = vld [vmem:[%s10075_s3 + $0xc30] sm:$0xff]  ;;  %v7942_v17 = vld [vmem:[%s10075_s3 + $0xc38] sm:$0xff] }
  0xbb   :  { %10423 = vst [vmem:[#allocation348_spill] sm:$0xff] %v7932_v41  ;;  %10424 = vst [vmem:[#allocation349_spill] sm:$0xff] %v7937_v1  ;;  %v7947_v3 = vld [vmem:[%s10075_s3 + $0xc40] sm:$0xff]  ;;  %v7952_v19 = vld [vmem:[%s10075_s3 + $0xc48] sm:$0xff] }
  0xbc   :  { %10425 = vst [vmem:[#allocation350_spill] sm:$0xff] %v7942_v17  ;;  %10426 = vst [vmem:[#allocation351_spill] sm:$0xff] %v7947_v3  ;;  %v7957_v41 = vld [vmem:[%s10075_s3 + $0xc50] sm:$0xff]  ;;  %v7962_v1 = vld [vmem:[%s10075_s3 + $0xc58] sm:$0xff] }
  0xbd   :  { %10427 = vst [vmem:[#allocation352_spill] sm:$0xff] %v7952_v19  ;;  %10428 = vst [vmem:[#allocation353_spill] sm:$0xff] %v7957_v41  ;;  %v7967_v17 = vld [vmem:[%s10075_s3 + $0xc60] sm:$0xff]  ;;  %v7972_v3 = vld [vmem:[%s10075_s3 + $0xc68] sm:$0xff] }
  0xbe   :  { %10429 = vst [vmem:[#allocation354_spill] sm:$0xff] %v7962_v1  ;;  %10430 = vst [vmem:[#allocation355_spill] sm:$0xff] %v7967_v17  ;;  %v7977_v19 = vld [vmem:[%s10075_s3 + $0xc70] sm:$0xff]  ;;  %v7982_v41 = vld [vmem:[%s10075_s3 + $0xc78] sm:$0xff] }
  0xbf   :  { %10431 = vst [vmem:[#allocation356_spill] sm:$0xff] %v7972_v3  ;;  %10432 = vst [vmem:[#allocation357_spill] sm:$0xff] %v7977_v19  ;;  %v7987_v1 = vld [vmem:[%s10075_s3 + $0xc80] sm:$0xff]  ;;  %v7992_v17 = vld [vmem:[%s10075_s3 + $0xc88] sm:$0xff] }
  0xc0   :  { %10433 = vst [vmem:[#allocation358_spill] sm:$0xff] %v7982_v41  ;;  %10434 = vst [vmem:[#allocation359_spill] sm:$0xff] %v7987_v1  ;;  %v7997_v3 = vld [vmem:[%s10075_s3 + $0xc90] sm:$0xff]  ;;  %v8002_v19 = vld [vmem:[%s10075_s3 + $0xc98] sm:$0xff] }
  0xc1   :  { %10435 = vst [vmem:[#allocation360_spill] sm:$0xff] %v7992_v17  ;;  %10436 = vst [vmem:[#allocation361_spill] sm:$0xff] %v7997_v3  ;;  %v8007_v41 = vld [vmem:[%s10075_s3 + $0xca0] sm:$0xff]  ;;  %v8012_v1 = vld [vmem:[%s10075_s3 + $0xca8] sm:$0xff] }
  0xc2   :  { %10437 = vst [vmem:[#allocation362_spill] sm:$0xff] %v8002_v19  ;;  %10438 = vst [vmem:[#allocation363_spill] sm:$0xff] %v8007_v41  ;;  %v8017_v17 = vld [vmem:[%s10075_s3 + $0xcb0] sm:$0xff]  ;;  %v8022_v3 = vld [vmem:[%s10075_s3 + $0xcb8] sm:$0xff] }
  0xc3   :  { %10439 = vst [vmem:[#allocation364_spill] sm:$0xff] %v8012_v1  ;;  %10440 = vst [vmem:[#allocation365_spill] sm:$0xff] %v8017_v17  ;;  %v8027_v19 = vld [vmem:[%s10075_s3 + $0xcc0] sm:$0xff]  ;;  %v8032_v41 = vld [vmem:[%s10075_s3 + $0xcc8] sm:$0xff] }
  0xc4   :  { %10441 = vst [vmem:[#allocation366_spill] sm:$0xff] %v8022_v3  ;;  %10442 = vst [vmem:[#allocation367_spill] sm:$0xff] %v8027_v19  ;;  %v8037_v1 = vld [vmem:[%s10075_s3 + $0xcd0] sm:$0xff]  ;;  %v8042_v17 = vld [vmem:[%s10075_s3 + $0xcd8] sm:$0xff] }
  0xc5   :  { %10443 = vst [vmem:[#allocation368_spill] sm:$0xff] %v8032_v41  ;;  %10444 = vst [vmem:[#allocation369_spill] sm:$0xff] %v8037_v1  ;;  %v8047_v3 = vld [vmem:[%s10075_s3 + $0xce0] sm:$0xff]  ;;  %v8052_v19 = vld [vmem:[%s10075_s3 + $0xce8] sm:$0xff] }
  0xc6   :  { %10445 = vst [vmem:[#allocation370_spill] sm:$0xff] %v8042_v17  ;;  %10446 = vst [vmem:[#allocation371_spill] sm:$0xff] %v8047_v3  ;;  %v8057_v41 = vld [vmem:[%s10075_s3 + $0xcf0] sm:$0xff]  ;;  %v8062_v1 = vld [vmem:[%s10075_s3 + $0xcf8] sm:$0xff] }
  0xc7   :  { %10447 = vst [vmem:[#allocation372_spill] sm:$0xff] %v8052_v19  ;;  %10448 = vst [vmem:[#allocation373_spill] sm:$0xff] %v8057_v41  ;;  %v8067_v17 = vld [vmem:[%s10075_s3 + $0xd00] sm:$0xff]  ;;  %v8072_v3 = vld [vmem:[%s10075_s3 + $0xd08] sm:$0xff] }
  0xc8   :  { %10449 = vst [vmem:[#allocation374_spill] sm:$0xff] %v8062_v1  ;;  %10450 = vst [vmem:[#allocation375_spill] sm:$0xff] %v8067_v17  ;;  %v8077_v19 = vld [vmem:[%s10075_s3 + $0xd10] sm:$0xff]  ;;  %v8082_v41 = vld [vmem:[%s10075_s3 + $0xd18] sm:$0xff] }
  0xc9   :  { %10451 = vst [vmem:[#allocation376_spill] sm:$0xff] %v8072_v3  ;;  %10452 = vst [vmem:[#allocation377_spill] sm:$0xff] %v8077_v19  ;;  %v8087_v1 = vld [vmem:[%s10075_s3 + $0xd20] sm:$0xff]  ;;  %v8092_v17 = vld [vmem:[%s10075_s3 + $0xd28] sm:$0xff] }
  0xca   :  { %10453 = vst [vmem:[#allocation378_spill] sm:$0xff] %v8082_v41  ;;  %10454 = vst [vmem:[#allocation379_spill] sm:$0xff] %v8087_v1  ;;  %v8097_v3 = vld [vmem:[%s10075_s3 + $0xd30] sm:$0xff]  ;;  %v8102_v19 = vld [vmem:[%s10075_s3 + $0xd38] sm:$0xff] }
  0xcb   :  { %10455 = vst [vmem:[#allocation380_spill] sm:$0xff] %v8092_v17  ;;  %10456 = vst [vmem:[#allocation381_spill] sm:$0xff] %v8097_v3  ;;  %v8107_v41 = vld [vmem:[%s10075_s3 + $0xd40] sm:$0xff]  ;;  %v8112_v1 = vld [vmem:[%s10075_s3 + $0xd48] sm:$0xff] }
  0xcc   :  { %10457 = vst [vmem:[#allocation382_spill] sm:$0xff] %v8102_v19  ;;  %10458 = vst [vmem:[#allocation383_spill] sm:$0xff] %v8107_v41  ;;  %v8117_v17 = vld [vmem:[%s10075_s3 + $0xd50] sm:$0xff]  ;;  %v8122_v3 = vld [vmem:[%s10075_s3 + $0xd58] sm:$0xff] }
  0xcd   :  { %10459 = vst [vmem:[#allocation384_spill] sm:$0xff] %v8112_v1  ;;  %10460 = vst [vmem:[#allocation385_spill] sm:$0xff] %v8117_v17  ;;  %v8127_v19 = vld [vmem:[%s10075_s3 + $0xd60] sm:$0xff]  ;;  %v8132_v41 = vld [vmem:[%s10075_s3 + $0xd68] sm:$0xff] }
  0xce   :  { %10461 = vst [vmem:[#allocation386_spill] sm:$0xff] %v8122_v3  ;;  %10462 = vst [vmem:[#allocation387_spill] sm:$0xff] %v8127_v19  ;;  %v8137_v1 = vld [vmem:[%s10075_s3 + $0xd70] sm:$0xff]  ;;  %v8142_v17 = vld [vmem:[%s10075_s3 + $0xd78] sm:$0xff] }
  0xcf   :  { %10463 = vst [vmem:[#allocation388_spill] sm:$0xff] %v8132_v41  ;;  %10464 = vst [vmem:[#allocation389_spill] sm:$0xff] %v8137_v1  ;;  %v8147_v3 = vld [vmem:[%s10075_s3 + $0xd80] sm:$0xff]  ;;  %v8152_v19 = vld [vmem:[%s10075_s3 + $0xd88] sm:$0xff] }
  0xd0   :  { %10465 = vst [vmem:[#allocation390_spill] sm:$0xff] %v8142_v17  ;;  %10466 = vst [vmem:[#allocation391_spill] sm:$0xff] %v8147_v3  ;;  %v8157_v41 = vld [vmem:[%s10075_s3 + $0xd90] sm:$0xff]  ;;  %v8162_v1 = vld [vmem:[%s10075_s3 + $0xd98] sm:$0xff] }
  0xd1   :  { %10467 = vst [vmem:[#allocation392_spill] sm:$0xff] %v8152_v19  ;;  %10468 = vst [vmem:[#allocation393_spill] sm:$0xff] %v8157_v41  ;;  %v8167_v17 = vld [vmem:[%s10075_s3 + $0xda0] sm:$0xff]  ;;  %v8172_v3 = vld [vmem:[%s10075_s3 + $0xda8] sm:$0xff] }
  0xd2   :  { %10469 = vst [vmem:[#allocation394_spill] sm:$0xff] %v8162_v1  ;;  %10470 = vst [vmem:[#allocation395_spill] sm:$0xff] %v8167_v17  ;;  %v8177_v19 = vld [vmem:[%s10075_s3 + $0xdb0] sm:$0xff]  ;;  %v8182_v41 = vld [vmem:[%s10075_s3 + $0xdb8] sm:$0xff] }
  0xd3   :  { %10471 = vst [vmem:[#allocation396_spill] sm:$0xff] %v8172_v3  ;;  %10472 = vst [vmem:[#allocation397_spill] sm:$0xff] %v8177_v19  ;;  %v8187_v1 = vld [vmem:[%s10075_s3 + $0xdc0] sm:$0xff]  ;;  %v8192_v17 = vld [vmem:[%s10075_s3 + $0xdc8] sm:$0xff] }
  0xd4   :  { %10473 = vst [vmem:[#allocation398_spill] sm:$0xff] %v8182_v41  ;;  %10474 = vst [vmem:[#allocation399_spill] sm:$0xff] %v8187_v1  ;;  %v8197_v3 = vld [vmem:[%s10075_s3 + $0xdd0] sm:$0xff]  ;;  %v8202_v19 = vld [vmem:[%s10075_s3 + $0xdd8] sm:$0xff] }
  0xd5   :  { %10475 = vst [vmem:[#allocation400_spill] sm:$0xff] %v8192_v17  ;;  %10476 = vst [vmem:[#allocation401_spill] sm:$0xff] %v8197_v3  ;;  %v8207_v41 = vld [vmem:[%s10075_s3 + $0xde0] sm:$0xff]  ;;  %v8212_v1 = vld [vmem:[%s10075_s3 + $0xde8] sm:$0xff] }
  0xd6   :  { %10477 = vst [vmem:[#allocation402_spill] sm:$0xff] %v8202_v19  ;;  %10478 = vst [vmem:[#allocation403_spill] sm:$0xff] %v8207_v41  ;;  %v8217_v17 = vld [vmem:[%s10075_s3 + $0xdf0] sm:$0xff]  ;;  %v8222_v3 = vld [vmem:[%s10075_s3 + $0xdf8] sm:$0xff] }
  0xd7   :  { %10479 = vst [vmem:[#allocation404_spill] sm:$0xff] %v8212_v1  ;;  %10480 = vst [vmem:[#allocation405_spill] sm:$0xff] %v8217_v17  ;;  %v8227_v19 = vld [vmem:[%s10075_s3 + $0xe00] sm:$0xff]  ;;  %v8232_v41 = vld [vmem:[%s10075_s3 + $0xe08] sm:$0xff] }
  0xd8   :  { %10481 = vst [vmem:[#allocation406_spill] sm:$0xff] %v8222_v3  ;;  %10482 = vst [vmem:[#allocation407_spill] sm:$0xff] %v8227_v19  ;;  %v8237_v1 = vld [vmem:[%s10075_s3 + $0xe10] sm:$0xff]  ;;  %v8242_v17 = vld [vmem:[%s10075_s3 + $0xe18] sm:$0xff] }
  0xd9   :  { %10483 = vst [vmem:[#allocation408_spill] sm:$0xff] %v8232_v41  ;;  %10484 = vst [vmem:[#allocation409_spill] sm:$0xff] %v8237_v1  ;;  %v8247_v3 = vld [vmem:[%s10075_s3 + $0xe20] sm:$0xff]  ;;  %v8252_v19 = vld [vmem:[%s10075_s3 + $0xe28] sm:$0xff] }
  0xda   :  { %10485 = vst [vmem:[#allocation410_spill] sm:$0xff] %v8242_v17  ;;  %10486 = vst [vmem:[#allocation411_spill] sm:$0xff] %v8247_v3  ;;  %v8257_v41 = vld [vmem:[%s10075_s3 + $0xe30] sm:$0xff]  ;;  %v8262_v1 = vld [vmem:[%s10075_s3 + $0xe38] sm:$0xff] }
  0xdb   :  { %10487 = vst [vmem:[#allocation412_spill] sm:$0xff] %v8252_v19  ;;  %10488 = vst [vmem:[#allocation413_spill] sm:$0xff] %v8257_v41  ;;  %v8267_v17 = vld [vmem:[%s10075_s3 + $0xe40] sm:$0xff]  ;;  %v8272_v3 = vld [vmem:[%s10075_s3 + $0xe48] sm:$0xff] }
  0xdc   :  { %10489 = vst [vmem:[#allocation414_spill] sm:$0xff] %v8262_v1  ;;  %10490 = vst [vmem:[#allocation415_spill] sm:$0xff] %v8267_v17  ;;  %v8277_v19 = vld [vmem:[%s10075_s3 + $0xe50] sm:$0xff]  ;;  %v8282_v41 = vld [vmem:[%s10075_s3 + $0xe58] sm:$0xff] }
  0xdd   :  { %10491 = vst [vmem:[#allocation416_spill] sm:$0xff] %v8272_v3  ;;  %10492 = vst [vmem:[#allocation417_spill] sm:$0xff] %v8277_v19  ;;  %v8287_v1 = vld [vmem:[%s10075_s3 + $0xe60] sm:$0xff]  ;;  %v8292_v17 = vld [vmem:[%s10075_s3 + $0xe68] sm:$0xff] }
  0xde   :  { %10493 = vst [vmem:[#allocation418_spill] sm:$0xff] %v8282_v41  ;;  %10494 = vst [vmem:[#allocation419_spill] sm:$0xff] %v8287_v1  ;;  %v8297_v3 = vld [vmem:[%s10075_s3 + $0xe70] sm:$0xff]  ;;  %v8302_v19 = vld [vmem:[%s10075_s3 + $0xe78] sm:$0xff] }
  0xdf   :  { %10495 = vst [vmem:[#allocation420_spill] sm:$0xff] %v8292_v17  ;;  %10496 = vst [vmem:[#allocation421_spill] sm:$0xff] %v8297_v3  ;;  %v8307_v41 = vld [vmem:[%s10075_s3 + $0xe80] sm:$0xff]  ;;  %v8312_v1 = vld [vmem:[%s10075_s3 + $0xe88] sm:$0xff] }
  0xe0   :  { %10497 = vst [vmem:[#allocation422_spill] sm:$0xff] %v8302_v19  ;;  %10498 = vst [vmem:[#allocation423_spill] sm:$0xff] %v8307_v41  ;;  %v8317_v17 = vld [vmem:[%s10075_s3 + $0xe90] sm:$0xff]  ;;  %v8322_v3 = vld [vmem:[%s10075_s3 + $0xe98] sm:$0xff] }
  0xe1   :  { %10499 = vst [vmem:[#allocation424_spill] sm:$0xff] %v8312_v1  ;;  %10500 = vst [vmem:[#allocation425_spill] sm:$0xff] %v8317_v17  ;;  %v8327_v19 = vld [vmem:[%s10075_s3 + $0xea0] sm:$0xff]  ;;  %v8332_v41 = vld [vmem:[%s10075_s3 + $0xea8] sm:$0xff] }
  0xe2   :  { %10501 = vst [vmem:[#allocation426_spill] sm:$0xff] %v8322_v3  ;;  %10502 = vst [vmem:[#allocation427_spill] sm:$0xff] %v8327_v19  ;;  %v8337_v1 = vld [vmem:[%s10075_s3 + $0xeb0] sm:$0xff]  ;;  %v8342_v17 = vld [vmem:[%s10075_s3 + $0xeb8] sm:$0xff] }
  0xe3   :  { %10503 = vst [vmem:[#allocation428_spill] sm:$0xff] %v8332_v41  ;;  %10504 = vst [vmem:[#allocation429_spill] sm:$0xff] %v8337_v1  ;;  %v8347_v3 = vld [vmem:[%s10075_s3 + $0xec0] sm:$0xff]  ;;  %v8352_v19 = vld [vmem:[%s10075_s3 + $0xec8] sm:$0xff] }
  0xe4   :  { %10505 = vst [vmem:[#allocation430_spill] sm:$0xff] %v8342_v17  ;;  %10506 = vst [vmem:[#allocation431_spill] sm:$0xff] %v8347_v3  ;;  %v8357_v41 = vld [vmem:[%s10075_s3 + $0xed0] sm:$0xff]  ;;  %v8362_v1 = vld [vmem:[%s10075_s3 + $0xed8] sm:$0xff] }
  0xe5   :  { %10507 = vst [vmem:[#allocation432_spill] sm:$0xff] %v8352_v19  ;;  %10508 = vst [vmem:[#allocation433_spill] sm:$0xff] %v8357_v41  ;;  %v8367_v17 = vld [vmem:[%s10075_s3 + $0xee0] sm:$0xff]  ;;  %v8372_v3 = vld [vmem:[%s10075_s3 + $0xee8] sm:$0xff] }
  0xe6   :  { %10509 = vst [vmem:[#allocation434_spill] sm:$0xff] %v8362_v1  ;;  %10510 = vst [vmem:[#allocation435_spill] sm:$0xff] %v8367_v17  ;;  %v8377_v19 = vld [vmem:[%s10075_s3 + $0xef0] sm:$0xff]  ;;  %v8382_v41 = vld [vmem:[%s10075_s3 + $0xef8] sm:$0xff] }
  0xe7   :  { %10511 = vst [vmem:[#allocation436_spill] sm:$0xff] %v8372_v3  ;;  %10512 = vst [vmem:[#allocation437_spill] sm:$0xff] %v8377_v19  ;;  %v8387_v1 = vld [vmem:[%s10075_s3 + $0xf00] sm:$0xff]  ;;  %v8392_v17 = vld [vmem:[%s10075_s3 + $0xf08] sm:$0xff] }
  0xe8   :  { %10513 = vst [vmem:[#allocation438_spill] sm:$0xff] %v8382_v41  ;;  %10514 = vst [vmem:[#allocation439_spill] sm:$0xff] %v8387_v1  ;;  %v8397_v3 = vld [vmem:[%s10075_s3 + $0xf10] sm:$0xff]  ;;  %v8402_v19 = vld [vmem:[%s10075_s3 + $0xf18] sm:$0xff] }
  0xe9   :  { %10515 = vst [vmem:[#allocation440_spill] sm:$0xff] %v8392_v17  ;;  %10516 = vst [vmem:[#allocation441_spill] sm:$0xff] %v8397_v3  ;;  %v8407_v41 = vld [vmem:[%s10075_s3 + $0xf20] sm:$0xff]  ;;  %v8412_v1 = vld [vmem:[%s10075_s3 + $0xf28] sm:$0xff] }
  0xea   :  { %10517 = vst [vmem:[#allocation442_spill] sm:$0xff] %v8402_v19  ;;  %10518 = vst [vmem:[#allocation443_spill] sm:$0xff] %v8407_v41  ;;  %v8417_v17 = vld [vmem:[%s10075_s3 + $0xf30] sm:$0xff]  ;;  %v8422_v3 = vld [vmem:[%s10075_s3 + $0xf38] sm:$0xff] }
  0xeb   :  { %10519 = vst [vmem:[#allocation444_spill] sm:$0xff] %v8412_v1  ;;  %10520 = vst [vmem:[#allocation445_spill] sm:$0xff] %v8417_v17  ;;  %v8427_v19 = vld [vmem:[%s10075_s3 + $0xf40] sm:$0xff]  ;;  %v8432_v41 = vld [vmem:[%s10075_s3 + $0xf48] sm:$0xff] }
  0xec   :  { %10521 = vst [vmem:[#allocation446_spill] sm:$0xff] %v8422_v3  ;;  %10522 = vst [vmem:[#allocation447_spill] sm:$0xff] %v8427_v19  ;;  %v8437_v1 = vld [vmem:[%s10075_s3 + $0xf50] sm:$0xff]  ;;  %v8442_v17 = vld [vmem:[%s10075_s3 + $0xf58] sm:$0xff] }
  0xed   :  { %10523 = vst [vmem:[#allocation448_spill] sm:$0xff] %v8432_v41  ;;  %10524 = vst [vmem:[#allocation449_spill] sm:$0xff] %v8437_v1  ;;  %v8447_v3 = vld [vmem:[%s10075_s3 + $0xf60] sm:$0xff]  ;;  %v8452_v19 = vld [vmem:[%s10075_s3 + $0xf68] sm:$0xff] }
  0xee   :  { %10525 = vst [vmem:[#allocation450_spill] sm:$0xff] %v8442_v17  ;;  %10526 = vst [vmem:[#allocation451_spill] sm:$0xff] %v8447_v3  ;;  %v8457_v41 = vld [vmem:[%s10075_s3 + $0xf70] sm:$0xff]  ;;  %v8462_v1 = vld [vmem:[%s10075_s3 + $0xf78] sm:$0xff] }
  0xef   :  { %10527 = vst [vmem:[#allocation452_spill] sm:$0xff] %v8452_v19  ;;  %10528 = vst [vmem:[#allocation453_spill] sm:$0xff] %v8457_v41  ;;  %v8467_v17 = vld [vmem:[%s10075_s3 + $0xf80] sm:$0xff]  ;;  %v8472_v3 = vld [vmem:[%s10075_s3 + $0xf88] sm:$0xff] }
  0xf0   :  { %10529 = vst [vmem:[#allocation454_spill] sm:$0xff] %v8462_v1  ;;  %10530 = vst [vmem:[#allocation455_spill] sm:$0xff] %v8467_v17  ;;  %v8477_v19 = vld [vmem:[%s10075_s3 + $0xf90] sm:$0xff]  ;;  %v8482_v41 = vld [vmem:[%s10075_s3 + $0xf98] sm:$0xff] }
  0xf1   :  { %10531 = vst [vmem:[#allocation456_spill] sm:$0xff] %v8472_v3  ;;  %10532 = vst [vmem:[#allocation457_spill] sm:$0xff] %v8477_v19  ;;  %v8487_v1 = vld [vmem:[%s10075_s3 + $0xfa0] sm:$0xff]  ;;  %v8492_v17 = vld [vmem:[%s10075_s3 + $0xfa8] sm:$0xff] }
  0xf2   :  { %10533 = vst [vmem:[#allocation458_spill] sm:$0xff] %v8482_v41  ;;  %10534 = vst [vmem:[#allocation459_spill] sm:$0xff] %v8487_v1  ;;  %v8497_v3 = vld [vmem:[%s10075_s3 + $0xfb0] sm:$0xff]  ;;  %v8502_v19 = vld [vmem:[%s10075_s3 + $0xfb8] sm:$0xff] }
  0xf3   :  { %10535 = vst [vmem:[#allocation460_spill] sm:$0xff] %v8492_v17  ;;  %10536 = vst [vmem:[#allocation461_spill] sm:$0xff] %v8497_v3  ;;  %v8507_v41 = vld [vmem:[%s10075_s3 + $0xfc0] sm:$0xff]  ;;  %v8512_v1 = vld [vmem:[%s10075_s3 + $0xfc8] sm:$0xff] }
  0xf4   :  { %10537 = vst [vmem:[#allocation462_spill] sm:$0xff] %v8502_v19  ;;  %10538 = vst [vmem:[#allocation463_spill] sm:$0xff] %v8507_v41  ;;  %v8517_v17 = vld [vmem:[%s10075_s3 + $0xfd0] sm:$0xff]  ;;  %v8522_v3 = vld [vmem:[%s10075_s3 + $0xfd8] sm:$0xff] }
  0xf5   :  { %10539 = vst [vmem:[#allocation464_spill] sm:$0xff] %v8512_v1  ;;  %10540 = vst [vmem:[#allocation465_spill] sm:$0xff] %v8517_v17  ;;  %v8527_v19 = vld [vmem:[%s10075_s3 + $0xfe0] sm:$0xff]  ;;  %v8532_v41 = vld [vmem:[%s10075_s3 + $0xfe8] sm:$0xff] }
  0xf6   :  { %10541 = vst [vmem:[#allocation466_spill] sm:$0xff] %v8522_v3  ;;  %10542 = vst [vmem:[#allocation467_spill] sm:$0xff] %v8527_v19  ;;  %v8537_v1 = vld [vmem:[%s10075_s3 + $0xff0] sm:$0xff]  ;;  %v8542_v17 = vld [vmem:[%s10075_s3 + $0xff8] sm:$0xff] }
  0xf7   :  { %10543 = vst [vmem:[#allocation468_spill] sm:$0xff] %v8532_v41  ;;  %10544 = vst [vmem:[#allocation469_spill] sm:$0xff] %v8537_v1  ;;  %v8547_v3 = vld [vmem:[%s10075_s3 + $0x1000] sm:$0xff]  ;;  %v8552_v19 = vld [vmem:[%s10075_s3 + $0x1008] sm:$0xff] }
  0xf8   :  { %10545 = vst [vmem:[#allocation470_spill] sm:$0xff] %v8542_v17  ;;  %10546 = vst [vmem:[#allocation471_spill] sm:$0xff] %v8547_v3  ;;  %v8557_v41 = vld [vmem:[%s10075_s3 + $0x1010] sm:$0xff]  ;;  %v8562_v1 = vld [vmem:[%s10075_s3 + $0x1018] sm:$0xff] }
  0xf9   :  { %10547 = vst [vmem:[#allocation472_spill] sm:$0xff] %v8552_v19  ;;  %10548 = vst [vmem:[#allocation473_spill] sm:$0xff] %v8557_v41  ;;  %v8567_v17 = vld [vmem:[%s10075_s3 + $0x1020] sm:$0xff]  ;;  %v8572_v3 = vld [vmem:[%s10075_s3 + $0x1028] sm:$0xff] }
  0xfa   :  { %10549 = vst [vmem:[#allocation474_spill] sm:$0xff] %v8562_v1  ;;  %10550 = vst [vmem:[#allocation475_spill] sm:$0xff] %v8567_v17  ;;  %v8577_v19 = vld [vmem:[%s10075_s3 + $0x1030] sm:$0xff]  ;;  %v8582_v41 = vld [vmem:[%s10075_s3 + $0x1038] sm:$0xff] }
  0xfb   :  { %10551 = vst [vmem:[#allocation476_spill] sm:$0xff] %v8572_v3  ;;  %10552 = vst [vmem:[#allocation477_spill] sm:$0xff] %v8577_v19  ;;  %v8587_v1 = vld [vmem:[%s10075_s3 + $0x1040] sm:$0xff]  ;;  %v8592_v17 = vld [vmem:[%s10075_s3 + $0x1048] sm:$0xff] }
  0xfc   :  { %10553 = vst [vmem:[#allocation478_spill] sm:$0xff] %v8582_v41  ;;  %10554 = vst [vmem:[#allocation479_spill] sm:$0xff] %v8587_v1  ;;  %v8597_v3 = vld [vmem:[%s10075_s3 + $0x1050] sm:$0xff]  ;;  %v8602_v19 = vld [vmem:[%s10075_s3 + $0x1058] sm:$0xff] }
  0xfd   :  { %10555 = vst [vmem:[#allocation480_spill] sm:$0xff] %v8592_v17  ;;  %10556 = vst [vmem:[#allocation481_spill] sm:$0xff] %v8597_v3  ;;  %v8607_v41 = vld [vmem:[%s10075_s3 + $0x1060] sm:$0xff]  ;;  %v8612_v1 = vld [vmem:[%s10075_s3 + $0x1068] sm:$0xff] }
  0xfe   :  { %10557 = vst [vmem:[#allocation482_spill] sm:$0xff] %v8602_v19  ;;  %10558 = vst [vmem:[#allocation483_spill] sm:$0xff] %v8607_v41  ;;  %v8617_v17 = vld [vmem:[%s10075_s3 + $0x1070] sm:$0xff]  ;;  %v8622_v3 = vld [vmem:[%s10075_s3 + $0x1078] sm:$0xff] }
  0xff   :  { %10559 = vst [vmem:[#allocation484_spill] sm:$0xff] %v8612_v1  ;;  %10560 = vst [vmem:[#allocation485_spill] sm:$0xff] %v8617_v17  ;;  %v8627_v19 = vld [vmem:[%s10075_s3 + $0x1080] sm:$0xff]  ;;  %v8632_v41 = vld [vmem:[%s10075_s3 + $0x1088] sm:$0xff] }
 0x100   :  { %10561 = vst [vmem:[#allocation486_spill] sm:$0xff] %v8622_v3  ;;  %10562 = vst [vmem:[#allocation487_spill] sm:$0xff] %v8627_v19  ;;  %v8637_v1 = vld [vmem:[%s10075_s3 + $0x1090] sm:$0xff]  ;;  %v8642_v17 = vld [vmem:[%s10075_s3 + $0x1098] sm:$0xff] }
 0x101   :  { %10563 = vst [vmem:[#allocation488_spill] sm:$0xff] %v8632_v41  ;;  %10564 = vst [vmem:[#allocation489_spill] sm:$0xff] %v8637_v1  ;;  %v8647_v3 = vld [vmem:[%s10075_s3 + $0x10a0] sm:$0xff]  ;;  %v8652_v19 = vld [vmem:[%s10075_s3 + $0x10a8] sm:$0xff] }
 0x102   :  { %10565 = vst [vmem:[#allocation490_spill] sm:$0xff] %v8642_v17  ;;  %10566 = vst [vmem:[#allocation491_spill] sm:$0xff] %v8647_v3  ;;  %v8657_v41 = vld [vmem:[%s10075_s3 + $0x10b0] sm:$0xff]  ;;  %v8662_v1 = vld [vmem:[%s10075_s3 + $0x10b8] sm:$0xff] }
 0x103   :  { %10567 = vst [vmem:[#allocation492_spill] sm:$0xff] %v8652_v19  ;;  %10568 = vst [vmem:[#allocation493_spill] sm:$0xff] %v8657_v41  ;;  %v8667_v17 = vld [vmem:[%s10075_s3 + $0x10c0] sm:$0xff]  ;;  %v8672_v3 = vld [vmem:[%s10075_s3 + $0x10c8] sm:$0xff] }
 0x104   :  { %10569 = vst [vmem:[#allocation494_spill] sm:$0xff] %v8662_v1  ;;  %10570 = vst [vmem:[#allocation495_spill] sm:$0xff] %v8667_v17  ;;  %v8677_v19 = vld [vmem:[%s10075_s3 + $0x10d0] sm:$0xff]  ;;  %v8682_v41 = vld [vmem:[%s10075_s3 + $0x10d8] sm:$0xff] }
 0x105   :  { %10571 = vst [vmem:[#allocation496_spill] sm:$0xff] %v8672_v3  ;;  %10572 = vst [vmem:[#allocation497_spill] sm:$0xff] %v8677_v19  ;;  %v8687_v1 = vld [vmem:[%s10075_s3 + $0x10e0] sm:$0xff]  ;;  %v8692_v17 = vld [vmem:[%s10075_s3 + $0x10e8] sm:$0xff] }
 0x106   :  { %10573 = vst [vmem:[#allocation498_spill] sm:$0xff] %v8682_v41  ;;  %10574 = vst [vmem:[#allocation499_spill] sm:$0xff] %v8687_v1  ;;  %v8697_v3 = vld [vmem:[%s10075_s3 + $0x10f0] sm:$0xff]  ;;  %v8702_v19 = vld [vmem:[%s10075_s3 + $0x10f8] sm:$0xff] }
 0x107   :  { %10575 = vst [vmem:[#allocation500_spill] sm:$0xff] %v8692_v17  ;;  %10576 = vst [vmem:[#allocation501_spill] sm:$0xff] %v8697_v3  ;;  %v8707_v41 = vld [vmem:[%s10075_s3 + $0x1100] sm:$0xff]  ;;  %v8712_v1 = vld [vmem:[%s10075_s3 + $0x1108] sm:$0xff] }
 0x108   :  { %10577 = vst [vmem:[#allocation502_spill] sm:$0xff] %v8702_v19  ;;  %10578 = vst [vmem:[#allocation503_spill] sm:$0xff] %v8707_v41  ;;  %v8717_v17 = vld [vmem:[%s10075_s3 + $0x1110] sm:$0xff]  ;;  %v8722_v3 = vld [vmem:[%s10075_s3 + $0x1118] sm:$0xff] }
 0x109   :  { %10579 = vst [vmem:[#allocation504_spill] sm:$0xff] %v8712_v1  ;;  %10580 = vst [vmem:[#allocation505_spill] sm:$0xff] %v8717_v17  ;;  %v8727_v19 = vld [vmem:[%s10075_s3 + $0x1120] sm:$0xff]  ;;  %v8732_v41 = vld [vmem:[%s10075_s3 + $0x1128] sm:$0xff] }
 0x10a   :  { %10581 = vst [vmem:[#allocation506_spill] sm:$0xff] %v8722_v3  ;;  %10582 = vst [vmem:[#allocation507_spill] sm:$0xff] %v8727_v19  ;;  %v8737_v1 = vld [vmem:[%s10075_s3 + $0x1130] sm:$0xff]  ;;  %v8742_v17 = vld [vmem:[%s10075_s3 + $0x1138] sm:$0xff] }
 0x10b   :  { %10583 = vst [vmem:[#allocation508_spill] sm:$0xff] %v8732_v41  ;;  %10584 = vst [vmem:[#allocation509_spill] sm:$0xff] %v8737_v1  ;;  %v8747_v3 = vld [vmem:[%s10075_s3 + $0x1140] sm:$0xff]  ;;  %v8752_v19 = vld [vmem:[%s10075_s3 + $0x1148] sm:$0xff] }
 0x10c   :  { %10585 = vst [vmem:[#allocation510_spill] sm:$0xff] %v8742_v17  ;;  %10586 = vst [vmem:[#allocation511_spill] sm:$0xff] %v8747_v3  ;;  %v8757_v41 = vld [vmem:[%s10075_s3 + $0x1150] sm:$0xff]  ;;  %v8762_v1 = vld [vmem:[%s10075_s3 + $0x1158] sm:$0xff] }
 0x10d   :  { %10587 = vst [vmem:[#allocation512_spill] sm:$0xff] %v8752_v19  ;;  %10588 = vst [vmem:[#allocation513_spill] sm:$0xff] %v8757_v41  ;;  %v8767_v17 = vld [vmem:[%s10075_s3 + $0x1160] sm:$0xff]  ;;  %v8772_v3 = vld [vmem:[%s10075_s3 + $0x1168] sm:$0xff] }
 0x10e   :  { %10589 = vst [vmem:[#allocation514_spill] sm:$0xff] %v8762_v1  ;;  %10590 = vst [vmem:[#allocation515_spill] sm:$0xff] %v8767_v17  ;;  %v8777_v19 = vld [vmem:[%s10075_s3 + $0x1170] sm:$0xff]  ;;  %v8782_v41 = vld [vmem:[%s10075_s3 + $0x1178] sm:$0xff] }
 0x10f   :  { %10591 = vst [vmem:[#allocation516_spill] sm:$0xff] %v8772_v3  ;;  %10592 = vst [vmem:[#allocation517_spill] sm:$0xff] %v8777_v19  ;;  %v8787_v1 = vld [vmem:[%s10075_s3 + $0x1180] sm:$0xff]  ;;  %v8792_v17 = vld [vmem:[%s10075_s3 + $0x1188] sm:$0xff] }
 0x110   :  { %10593 = vst [vmem:[#allocation518_spill] sm:$0xff] %v8782_v41  ;;  %10594 = vst [vmem:[#allocation519_spill] sm:$0xff] %v8787_v1  ;;  %v8797_v3 = vld [vmem:[%s10075_s3 + $0x1190] sm:$0xff]  ;;  %v8802_v19 = vld [vmem:[%s10075_s3 + $0x1198] sm:$0xff] }
 0x111   :  { %10595 = vst [vmem:[#allocation520_spill] sm:$0xff] %v8792_v17  ;;  %10596 = vst [vmem:[#allocation521_spill] sm:$0xff] %v8797_v3  ;;  %v8807_v41 = vld [vmem:[%s10075_s3 + $0x11a0] sm:$0xff]  ;;  %v8812_v1 = vld [vmem:[%s10075_s3 + $0x11a8] sm:$0xff] }
 0x112   :  { %10597 = vst [vmem:[#allocation522_spill] sm:$0xff] %v8802_v19  ;;  %10598 = vst [vmem:[#allocation523_spill] sm:$0xff] %v8807_v41  ;;  %v8817_v17 = vld [vmem:[%s10075_s3 + $0x11b0] sm:$0xff]  ;;  %v8822_v3 = vld [vmem:[%s10075_s3 + $0x11b8] sm:$0xff] }
 0x113   :  { %10599 = vst [vmem:[#allocation524_spill] sm:$0xff] %v8812_v1  ;;  %10600 = vst [vmem:[#allocation525_spill] sm:$0xff] %v8817_v17  ;;  %v8827_v19 = vld [vmem:[%s10075_s3 + $0x11c0] sm:$0xff]  ;;  %v8832_v41 = vld [vmem:[%s10075_s3 + $0x11c8] sm:$0xff] }
 0x114   :  { %10601 = vst [vmem:[#allocation526_spill] sm:$0xff] %v8822_v3  ;;  %10602 = vst [vmem:[#allocation527_spill] sm:$0xff] %v8827_v19  ;;  %v8837_v1 = vld [vmem:[%s10075_s3 + $0x11d0] sm:$0xff]  ;;  %v8842_v17 = vld [vmem:[%s10075_s3 + $0x11d8] sm:$0xff] }
 0x115   :  { %10603 = vst [vmem:[#allocation528_spill] sm:$0xff] %v8832_v41  ;;  %10604 = vst [vmem:[#allocation529_spill] sm:$0xff] %v8837_v1  ;;  %v8847_v3 = vld [vmem:[%s10075_s3 + $0x11e0] sm:$0xff]  ;;  %v8852_v19 = vld [vmem:[%s10075_s3 + $0x11e8] sm:$0xff] }
 0x116   :  { %10605 = vst [vmem:[#allocation530_spill] sm:$0xff] %v8842_v17  ;;  %10606 = vst [vmem:[#allocation531_spill] sm:$0xff] %v8847_v3  ;;  %v8857_v41 = vld [vmem:[%s10075_s3 + $0x11f0] sm:$0xff]  ;;  %v8862_v1 = vld [vmem:[%s10075_s3 + $0x11f8] sm:$0xff] }
 0x117   :  { %10607 = vst [vmem:[#allocation532_spill] sm:$0xff] %v8852_v19  ;;  %10608 = vst [vmem:[#allocation533_spill] sm:$0xff] %v8857_v41 }
 0x118   :  { %10609 = vst [vmem:[#allocation534_spill] sm:$0xff] %v8862_v1 }
 0x119   :  { %1216 = vsyncadd [#allocation3], 73728  ;;  %v1218_v3 = vld [vmem:[%s10072_s0] sm:$0xff]  ;;  %v1219_v17 = vld [vmem:[%s10072_s0 + $0x8] sm:$0xff]  ;;  %v10080_v19 = vmov 0.0|0.0   ;;  %vm5939_vm0 = vmmov 0  }
 0x11a   :  { %5165 = vmatprep.subr.bf16.mxu0 %v10080_v19  ;;  %5187 = vmatprep.subr.bf16.mxu1 %v10080_v19  ;;  %v5166_v41 = vpack.c.bf16 %v1219_v17, %v1218_v3  ;;  %v4883_v57 = vld [vmem:[%s10072_s0 + $0x70] sm:$0xff]  ;;  %v4884_v1 = vld [vmem:[%s10072_s0 + $0x78] sm:$0xff]  ;;  %v4885_v3 = vld [vmem:[%s10072_s0 + $0x80] sm:$0xff]  ;;  %v10082_v19 = vmov 0.0   ;;  %v10610_v49 = vmov 0.0|0.0   ;;  %vm1242_vm1 = vcmask 1043456  }
 0x11b   :  { %v1220_v43 = vld [vmem:[%s10072_s0 + $0x10] sm:$0xff]  ;;  %v5188_v59 = vpack.c.bf16 %v4884_v1, %v4883_v57  ;;  %v1221_v33 = vld [vmem:[%s10072_s0 + $0x18] sm:$0xff]  ;;  %v4886_v17 = vld [vmem:[%s10072_s0 + $0x88] sm:$0xff]  ;;  %5131 = vmatprep.mubr.msk.f32.mxu0 %vm5939_vm0, %v10082_v19  ;;  %5162 = vmatprep.mubr.msk.f32.mxu1 %vm5939_vm0, %v10082_v19  ;;  %v5941_v57 = vmov 0   ;;  %vm5942_vm2 = vmmov 1   ;;  %vm1238_vm4 = vcmask 883712  }
 0x11c   :  { %5167 = vmatpush3.bf16.msra.mxu0 %v5166_v41  ;;  %v5169_v1 = vpack.c.bf16 %v1221_v33, %v1220_v43  ;;  %5911 = vset.pattern.permute.xlu0 %v5941_v57  ;;  %v5191_v35 = vpack.c.bf16 %v4886_v17, %v4885_v3  ;;  %v1222_v51 = vld [vmem:[%s10072_s0 + $0x20] sm:$0xff]  ;;  %v1223_v62 = vld [vmem:[%s10072_s0 + $0x28] sm:$0xff]  ;;  %v4887_v33 = vld [vmem:[%s10072_s0 + $0x90] sm:$0xff] }
 0x11d   :  { %5189 = vmatpush3.bf16.msra.mxu1 %v5188_v59  ;;  %5168 = vmatprep.subr.bf16.mxu0 %v10610_v49  ;;  %v4888_v41 = vld [vmem:[%s10072_s0 + $0x98] sm:$0xff]  ;;  %v5172_v43 = vpack.c.bf16 %v1223_v62, %v1222_v51  ;;  %v1224_v3 = vld [vmem:[%s10072_s0 + $0x30] sm:$0xff]  ;;  %v4889_v57 = vld [vmem:[%s10072_s0 + $0xa0] sm:$0xff] }
 0x11e   :  { %5190 = vmatprep.subr.bf16.mxu1 %v10610_v49  ;;  %v5194_v59 = vpack.c.bf16 %v4888_v41, %v4887_v33  ;;  %v1225_v17 = vld [vmem:[%s10072_s0 + $0x38] sm:$0xff]  ;;  %v1232_v51 = vld [vmem:[%s10074_s2] sm:$0xff]  ;;  %v1227_v41 = vld [vmem:[%s10072_s0 + $0x48] sm:$0xff] }
 0x11f   :  { %v5175_v62 = vpack.c.bf16 %v1225_v17, %v1224_v3  ;;  %1235 = vperm.xlu0 %5911, %v1232_v51   ;;  %v1226_v33 = vld [vmem:[%s10072_s0 + $0x40] sm:$0xff]  ;;  %vm5185_vm3 = vmpackc.low %vm1242_vm1, %vm5942_vm2 }
 0x120   :  { %5170 = vmatpush3.bf16.msra.mxu0 %v5169_v1  ;;  %v5178_v3 = vpack.c.bf16 %v1227_v41, %v1226_v33  ;;  %v4893_v51 = vld [vmem:[%s10072_s0 + $0xc0] sm:$0xff] }
 0x121   :  { %5192 = vmatpush3.bf16.msra.mxu1 %v5191_v35  ;;  %5171 = vmatprep.subr.bf16.mxu0 %v10610_v49  ;;  %v4890_v35 = vld [vmem:[%s10072_s0 + $0xa8] sm:$0xff]  ;;  %v1230_v41 = vld [vmem:[%s10072_s0 + $0x60] sm:$0xff] }
 0x122   :  { %5193 = vmatprep.subr.bf16.mxu1 %v10610_v49  ;;  %v5197_v1 = vpack.c.bf16 %v4890_v35, %v4889_v57  ;;  %v1228_v57 = vld [vmem:[%s10072_s0 + $0x50] sm:$0xff]  ;;  %v1229_v35 = vld [vmem:[%s10072_s0 + $0x58] sm:$0xff] }
 0x124   :  { %5173 = vmatpush3.bf16.msra.mxu0 %v5172_v43  ;;  %v4891_v43 = vld [vmem:[%s10072_s0 + $0xb0] sm:$0xff] }
 0x125   :  { %5195 = vmatpush3.bf16.msra.mxu1 %v5194_v59  ;;  %5174 = vmatprep.subr.bf16.mxu0 %v10610_v49  ;;  %v4892_v59 = vld [vmem:[%s10072_s0 + $0xb8] sm:$0xff] }
 0x126   :  { %5196 = vmatprep.subr.bf16.mxu1 %v10610_v49  ;;  %v5200_v17 = vpack.c.bf16 %v4892_v59, %v4891_v43  ;;  %v1231_v43 = vld [vmem:[%s10072_s0 + $0x68] sm:$0xf]  ;;  %v4895_v59 = vld [vmem:[%s10072_s0 + $0xd0] sm:$0xff] }
 0x128   :  { %5176 = vmatpush3.bf16.msra.mxu0 %v5175_v62  ;;  %v4894_v62 = vld [vmem:[%s10072_s0 + $0xc8] sm:$0xff] }
 0x129   :  { %5198 = vmatpush3.bf16.msra.mxu1 %v5197_v1  ;;  %5177 = vmatprep.subr.bf16.mxu0 %v10610_v49  ;;  %v5181_v1 = vpack.c.bf16 %v1229_v35, %v1228_v57  ;;  %v5203_v33 = vpack.c.bf16 %v4894_v62, %v4893_v51  ;;  %v1217_v35 = vld [vmem:[%s10073_s1] sm:$0xff] }
 0x12a   :  { %5199 = vmatprep.subr.bf16.mxu1 %v10610_v49 }
 0x12c   :  { %5179 = vmatpush3.bf16.msra.mxu0 %v5178_v3  ;;  %v4896_v3 = vld [vmem:[%s10072_s0 + $0xd8] sm:$0xf] }
 0x12d   :  { %5201 = vmatpush3.bf16.msra.mxu1 %v5200_v17  ;;  %5180 = vmatprep.subr.bf16.mxu0 %v10610_v49  ;;  %v5184_v17 = vpack.c.bf16 %v1231_v43, %v1230_v41  ;;  %v5206_v57 = vpack.c.bf16 %v4896_v3, %v4895_v59  ;;  %v5225_v3 = vpack.c.bf16 %v6402_v37, %v6362_v61 }
 0x12e   :  { %5202 = vmatprep.subr.bf16.mxu1 %v10610_v49 }
 0x130   :  { %5182 = vmatpush3.bf16.msra.mxu0 %v5181_v1 }
 0x131   :  { %5204 = vmatpush3.bf16.msra.mxu1 %v5203_v33  ;;  %5183 = vmatprep.subr.bf16.mxu0 %v10610_v49 }
 0x132   :  { %5205 = vmatprep.subr.bf16.mxu1 %v10610_v49  ;;  %v5209_v49 = vpack.c.bf16 %v6392_v39, %v6352_v63 }
 0x134   :  { %5186 = vmatpush3.bf16.msk.msra.mxu0 %vm5185_vm3, %v5184_v17  ;;  %v5211_v17 = vpack.c.bf16 %v6387_v47, %v6347_v46 }
 0x135   :  { %5208 = vmatpush3.bf16.msk.msra.mxu1 %vm5185_vm3, %v5206_v57  ;;  %v5227_v57 = vpack.c.bf16 %v6397_v45, %v6357_v55 }
 0x137   :  { %5132 = vmatmul.mubr.msk.f32.vlgmr.msra.gmra.mrb[0].mxu0 %vm1238_vm4, %v1217_v35 }
 0x138   :  { %5163 = vmatmul.mubr.msk.f32.vlgmr.msra.gmra.mrb[0].mxu1 %vm1238_vm4, %v1217_v35  ;;  %v10611_v35 = vmov 0.0  }
 0x139   :  { %1633 = vmatprep.mubr.f32.mxu0 %v10611_v35 }
 0x19e   :  { %v1236_v51 = vpop.permute.xlu0 %1235 }
 0x20a   :  { %v1312_v62 = vpop.f32.mrb[0].mxu0 }
 0x20b   :  { %v1313_v1 = vadd.f32 %v1312_v62, %v1236_v51  ;;  %v1401_v33 = vpop.f32.mrb[0].mxu1  ;;  %v5133_v41 = vpop.f32.mrb[1].mxu0 }
 0x20c   :  { %v1402_v43 = vadd.f32 %v1401_v33, %v1236_v51  ;;  %v5164_v19 = vpop.f32.mrb[1].mxu1 }
 0x20d   :  { %v8970_v14 = vmax.f32 %v1313_v1, 0.0 }
 0x20e   :  { %v8972_v59 = vmax.f32 %v1402_v43, 0.0 }
 0x20f   :  { %5934 = dma.done.wait [#allocation3], 73728 }
 0x210   :  { %5935 = vsyncadd [#allocation3], 4294893568  ;;  %v5213_v19 = vpack.c.bf16 %v6472_v4, %v6432_v23  ;;  %v5229_v51 = vpack.c.bf16 %v6482_v7, %v6442_v21  ;;  %1704 = vmatprep.mubr.f32.mxu1 %v10611_v35  ;;  %5210 = vmatprep.subr.bf16.mxu0 %v5209_v49  ;;  %v5215_v37 = vpack.c.bf16 %v6467_v12, %v6427_v31  ;;  %vm1414_vm5 = vcmask 1040384   ;;  %v10624_v46 = vld [vmem:[#allocation94_spill] sm:$0xff]  ;;  %v10629_v55 = vld [vmem:[#allocation97_spill] sm:$0xff]  ;;  %s5943_s21 = smov [#allocation4]  }
 0x211   :  { %5226 = vmatprep.subr.bf16.mxu1 %v5225_v3  ;;  %5212 = vmatpush1.bf16.msra.mxu0 %v5211_v17  ;;  %v5231_v39 = vpack.c.bf16 %v6477_v15, %v6437_v29  ;;  %v5217_v4 = vpack.c.bf16 %v6552_v34, %v6512_v50  ;;  %v5233_v7 = vpack.c.bf16 %v6562_v32, %v6522_v48  ;;  %v1489_v32 = vrot.slane %v8970_v14, 1  ;;  %v10619_v34 = vld [vmem:[#allocation87_spill] sm:$0xff]  ;;  %v10625_v47 = vld [vmem:[#allocation98_spill] sm:$0xff]  ;;  %v10634_v1 = vld [vmem:[#allocation12_spill] sm:$0xff]  ;;  %s4859_s22 = sshll.u32 %s5943_s21, 4  ;;  %s4860_s22 = int_to_ptr.vmem [resolvable:$true] %s4859_s22 }
 0x212   :  { %5228 = vmatpush1.bf16.msra.mxu1 %v5227_v57  ;;  %5214 = vmatprep.subr.bf16.mxu0 %v5213_v19  ;;  %v5219_v21 = vpack.c.bf16 %v6547_v42, %v6507_v58  ;;  %v5235_v23 = vpack.c.bf16 %v6557_v40, %v6517_v56  ;;  %v5221_v12 = vpack.c.bf16 %v6632_v2, %v6592_v18  ;;  %vm1565_vm6 = vcmask 588800   ;;  %v10622_v42 = vld [vmem:[#allocation92_spill] sm:$0xff]  ;;  %v10626_v50 = vld [vmem:[#allocation91_spill] sm:$0xff]  ;;  %v10632_v61 = vld [vmem:[#allocation10_spill] sm:$0xff]  ;;  %p5917_p1 = scmp.lt.s32.totalorder %s4860_s22, %s4860_s22 }
 0x213   :  { %5230 = vmatprep.subr.bf16.mxu1 %v5229_v51  ;;  %v5237_v15 = vpack.c.bf16 %v6642_v0, %v6602_v16  ;;  %v5223_v29 = vpack.c.bf16 %v6627_v10, %v6587_v26  ;;  %v5239_v31 = vpack.c.bf16 %v6637_v8, %v6597_v24  ;;  %v5241_v0 = vpack.c.bf16 %v6412_v22, %v6372_v38  ;;  %v10613_v22 = vld [vmem:[#allocation82_spill] sm:$0xff]  ;;  %v10621_v38 = vld [vmem:[#allocation89_spill] sm:$0xff]  ;;  %v10630_v58 = vld [vmem:[#allocation100_spill] sm:$0xff] }
 0x214   :  { %v5257_v2 = vpack.c.bf16 %v6422_v20, %v6382_v36  ;;  %v1491_v8 = vsel %vm1414_vm5, %v1489_v32, %v8972_v59  ;;  %v5243_v10 = vpack.c.bf16 %v6407_v30, %v6367_v53  ;;  %v5259_v16 = vpack.c.bf16 %v6417_v28, %v6377_v44  ;;  %v10612_v20 = vld [vmem:[#allocation81_spill] sm:$0xff]  ;;  %v10618_v30 = vld [vmem:[#allocation83_spill] sm:$0xff]  ;;  %v10623_v44 = vld [vmem:[#allocation96_spill] sm:$0xff] }
 0x215   :  { %5216 = vmatpush1.bf16.msra.mxu0 %v5215_v37  ;;  %v5247_v18 = vpack.c.bf16 %v6487_v13, %v6447_v52  ;;  %v5263_v24 = vpack.c.bf16 %v10613_v22, %v10612_v20  ;;  %v5251_v13 = vpack.c.bf16 %v10619_v34, %v10618_v30  ;;  %v10620_v36 = vld [vmem:[#allocation85_spill] sm:$0xff]  ;;  %v5253_v45 = vpack.c.bf16 %v10623_v44, %v10622_v42  ;;  %v10627_v52 = vld [vmem:[#allocation95_spill] sm:$0xff]  ;;  %v10633_v63 = vld [vmem:[#allocation18_spill] sm:$0xff] }
 0x216   :  { %5232 = vmatpush1.bf16.msra.mxu1 %v5231_v39  ;;  %5218 = vmatprep.subr.bf16.mxu0 %v5217_v4  ;;  %v5267_v40 = vpack.c.bf16 %v10621_v38, %v10620_v36  ;;  %v5269_v48 = vpack.c.bf16 %v10625_v47, %v10624_v46  ;;  %v5255_v53 = vpack.c.bf16 %v10627_v52, %v10626_v50  ;;  %v10635_v33 = vld [vmem:[#allocation20_spill] sm:$0xff]  ;;  %v10636_v43 = vld [vmem:[#allocation9_spill] sm:$0xff]  ;;  %v10638_v17 = vld [vmem:[#allocation11_spill] sm:$0xff]  ;;  %v1412_v46 = vrot.slane %v8972_v59, 7 }
 0x217   :  { %5234 = vmatprep.subr.bf16.mxu1 %v5233_v7  ;;  %v5273_v62 = vpack.c.bf16 %v10633_v63, %v10632_v61  ;;  %v5289_v41 = vpack.c.bf16 %v10635_v33, %v10634_v1  ;;  %v10637_v49 = vld [vmem:[#allocation17_spill] sm:$0xff]  ;;  %v10639_v57 = vld [vmem:[#allocation19_spill] sm:$0xff]  ;;  %v10642_v39 = vld [vmem:[#allocation26_spill] sm:$0xff]  ;;  %vm4851_vm7 = vcmask 33792  }
 0x218   :  { %v5275_v3 = vpack.c.bf16 %v10637_v49, %v10636_v43  ;;  %v5291_v19 = vpack.c.bf16 %v10639_v57, %v10638_v17  ;;  %v10640_v51 = vld [vmem:[#allocation99_spill] sm:$0xff]  ;;  %v10641_v37 = vld [vmem:[#allocation101_spill] sm:$0xff]  ;;  %v10643_v4 = vld [vmem:[#allocation34_spill] sm:$0xff] }
 0x219   :  { %5220 = vmatpush1.bf16.msra.mxu0 %v5219_v21  ;;  %v5277_v7 = vpack.c.bf16 %v10643_v4, %v10642_v39  ;;  %v10644_v21 = vld [vmem:[#allocation28_spill] sm:$0xff]  ;;  %v10648_v32 = vld [vmem:[#allocation27_spill] sm:$0xff]  ;;  %v10655_v22 = vld [vmem:[#allocation49_spill] sm:$0xff] }
 0x21a   :  { %5236 = vmatpush1.bf16.msra.mxu1 %v5235_v23  ;;  %5222 = vmatprep.subr.bf16.mxu0 %v5221_v12  ;;  %v10645_v23 = vld [vmem:[#allocation36_spill] sm:$0xff]  ;;  %v10662_v36 = vld [vmem:[#allocation57_spill] sm:$0xff]  ;;  %v10664_v42 = vld [vmem:[#allocation59_spill] sm:$0xff] }
 0x21b   :  { %5238 = vmatprep.subr.bf16.mxu1 %v5237_v15  ;;  %v5293_v12 = vpack.c.bf16 %v10645_v23, %v10644_v21  ;;  %v10646_v15 = vld [vmem:[#allocation25_spill] sm:$0xff]  ;;  %v10660_v30 = vld [vmem:[#allocation60_spill] sm:$0xff]  ;;  %v10665_v44 = vld [vmem:[#allocation67_spill] sm:$0xff] }
 0x21c   :  { %v10661_v34 = vld [vmem:[#allocation68_spill] sm:$0xff]  ;;  %v10663_v38 = vld [vmem:[#allocation65_spill] sm:$0xff]  ;;  %v10666_v47 = vld [vmem:[#allocation74_spill] sm:$0xff] }
 0x21d   :  { %5224 = vmatpush1.bf16.msra.mxu0 %v5223_v29  ;;  %v10647_v29 = vld [vmem:[#allocation33_spill] sm:$0xff]  ;;  %v10668_v50 = vld [vmem:[#allocation14_spill] sm:$0xff]  ;;  %v10675_v1 = vld [vmem:[#allocation23_spill] sm:$0xff] }
 0x21e   :  { %5240 = vmatpush1.bf16.msra.mxu1 %v5239_v31  ;;  %1585 = vmatprep.subr.mxu0 %v6672_v11  ;;  %v5261_v11 = vpack.c.bf16 %v6502_v60, %v6462_v6  ;;  %v10616_v6 = vld [vmem:[#allocation86_spill] sm:$0xff]  ;;  %v5279_v31 = vpack.c.bf16 %v10647_v29, %v10646_v15  ;;  %v10673_v61 = vld [vmem:[#allocation21_spill] sm:$0xff]  ;;  %v10677_v43 = vld [vmem:[#allocation75_spill] sm:$0xff] }
 0x21f   :  { %1656 = vmatprep.subr.mxu1 %v6682_v9  ;;  %v5245_v9 = vpack.c.bf16 %v6492_v5, %v6452_v54  ;;  %v10614_v5 = vld [vmem:[#allocation84_spill] sm:$0xff]  ;;  %v10628_v54 = vld [vmem:[#allocation93_spill] sm:$0xff]  ;;  %v10631_v60 = vld [vmem:[#allocation102_spill] sm:$0xff] }
 0x220   :  { %v5271_v56 = vpack.c.bf16 %v10629_v55, %v10628_v54  ;;  %v10669_v52 = vld [vmem:[#allocation22_spill] sm:$0xff]  ;;  %v10670_v54 = vld [vmem:[#allocation16_spill] sm:$0xff]  ;;  %v10683_v39 = vld [vmem:[#allocation37_spill] sm:$0xff] }
 0x221   :  { %1586 = vmatpush1.msra.mxu0 %v6667_v25  ;;  %v10615_v25 = vld [vmem:[#allocation88_spill] sm:$0xff]  ;;  %v10678_v49 = vld [vmem:[#allocation30_spill] sm:$0xff]  ;;  %v10685_v21 = vld [vmem:[#allocation39_spill] sm:$0xff] }
 0x222   :  { %1657 = vmatpush1.msra.mxu1 %v6677_v27  ;;  %5242 = vmatprep.subr.bf16.mxu0 %v5241_v0  ;;  %v5249_v26 = vpack.c.bf16 %v10615_v25, %v10614_v5  ;;  %v10617_v27 = vld [vmem:[#allocation90_spill] sm:$0xff]  ;;  %v10649_v0 = vld [vmem:[#allocation35_spill] sm:$0xff]  ;;  %v10671_v55 = vld [vmem:[#allocation24_spill] sm:$0xff] }
 0x223   :  { %5258 = vmatprep.subr.bf16.mxu1 %v5257_v2  ;;  %4899 = vmatmul.mubr.msk.f32.vlgmr.msra.gmra.mrb[2].mxu0 %vm1565_vm6, %v1491_v8  ;;  %v5265_v28 = vpack.c.bf16 %v10617_v27, %v10616_v6  ;;  %v5295_v2 = vpack.c.bf16 %v10649_v0, %v10648_v32  ;;  %v10656_v5 = vld [vmem:[#allocation43_spill] sm:$0xff]  ;;  %v10658_v6 = vld [vmem:[#allocation58_spill] sm:$0xff]  ;;  %v10680_v57 = vld [vmem:[#allocation32_spill] sm:$0xff] }
 0x224   :  { %4900 = vmatmul.mubr.msk.f32.vlgmr.msra.gmra.mrb[2].mxu1 %vm1565_vm6, %v1491_v8  ;;  %5244 = vmatpush1.bf16.msra.mxu0 %v5243_v10  ;;  %v10650_v10 = vld [vmem:[#allocation42_spill] sm:$0xff]  ;;  %v10657_v25 = vld [vmem:[#allocation51_spill] sm:$0xff]  ;;  %v10689_v32 = vld [vmem:[#allocation56_spill] sm:$0xff] }
 0x225   :  { %5260 = vmatpush1.bf16.msra.mxu1 %v5259_v16  ;;  %5246 = vmatprep.subr.bf16.mxu0 %v5245_v9  ;;  %v10651_v16 = vld [vmem:[#allocation50_spill] sm:$0xff] }
 0x226   :  { %5262 = vmatprep.subr.bf16.mxu1 %v5261_v11  ;;  %1775 = vmatprep.mubr.f32.mxu0 %v10611_v35  ;;  %v5281_v9 = vpack.c.bf16 %v10651_v16, %v10650_v10  ;;  %v10652_v11 = vld [vmem:[#allocation44_spill] sm:$0xff]  ;;  %v10659_v27 = vld [vmem:[#allocation66_spill] sm:$0xff]  ;;  %v10691_v10 = vld [vmem:[#allocation53_spill] sm:$0xff] }
 0x227   :  { %1846 = vmatprep.mubr.f32.mxu1 %v10611_v35  ;;  %v10687_v15 = vld [vmem:[#allocation54_spill] sm:$0xff] }
 0x228   :  { %5248 = vmatpush1.bf16.msra.mxu0 %v5247_v18  ;;  %v10653_v18 = vld [vmem:[#allocation52_spill] sm:$0xff] }
 0x229   :  { %5264 = vmatpush1.bf16.msra.mxu1 %v5263_v24  ;;  %5250 = vmatprep.subr.bf16.mxu0 %v5249_v26  ;;  %v5297_v20 = vpack.c.bf16 %v10653_v18, %v10652_v11  ;;  %v5299_v26 = vpack.c.bf16 %v10657_v25, %v10656_v5  ;;  %v10693_v11 = vld [vmem:[#allocation55_spill] sm:$0xff]  ;;  %v10697_v5 = vld [vmem:[#allocation72_spill] sm:$0xff] }
 0x22a   :  { %5266 = vmatprep.subr.bf16.mxu1 %v5265_v28  ;;  %v5285_v28 = vpack.c.bf16 %v10659_v27, %v10658_v6  ;;  %v10699_v6 = vld [vmem:[#allocation69_spill] sm:$0xff] }
 0x22c   :  { %5252 = vmatpush1.bf16.msra.mxu0 %v5251_v13  ;;  %v5301_v13 = vpack.c.bf16 %v10661_v34, %v10660_v30  ;;  %v10701_v30 = vld [vmem:[#allocation71_spill] sm:$0xff] }
 0x22d   :  { %5268 = vmatpush1.bf16.msra.mxu1 %v5267_v40  ;;  %5254 = vmatprep.subr.bf16.mxu0 %v5253_v45  ;;  %v5287_v40 = vpack.c.bf16 %v10663_v38, %v10662_v36  ;;  %v5303_v45 = vpack.c.bf16 %v10665_v44, %v10664_v42  ;;  %v10703_v36 = vld [vmem:[#allocation80_spill] sm:$0xff]  ;;  %v10706_v44 = vld [vmem:[#allocation106_spill] sm:$0xff] }
 0x22e   :  { %5270 = vmatprep.subr.bf16.mxu1 %v5269_v48  ;;  %v10667_v48 = vld [vmem:[#allocation76_spill] sm:$0xff] }
 0x22f   :  { %v10704_v38 = vld [vmem:[#allocation104_spill] sm:$0xff] }
 0x230   :  { %5256 = vmatpush1.bf16.msra.mxu0 %v5255_v53  ;;  %v5305_v53 = vpack.c.bf16 %v10669_v52, %v10668_v50  ;;  %v10710_v52 = vld [vmem:[#allocation105_spill] sm:$0xff] }
 0x231   :  { %5272 = vmatpush1.bf16.msra.mxu1 %v5271_v56  ;;  %1727 = vmatprep.subr.mxu0 %v10630_v58  ;;  %v5321_v56 = vpack.c.bf16 %v10671_v55, %v10670_v54  ;;  %v1415_v58 = vsel %vm1414_vm5, %v8970_v14, %v1412_v46  ;;  %v10712_v55 = vld [vmem:[#allocation77_spill] sm:$0xff] }
 0x232   :  { %1798 = vmatprep.subr.mxu1 %v10631_v60  ;;  %v10672_v60 = vld [vmem:[#allocation13_spill] sm:$0xff] }
 0x233   :  { %v5307_v63 = vpack.c.bf16 %v10673_v61, %v10672_v60  ;;  %v10714_v60 = vld [vmem:[#allocation120_spill] sm:$0xff] }
 0x234   :  { %1728 = vmatpush1.msra.mxu0 %v10640_v51  ;;  %v10715_v61 = vld [vmem:[#allocation128_spill] sm:$0xff] }
 0x235   :  { %1799 = vmatpush1.msra.mxu1 %v10641_v37  ;;  %5274 = vmatprep.subr.bf16.mxu0 %v5273_v62  ;;  %v10674_v62 = vld [vmem:[#allocation15_spill] sm:$0xff]  ;;  %v10682_v37 = vld [vmem:[#allocation29_spill] sm:$0xff] }
 0x236   :  { %5290 = vmatprep.subr.bf16.mxu1 %v5289_v41  ;;  %4901 = vmatmul.mubr.msk.f32.vlgmr.msra.gmra.mrb[4].mxu0 %vm1565_vm6, %v1491_v8  ;;  %v5323_v33 = vpack.c.bf16 %v10675_v1, %v10674_v62  ;;  %v10676_v41 = vld [vmem:[#allocation73_spill] sm:$0xff]  ;;  %v5311_v4 = vpack.c.bf16 %v10683_v39, %v10682_v37  ;;  %v10716_v62 = vld [vmem:[#allocation122_spill] sm:$0xff] }
 0x237   :  { %4902 = vmatmul.mubr.msk.f32.vlgmr.msra.gmra.mrb[4].mxu1 %vm1565_vm6, %v1491_v8  ;;  %5276 = vmatpush1.bf16.msra.mxu0 %v5275_v3  ;;  %v10654_v8 = vld [vmem:[#allocation41_spill] sm:$0xff]  ;;  %v10679_v3 = vld [vmem:[#allocation38_spill] sm:$0xff] }
 0x238   :  { %5292 = vmatpush1.bf16.msra.mxu1 %v5291_v19  ;;  %5278 = vmatprep.subr.bf16.mxu0 %v5277_v7  ;;  %v5283_v24 = vpack.c.bf16 %v10655_v22, %v10654_v8  ;;  %v5309_v17 = vpack.c.bf16 %v10679_v3, %v10678_v49  ;;  %v10681_v19 = vld [vmem:[#allocation40_spill] sm:$0xff]  ;;  %v10684_v7 = vld [vmem:[#allocation31_spill] sm:$0xff]  ;;  %v10695_v8 = vld [vmem:[#allocation70_spill] sm:$0xff] }
 0x239   :  { %5294 = vmatprep.subr.bf16.mxu1 %v5293_v12  ;;  %1920 = vmatprep.mubr.f32.mxu0 %v10611_v35  ;;  %v5325_v51 = vpack.c.bf16 %v10681_v19, %v10680_v57  ;;  %v5327_v23 = vpack.c.bf16 %v10685_v21, %v10684_v7  ;;  %v10686_v12 = vld [vmem:[#allocation46_spill] sm:$0xff]  ;;  %v10720_v3 = vld [vmem:[#allocation121_spill] sm:$0xff]  ;;  %v10722_v19 = vld [vmem:[#allocation136_spill] sm:$0xff] }
 0x23a   :  { %1991 = vmatprep.mubr.f32.mxu1 %v10611_v35  ;;  %v5313_v29 = vpack.c.bf16 %v10687_v15, %v10686_v12  ;;  %v10717_v1 = vld [vmem:[#allocation130_spill] sm:$0xff]  ;;  %v10727_v21 = vld [vmem:[#allocation143_spill] sm:$0xff]  ;;  %v10728_v12 = vld [vmem:[#allocation137_spill] sm:$0xff] }
 0x23b   :  { %5280 = vmatpush1.bf16.msra.mxu0 %v5279_v31  ;;  %v10688_v31 = vld [vmem:[#allocation48_spill] sm:$0xff]  ;;  %v10724_v39 = vld [vmem:[#allocation138_spill] sm:$0xff]  ;;  %v10729_v15 = vld [vmem:[#allocation145_spill] sm:$0xff] }
 0x23c   :  { %5296 = vmatpush1.bf16.msra.mxu1 %v5295_v2  ;;  %5282 = vmatprep.subr.bf16.mxu0 %v5281_v9  ;;  %v5329_v0 = vpack.c.bf16 %v10689_v32, %v10688_v31  ;;  %v10690_v2 = vld [vmem:[#allocation45_spill] sm:$0xff]  ;;  %v10692_v9 = vld [vmem:[#allocation47_spill] sm:$0xff]  ;;  %v10730_v31 = vld [vmem:[#allocation152_spill] sm:$0xff] }
 0x23d   :  { %5298 = vmatprep.subr.bf16.mxu1 %v5297_v20  ;;  %v5315_v16 = vpack.c.bf16 %v10691_v10, %v10690_v2  ;;  %v5331_v18 = vpack.c.bf16 %v10693_v11, %v10692_v9  ;;  %v10694_v20 = vld [vmem:[#allocation62_spill] sm:$0xff]  ;;  %v10731_v32 = vld [vmem:[#allocation160_spill] sm:$0xff]  ;;  %v10734_v9 = vld [vmem:[#allocation151_spill] sm:$0xff] }
 0x23e   :  { %v5317_v22 = vpack.c.bf16 %v10695_v8, %v10694_v20  ;;  %v10732_v2 = vld [vmem:[#allocation154_spill] sm:$0xff]  ;;  %v10735_v11 = vld [vmem:[#allocation159_spill] sm:$0xff]  ;;  %v10736_v20 = vld [vmem:[#allocation153_spill] sm:$0xff] }
 0x23f   :  { %5284 = vmatpush1.bf16.msra.mxu0 %v5283_v24  ;;  %v10696_v24 = vld [vmem:[#allocation64_spill] sm:$0xff]  ;;  %v10733_v10 = vld [vmem:[#allocation162_spill] sm:$0xff]  ;;  %v10737_v8 = vld [vmem:[#allocation161_spill] sm:$0xff] }
 0x240   :  { %5300 = vmatpush1.bf16.msra.mxu1 %v5299_v26  ;;  %5286 = vmatprep.subr.bf16.mxu0 %v5285_v28  ;;  %v5333_v25 = vpack.c.bf16 %v10697_v5, %v10696_v24  ;;  %v10698_v26 = vld [vmem:[#allocation61_spill] sm:$0xff]  ;;  %v10700_v28 = vld [vmem:[#allocation63_spill] sm:$0xff]  ;;  %v2140_v24 = vrot.slane %v8970_v14, 2  ;;  %v2142_v5 = vrot.slane %v8972_v59, 1 }
 0x241   :  { %5302 = vmatprep.subr.bf16.mxu1 %v5301_v13  ;;  %v5319_v27 = vpack.c.bf16 %v10699_v6, %v10698_v26  ;;  %v5335_v34 = vpack.c.bf16 %v10701_v30, %v10700_v28  ;;  %v10702_v13 = vld [vmem:[#allocation78_spill] sm:$0xff]  ;;  %v10740_v6 = vld [vmem:[#allocation108_spill] sm:$0xff] }
 0x242   :  { %v10739_v26 = vld [vmem:[#allocation170_spill] sm:$0xff] }
 0x243   :  { %5288 = vmatpush1.bf16.msra.mxu0 %v5287_v40  ;;  %v10705_v40 = vld [vmem:[#allocation112_spill] sm:$0xff]  ;;  %v10742_v30 = vld [vmem:[#allocation110_spill] sm:$0xff] }
 0x244   :  { %5304 = vmatpush1.bf16.msra.mxu1 %v5303_v45  ;;  %1872 = vmatprep.subr.mxu0 %v10666_v47  ;;  %v5337_v42 = vpack.c.bf16 %v10705_v40, %v10704_v38  ;;  %v10707_v45 = vld [vmem:[#allocation114_spill] sm:$0xff]  ;;  %v10708_v47 = vld [vmem:[#allocation103_spill] sm:$0xff] }
 0x245   :  { %1943 = vmatprep.subr.mxu1 %v10667_v48  ;;  %v5353_v46 = vpack.c.bf16 %v10707_v45, %v10706_v44  ;;  %v10709_v48 = vld [vmem:[#allocation111_spill] sm:$0xff]  ;;  %v10746_v44 = vld [vmem:[#allocation109_spill] sm:$0xff] }
 0x246   :  { %v5339_v50 = vpack.c.bf16 %v10709_v48, %v10708_v47  ;;  %v10744_v38 = vld [vmem:[#allocation107_spill] sm:$0xff]  ;;  %v10747_v45 = vld [vmem:[#allocation117_spill] sm:$0xff] }
 0x247   :  { %1873 = vmatpush1.msra.mxu0 %v10676_v41  ;;  %v10718_v41 = vld [vmem:[#allocation119_spill] sm:$0xff]  ;;  %v10749_v48 = vld [vmem:[#allocation169_spill] sm:$0xff] }
 0x248   :  { %1944 = vmatpush1.msra.mxu1 %v10677_v43  ;;  %5306 = vmatprep.subr.bf16.mxu0 %v5305_v53  ;;  %v10711_v53 = vld [vmem:[#allocation113_spill] sm:$0xff]  ;;  %v10719_v43 = vld [vmem:[#allocation127_spill] sm:$0xff] }
 0x249   :  { %5322 = vmatprep.subr.bf16.mxu1 %v5321_v56  ;;  %4903 = vmatmul.mubr.msk.f32.vlgmr.msra.gmra.mrb[2].mxu0 %vm1565_vm6, %v1415_v58  ;;  %v5355_v54 = vpack.c.bf16 %v10711_v53, %v10710_v52  ;;  %v10713_v56 = vld [vmem:[#allocation79_spill] sm:$0xff]  ;;  %v5343_v49 = vpack.c.bf16 %v10719_v43, %v10718_v41  ;;  %v10751_v52 = vld [vmem:[#allocation132_spill] sm:$0xff] }
 0x24a   :  { %4904 = vmatmul.mubr.msk.f32.vlgmr.msra.gmra.mrb[2].mxu1 %vm1565_vm6, %v1415_v58  ;;  %5308 = vmatpush1.bf16.msra.mxu0 %v5307_v63  ;;  %v5341_v63 = vpack.c.bf16 %v10715_v61, %v10714_v60  ;;  %v10745_v40 = vld [vmem:[#allocation115_spill] sm:$0xff]  ;;  %v10758_v41 = vld [vmem:[#allocation140_spill] sm:$0xff] }
 0x24b   :  { %5324 = vmatpush1.bf16.msra.mxu1 %v5323_v33  ;;  %5310 = vmatprep.subr.bf16.mxu0 %v5309_v17  ;;  %v5357_v33 = vpack.c.bf16 %v10717_v1, %v10716_v62  ;;  %v10721_v17 = vld [vmem:[#allocation129_spill] sm:$0xff]  ;;  %v10748_v47 = vld [vmem:[#allocation167_spill] sm:$0xff]  ;;  %v10759_v43 = vld [vmem:[#allocation148_spill] sm:$0xff] }
 0x24c   :  { %5326 = vmatprep.subr.bf16.mxu1 %v5325_v51  ;;  %2062 = vmatprep.mubr.f32.mxu0 %v10611_v35  ;;  %v5359_v57 = vpack.c.bf16 %v10721_v17, %v10720_v3  ;;  %v10723_v51 = vld [vmem:[#allocation144_spill] sm:$0xff]  ;;  %v10754_v60 = vld [vmem:[#allocation123_spill] sm:$0xff]  ;;  %v10756_v62 = vld [vmem:[#allocation125_spill] sm:$0xff] }
 0x24d   :  { %2133 = vmatprep.mubr.f32.mxu1 %v10611_v35  ;;  %v5345_v37 = vpack.c.bf16 %v10723_v51, %v10722_v19  ;;  %v10755_v61 = vld [vmem:[#allocation131_spill] sm:$0xff]  ;;  %v10757_v1 = vld [vmem:[#allocation133_spill] sm:$0xff]  ;;  %v10760_v3 = vld [vmem:[#allocation142_spill] sm:$0xff] }
 0x24e   :  { %5312 = vmatpush1.bf16.msra.mxu0 %v5311_v4  ;;  %v10725_v4 = vld [vmem:[#allocation146_spill] sm:$0xff]  ;;  %v10762_v19 = vld [vmem:[#allocation139_spill] sm:$0xff] }
 0x24f   :  { %5328 = vmatpush1.bf16.msra.mxu1 %v5327_v23  ;;  %5314 = vmatprep.subr.bf16.mxu0 %v5313_v29  ;;  %v5361_v7 = vpack.c.bf16 %v10725_v4, %v10724_v39  ;;  %v5363_v29 = vpack.c.bf16 %v10729_v15, %v10728_v12  ;;  %v10761_v17 = vld [vmem:[#allocation150_spill] sm:$0xff]  ;;  %v10763_v51 = vld [vmem:[#allocation147_spill] sm:$0xff]  ;;  %v10764_v39 = vld [vmem:[#allocation141_spill] sm:$0xff] }
 0x250   :  { %5330 = vmatprep.subr.bf16.mxu1 %v5329_v0  ;;  %v5349_v0 = vpack.c.bf16 %v10731_v32, %v10730_v31  ;;  %v10765_v4 = vld [vmem:[#allocation149_spill] sm:$0xff]  ;;  %v10768_v12 = vld [vmem:[#allocation158_spill] sm:$0xff]  ;;  %v10770_v31 = vld [vmem:[#allocation155_spill] sm:$0xff] }
 0x251   :  { %v10769_v15 = vld [vmem:[#allocation166_spill] sm:$0xff]  ;;  %v10771_v32 = vld [vmem:[#allocation163_spill] sm:$0xff] }
 0x252   :  { %5316 = vmatpush1.bf16.msra.mxu0 %v5315_v16  ;;  %v5365_v16 = vpack.c.bf16 %v10733_v10, %v10732_v2  ;;  %v10772_v2 = vld [vmem:[#allocation157_spill] sm:$0xff] }
 0x253   :  { %5332 = vmatpush1.bf16.msra.mxu1 %v5331_v18  ;;  %5318 = vmatprep.subr.bf16.mxu0 %v5317_v22  ;;  %v5351_v18 = vpack.c.bf16 %v10735_v11, %v10734_v9  ;;  %v5367_v22 = vpack.c.bf16 %v10737_v8, %v10736_v20  ;;  %v10773_v10 = vld [vmem:[#allocation165_spill] sm:$0xff]  ;;  %v10774_v9 = vld [vmem:[#allocation172_spill] sm:$0xff]  ;;  %v10775_v11 = vld [vmem:[#allocation174_spill] sm:$0xff] }
 0x254   :  { %5334 = vmatprep.subr.bf16.mxu1 %v5333_v25  ;;  %v10738_v25 = vld [vmem:[#allocation168_spill] sm:$0xff] }
 0x255   :  { %v10777_v20 = vld [vmem:[#allocation184_spill] sm:$0xff] }
 0x256   :  { %5320 = vmatpush1.bf16.msra.mxu0 %v5319_v27  ;;  %v10741_v27 = vld [vmem:[#allocation116_spill] sm:$0xff] }
 0x257   :  { %5336 = vmatpush1.bf16.msra.mxu1 %v5335_v34  ;;  %2014 = vmatprep.subr.mxu0 %v10702_v13  ;;  %v5369_v28 = vpack.c.bf16 %v10741_v27, %v10740_v6  ;;  %v10743_v34 = vld [vmem:[#allocation118_spill] sm:$0xff]  ;;  %v10782_v27 = vld [vmem:[#allocation177_spill] sm:$0xff] }
 0x258   :  { %2085 = vmatprep.subr.mxu1 %v10703_v36  ;;  %v5385_v13 = vpack.c.bf16 %v10743_v34, %v10742_v30  ;;  %v2144_v36 = vsel %vm1414_vm5, %v2140_v24, %v2142_v5  ;;  %v10779_v24 = vld [vmem:[#allocation186_spill] sm:$0xff]  ;;  %v10784_v34 = vld [vmem:[#allocation171_spill] sm:$0xff] }
 0x25a   :  { %2015 = vmatpush1.msra.mxu0 %v10712_v55  ;;  %v10753_v55 = vld [vmem:[#allocation134_spill] sm:$0xff] }
 0x25b   :  { %2086 = vmatpush1.msra.mxu1 %v10713_v56  ;;  %5338 = vmatprep.subr.bf16.mxu0 %v5337_v42  ;;  %v5371_v42 = vpack.c.bf16 %v10745_v40, %v10744_v38  ;;  %v10786_v38 = vld [vmem:[#allocation192_spill] sm:$0xff] }
 0x25c   :  { %5354 = vmatprep.subr.bf16.mxu1 %v5353_v46  ;;  %4905 = vmatmul.mubr.msk.f32.vlgmr.msra.gmra.mrb[4].mxu0 %vm1565_vm6, %v1415_v58  ;;  %v5387_v46 = vpack.c.bf16 %v10747_v45, %v10746_v44  ;;  %v10787_v40 = vld [vmem:[#allocation200_spill] sm:$0xff]  ;;  %v10788_v44 = vld [vmem:[#allocation194_spill] sm:$0xff] }
 0x25d   :  { %4906 = vmatmul.mubr.msk.f32.vlgmr.msra.gmra.mrb[4].mxu1 %vm1565_vm6, %v1415_v58  ;;  %5340 = vmatpush1.bf16.msra.mxu0 %v5339_v50  ;;  %v10726_v58 = vld [vmem:[#allocation135_spill] sm:$0xff]  ;;  %v10750_v50 = vld [vmem:[#allocation124_spill] sm:$0xff]  ;;  %v10789_v45 = vld [vmem:[#allocation202_spill] sm:$0xff] }
 0x25e   :  { %5356 = vmatpush1.bf16.msra.mxu1 %v5355_v54  ;;  %5342 = vmatprep.subr.bf16.mxu0 %v5341_v63  ;;  %v5347_v23 = vpack.c.bf16 %v10727_v21, %v10726_v58  ;;  %v5373_v53 = vpack.c.bf16 %v10751_v52, %v10750_v50  ;;  %v10752_v54 = vld [vmem:[#allocation126_spill] sm:$0xff]  ;;  %v5375_v63 = vpack.c.bf16 %v10755_v61, %v10754_v60  ;;  %v10766_v58 = vld [vmem:[#allocation156_spill] sm:$0xff]  ;;  %v10792_v52 = vld [vmem:[#allocation193_spill] sm:$0xff] }
 0x25f   :  { %5358 = vmatprep.subr.bf16.mxu1 %v5357_v33  ;;  %2285 = vmatprep.mubr.f32.mxu0 %v10611_v35  ;;  %v5389_v56 = vpack.c.bf16 %v10753_v55, %v10752_v54  ;;  %v5391_v33 = vpack.c.bf16 %v10757_v1, %v10756_v62  ;;  %v10767_v21 = vld [vmem:[#allocation164_spill] sm:$0xff]  ;;  %v10796_v61 = vld [vmem:[#allocation210_spill] sm:$0xff]  ;;  %v10799_v1 = vld [vmem:[#allocation215_spill] sm:$0xff] }
 0x260   :  { %2356 = vmatprep.mubr.f32.mxu1 %v10611_v35  ;;  %v10794_v55 = vld [vmem:[#allocation208_spill] sm:$0xff] }
 0x261   :  { %5344 = vmatpush1.bf16.msra.mxu0 %v5343_v49  ;;  %v5377_v49 = vpack.c.bf16 %v10759_v43, %v10758_v41  ;;  %v10800_v41 = vld [vmem:[#allocation209_spill] sm:$0xff] }
 0x262   :  { %5360 = vmatpush1.bf16.msra.mxu1 %v5359_v57  ;;  %5346 = vmatprep.subr.bf16.mxu0 %v5345_v37  ;;  %v5393_v57 = vpack.c.bf16 %v10761_v17, %v10760_v3  ;;  %v5379_v37 = vpack.c.bf16 %v10763_v51, %v10762_v19  ;;  %v10801_v43 = vld [vmem:[#allocation217_spill] sm:$0xff]  ;;  %v10802_v3 = vld [vmem:[#allocation224_spill] sm:$0xff]  ;;  %v10804_v19 = vld [vmem:[#allocation226_spill] sm:$0xff] }
 0x263   :  { %5362 = vmatprep.subr.bf16.mxu1 %v5361_v7  ;;  %v5395_v7 = vpack.c.bf16 %v10765_v4, %v10764_v39  ;;  %v10803_v17 = vld [vmem:[#allocation232_spill] sm:$0xff]  ;;  %v10805_v51 = vld [vmem:[#allocation234_spill] sm:$0xff]  ;;  %v10806_v39 = vld [vmem:[#allocation223_spill] sm:$0xff] }
 0x264   :  { %v10807_v4 = vld [vmem:[#allocation231_spill] sm:$0xff] }
 0x265   :  { %5348 = vmatpush1.bf16.msra.mxu0 %v5347_v23  ;;  %v5381_v23 = vpack.c.bf16 %v10767_v21, %v10766_v58  ;;  %v10808_v58 = vld [vmem:[#allocation225_spill] sm:$0xff] }
 0x266   :  { %5364 = vmatpush1.bf16.msra.mxu1 %v5363_v29  ;;  %5350 = vmatprep.subr.bf16.mxu0 %v5349_v0  ;;  %v5397_v29 = vpack.c.bf16 %v10769_v15, %v10768_v12  ;;  %v5383_v0 = vpack.c.bf16 %v10771_v32, %v10770_v31  ;;  %v10809_v21 = vld [vmem:[#allocation233_spill] sm:$0xff]  ;;  %v2513_v12 = vrot.slane %v8970_v14, 3  ;;  %v2515_v15 = vrot.slane %v8972_v59, 2  ;;  %v10811_v31 = vld [vmem:[#allocation242_spill] sm:$0xff]  ;;  %v10812_v32 = vld [vmem:[#allocation180_spill] sm:$0xff] }
 0x267   :  { %5366 = vmatprep.subr.bf16.mxu1 %v5365_v16  ;;  %v5399_v16 = vpack.c.bf16 %v10773_v10, %v10772_v2  ;;  %v10814_v10 = vld [vmem:[#allocation182_spill] sm:$0xff] }
 0x269   :  { %5352 = vmatpush1.bf16.msra.mxu0 %v5351_v18  ;;  %v10776_v18 = vld [vmem:[#allocation176_spill] sm:$0xff] }
 0x26a   :  { %5368 = vmatpush1.bf16.msra.mxu1 %v5367_v22  ;;  %2237 = vmatprep.subr.mxu0 %v10738_v25  ;;  %v5401_v8 = vpack.c.bf16 %v10777_v20, %v10776_v18  ;;  %v10778_v22 = vld [vmem:[#allocation178_spill] sm:$0xff]  ;;  %v10780_v25 = vld [vmem:[#allocation175_spill] sm:$0xff] }
 0x26b   :  { %2308 = vmatprep.subr.mxu1 %v10739_v26  ;;  %v5417_v5 = vpack.c.bf16 %v10779_v24, %v10778_v22  ;;  %v10781_v26 = vld [vmem:[#allocation183_spill] sm:$0xff]  ;;  %v10818_v22 = vld [vmem:[#allocation181_spill] sm:$0xff] }
 0x26c   :  { %v5403_v6 = vpack.c.bf16 %v10781_v26, %v10780_v25  ;;  %v10816_v18 = vld [vmem:[#allocation179_spill] sm:$0xff]  ;;  %v10819_v24 = vld [vmem:[#allocation189_spill] sm:$0xff] }
 0x26d   :  { %2238 = vmatpush1.msra.mxu0 %v10748_v47  ;;  %v10790_v47 = vld [vmem:[#allocation191_spill] sm:$0xff]  ;;  %v10821_v26 = vld [vmem:[#allocation241_spill] sm:$0xff] }
 0x26e   :  { %2309 = vmatpush1.msra.mxu1 %v10749_v48  ;;  %5370 = vmatprep.subr.bf16.mxu0 %v5369_v28  ;;  %v10783_v28 = vld [vmem:[#allocation185_spill] sm:$0xff]  ;;  %v10791_v48 = vld [vmem:[#allocation199_spill] sm:$0xff] }
 0x26f   :  { %5386 = vmatprep.subr.bf16.mxu1 %v5385_v13  ;;  %4907 = vmatmul.mubr.msk.f32.vlgmr.msra.gmra.mrb[2].mxu0 %vm1565_vm6, %v2144_v36  ;;  %v5419_v30 = vpack.c.bf16 %v10783_v28, %v10782_v27  ;;  %v10785_v13 = vld [vmem:[#allocation173_spill] sm:$0xff]  ;;  %v5407_v50 = vpack.c.bf16 %v10791_v48, %v10790_v47  ;;  %v10817_v20 = vld [vmem:[#allocation187_spill] sm:$0xff]  ;;  %v10823_v27 = vld [vmem:[#allocation204_spill] sm:$0xff] }
 0x270   :  { %4908 = vmatmul.mubr.msk.f32.vlgmr.msra.gmra.mrb[2].mxu1 %vm1565_vm6, %v2144_v36  ;;  %5372 = vmatpush1.bf16.msra.mxu0 %v5371_v42  ;;  %v5405_v42 = vpack.c.bf16 %v10787_v40, %v10786_v38  ;;  %v10820_v25 = vld [vmem:[#allocation239_spill] sm:$0xff]  ;;  %v10830_v47 = vld [vmem:[#allocation212_spill] sm:$0xff] }
 0x271   :  { %5388 = vmatpush1.bf16.msra.mxu1 %v5387_v46  ;;  %5374 = vmatprep.subr.bf16.mxu0 %v5373_v53  ;;  %v5421_v46 = vpack.c.bf16 %v10789_v45, %v10788_v44  ;;  %v10793_v53 = vld [vmem:[#allocation201_spill] sm:$0xff]  ;;  %v10826_v38 = vld [vmem:[#allocation195_spill] sm:$0xff]  ;;  %v10831_v48 = vld [vmem:[#allocation220_spill] sm:$0xff] }
 0x272   :  { %5390 = vmatprep.subr.bf16.mxu1 %v5389_v56  ;;  %2427 = vmatprep.mubr.f32.mxu0 %v10611_v35  ;;  %v5423_v54 = vpack.c.bf16 %v10793_v53, %v10792_v52  ;;  %v10795_v56 = vld [vmem:[#allocation216_spill] sm:$0xff]  ;;  %v10827_v40 = vld [vmem:[#allocation203_spill] sm:$0xff]  ;;  %v10828_v44 = vld [vmem:[#allocation197_spill] sm:$0xff] }
 0x273   :  { %2498 = vmatprep.mubr.f32.mxu1 %v10611_v35  ;;  %v5409_v60 = vpack.c.bf16 %v10795_v56, %v10794_v55  ;;  %v10829_v45 = vld [vmem:[#allocation205_spill] sm:$0xff]  ;;  %v10832_v52 = vld [vmem:[#allocation214_spill] sm:$0xff]  ;;  %v10834_v55 = vld [vmem:[#allocation211_spill] sm:$0xff] }
 0x274   :  { %5376 = vmatpush1.bf16.msra.mxu0 %v5375_v63  ;;  %v10797_v63 = vld [vmem:[#allocation218_spill] sm:$0xff]  ;;  %v10835_v56 = vld [vmem:[#allocation219_spill] sm:$0xff] }
 0x275   :  { %5392 = vmatpush1.bf16.msra.mxu1 %v5391_v33  ;;  %5378 = vmatprep.subr.bf16.mxu0 %v5377_v49  ;;  %v5425_v62 = vpack.c.bf16 %v10797_v63, %v10796_v61  ;;  %v5427_v49 = vpack.c.bf16 %v10801_v43, %v10800_v41  ;;  %v10833_v53 = vld [vmem:[#allocation222_spill] sm:$0xff]  ;;  %v10836_v61 = vld [vmem:[#allocation213_spill] sm:$0xff] }
 0x276   :  { %5394 = vmatprep.subr.bf16.mxu1 %v5393_v57  ;;  %v5413_v57 = vpack.c.bf16 %v10803_v17, %v10802_v3  ;;  %v10837_v63 = vld [vmem:[#allocation221_spill] sm:$0xff]  ;;  %v10840_v41 = vld [vmem:[#allocation230_spill] sm:$0xff]  ;;  %v10842_v3 = vld [vmem:[#allocation227_spill] sm:$0xff] }
 0x277   :  { %v10841_v43 = vld [vmem:[#allocation238_spill] sm:$0xff]  ;;  %v10843_v17 = vld [vmem:[#allocation235_spill] sm:$0xff] }
 0x278   :  { %5380 = vmatpush1.bf16.msra.mxu0 %v5379_v37  ;;  %v5429_v37 = vpack.c.bf16 %v10805_v51, %v10804_v19  ;;  %v10844_v19 = vld [vmem:[#allocation229_spill] sm:$0xff] }
 0x279   :  { %5396 = vmatpush1.bf16.msra.mxu1 %v5395_v7  ;;  %5382 = vmatprep.subr.bf16.mxu0 %v5381_v23  ;;  %v5415_v7 = vpack.c.bf16 %v10807_v4, %v10806_v39  ;;  %v5431_v23 = vpack.c.bf16 %v10809_v21, %v10808_v58  ;;  %v10845_v51 = vld [vmem:[#allocation237_spill] sm:$0xff]  ;;  %v10846_v39 = vld [vmem:[#allocation244_spill] sm:$0xff]  ;;  %v10847_v4 = vld [vmem:[#allocation246_spill] sm:$0xff] }
 0x27a   :  { %5398 = vmatprep.subr.bf16.mxu1 %v5397_v29  ;;  %v10810_v29 = vld [vmem:[#allocation240_spill] sm:$0xff] }
 0x27b   :  { %v10849_v58 = vld [vmem:[#allocation256_spill] sm:$0xff] }
 0x27c   :  { %5384 = vmatpush1.bf16.msra.mxu0 %v5383_v0  ;;  %v10813_v0 = vld [vmem:[#allocation188_spill] sm:$0xff] }
 0x27d   :  { %5400 = vmatpush1.bf16.msra.mxu1 %v5399_v16  ;;  %2379 = vmatprep.subr.mxu0 %v10774_v9  ;;  %v5433_v2 = vpack.c.bf16 %v10813_v0, %v10812_v32  ;;  %v10815_v16 = vld [vmem:[#allocation190_spill] sm:$0xff]  ;;  %v10854_v0 = vld [vmem:[#allocation249_spill] sm:$0xff] }
 0x27e   :  { %2450 = vmatprep.subr.mxu1 %v10775_v11  ;;  %v5449_v9 = vpack.c.bf16 %v10815_v16, %v10814_v10  ;;  %v2517_v11 = vsel %vm1414_vm5, %v2513_v12, %v2515_v15  ;;  %v10851_v12 = vld [vmem:[#allocation258_spill] sm:$0xff]  ;;  %v10856_v16 = vld [vmem:[#allocation243_spill] sm:$0xff] }
 0x280   :  { %2380 = vmatpush1.msra.mxu0 %v10784_v34  ;;  %v10825_v34 = vld [vmem:[#allocation206_spill] sm:$0xff] }
 0x281   :  { %2451 = vmatpush1.msra.mxu1 %v10785_v13  ;;  %5402 = vmatprep.subr.bf16.mxu0 %v5401_v8  ;;  %v5435_v8 = vpack.c.bf16 %v10817_v20, %v10816_v18  ;;  %v10858_v18 = vld [vmem:[#allocation264_spill] sm:$0xff] }
 0x282   :  { %5418 = vmatprep.subr.bf16.mxu1 %v5417_v5  ;;  %4909 = vmatmul.mubr.msk.f32.vlgmr.msra.gmra.mrb[4].mxu0 %vm1565_vm6, %v2144_v36  ;;  %v5451_v5 = vpack.c.bf16 %v10819_v24, %v10818_v22  ;;  %v10859_v20 = vld [vmem:[#allocation272_spill] sm:$0xff]  ;;  %v10860_v22 = vld [vmem:[#allocation266_spill] sm:$0xff] }
 0x283   :  { %4910 = vmatmul.mubr.msk.f32.vlgmr.msra.gmra.mrb[4].mxu1 %vm1565_vm6, %v2144_v36  ;;  %5404 = vmatpush1.bf16.msra.mxu0 %v5403_v6  ;;  %v10798_v36 = vld [vmem:[#allocation207_spill] sm:$0xff]  ;;  %v10822_v6 = vld [vmem:[#allocation196_spill] sm:$0xff]  ;;  %v10861_v24 = vld [vmem:[#allocation274_spill] sm:$0xff] }
 0x284   :  { %5420 = vmatpush1.bf16.msra.mxu1 %v5419_v30  ;;  %5406 = vmatprep.subr.bf16.mxu0 %v5405_v42  ;;  %v5411_v33 = vpack.c.bf16 %v10799_v1, %v10798_v36  ;;  %v5437_v28 = vpack.c.bf16 %v10823_v27, %v10822_v6  ;;  %v10824_v30 = vld [vmem:[#allocation198_spill] sm:$0xff]  ;;  %v5439_v42 = vpack.c.bf16 %v10827_v40, %v10826_v38  ;;  %v10838_v36 = vld [vmem:[#allocation228_spill] sm:$0xff]  ;;  %v10864_v27 = vld [vmem:[#allocation265_spill] sm:$0xff] }
 0x285   :  { %5422 = vmatprep.subr.bf16.mxu1 %v5421_v46  ;;  %2658 = vmatprep.mubr.f32.mxu0 %v10611_v35  ;;  %v5453_v13 = vpack.c.bf16 %v10825_v34, %v10824_v30  ;;  %v5455_v46 = vpack.c.bf16 %v10829_v45, %v10828_v44  ;;  %v10839_v1 = vld [vmem:[#allocation236_spill] sm:$0xff]  ;;  %v10868_v40 = vld [vmem:[#allocation282_spill] sm:$0xff]  ;;  %v10871_v45 = vld [vmem:[#allocation287_spill] sm:$0xff] }
 0x286   :  { %2729 = vmatprep.mubr.f32.mxu1 %v10611_v35  ;;  %v10866_v34 = vld [vmem:[#allocation280_spill] sm:$0xff] }
 0x287   :  { %5408 = vmatpush1.bf16.msra.mxu0 %v5407_v50  ;;  %v5441_v50 = vpack.c.bf16 %v10831_v48, %v10830_v47  ;;  %v10872_v47 = vld [vmem:[#allocation281_spill] sm:$0xff] }
 0x288   :  { %5424 = vmatpush1.bf16.msra.mxu1 %v5423_v54  ;;  %5410 = vmatprep.subr.bf16.mxu0 %v5409_v60  ;;  %v5457_v54 = vpack.c.bf16 %v10833_v53, %v10832_v52  ;;  %v5443_v60 = vpack.c.bf16 %v10835_v56, %v10834_v55  ;;  %v10873_v48 = vld [vmem:[#allocation289_spill] sm:$0xff]  ;;  %v10874_v52 = vld [vmem:[#allocation296_spill] sm:$0xff]  ;;  %v10876_v55 = vld [vmem:[#allocation298_spill] sm:$0xff] }
 0x289   :  { %5426 = vmatprep.subr.bf16.mxu1 %v5425_v62  ;;  %v5459_v62 = vpack.c.bf16 %v10837_v63, %v10836_v61  ;;  %v10875_v53 = vld [vmem:[#allocation304_spill] sm:$0xff]  ;;  %v10877_v56 = vld [vmem:[#allocation306_spill] sm:$0xff]  ;;  %v10878_v61 = vld [vmem:[#allocation295_spill] sm:$0xff] }
 0x28a   :  { %v10879_v63 = vld [vmem:[#allocation303_spill] sm:$0xff] }
 0x28b   :  { %5412 = vmatpush1.bf16.msra.mxu0 %v5411_v33  ;;  %v5445_v33 = vpack.c.bf16 %v10839_v1, %v10838_v36  ;;  %v10880_v36 = vld [vmem:[#allocation297_spill] sm:$0xff] }
 0x28c   :  { %5428 = vmatpush1.bf16.msra.mxu1 %v5427_v49  ;;  %5414 = vmatprep.subr.bf16.mxu0 %v5413_v57  ;;  %v5461_v49 = vpack.c.bf16 %v10841_v43, %v10840_v41  ;;  %v5447_v57 = vpack.c.bf16 %v10843_v17, %v10842_v3  ;;  %v10881_v1 = vld [vmem:[#allocation305_spill] sm:$0xff]  ;;  %v2886_v41 = vrot.slane %v8970_v14, 4  ;;  %v2888_v43 = vrot.slane %v8972_v59, 3  ;;  %v10883_v3 = vld [vmem:[#allocation314_spill] sm:$0xff]  ;;  %v10884_v17 = vld [vmem:[#allocation252_spill] sm:$0xff] }
 0x28d   :  { %5430 = vmatprep.subr.bf16.mxu1 %v5429_v37  ;;  %v5463_v37 = vpack.c.bf16 %v10845_v51, %v10844_v19  ;;  %v10886_v51 = vld [vmem:[#allocation254_spill] sm:$0xff] }
 0x28f   :  { %5416 = vmatpush1.bf16.msra.mxu0 %v5415_v7  ;;  %v10848_v7 = vld [vmem:[#allocation248_spill] sm:$0xff] }
 0x290   :  { %5432 = vmatpush1.bf16.msra.mxu1 %v5431_v23  ;;  %2610 = vmatprep.subr.mxu0 %v10810_v29  ;;  %v5465_v21 = vpack.c.bf16 %v10849_v58, %v10848_v7  ;;  %v10850_v23 = vld [vmem:[#allocation250_spill] sm:$0xff]  ;;  %v10852_v29 = vld [vmem:[#allocation247_spill] sm:$0xff] }
 0x291   :  { %2681 = vmatprep.subr.mxu1 %v10811_v31  ;;  %v5481_v15 = vpack.c.bf16 %v10851_v12, %v10850_v23  ;;  %v10853_v31 = vld [vmem:[#allocation255_spill] sm:$0xff]  ;;  %v10890_v23 = vld [vmem:[#allocation253_spill] sm:$0xff] }
 0x292   :  { %v5467_v32 = vpack.c.bf16 %v10853_v31, %v10852_v29  ;;  %v10888_v7 = vld [vmem:[#allocation251_spill] sm:$0xff]  ;;  %v10891_v12 = vld [vmem:[#allocation261_spill] sm:$0xff] }
 0x293   :  { %2611 = vmatpush1.msra.mxu0 %v10820_v25  ;;  %v10862_v25 = vld [vmem:[#allocation263_spill] sm:$0xff]  ;;  %v10893_v31 = vld [vmem:[#allocation313_spill] sm:$0xff] }
 0x294   :  { %2682 = vmatpush1.msra.mxu1 %v10821_v26  ;;  %5434 = vmatprep.subr.bf16.mxu0 %v5433_v2  ;;  %v10855_v2 = vld [vmem:[#allocation257_spill] sm:$0xff]  ;;  %v10863_v26 = vld [vmem:[#allocation271_spill] sm:$0xff] }
 0x295   :  { %5450 = vmatprep.subr.bf16.mxu1 %v5449_v9  ;;  %4911 = vmatmul.mubr.msk.f32.vlgmr.msra.gmra.mrb[2].mxu0 %vm1565_vm6, %v2517_v11  ;;  %v5483_v10 = vpack.c.bf16 %v10855_v2, %v10854_v0  ;;  %v10857_v9 = vld [vmem:[#allocation245_spill] sm:$0xff]  ;;  %v5471_v6 = vpack.c.bf16 %v10863_v26, %v10862_v25  ;;  %v10889_v58 = vld [vmem:[#allocation259_spill] sm:$0xff]  ;;  %v10895_v0 = vld [vmem:[#allocation276_spill] sm:$0xff] }
 0x296   :  { %4912 = vmatmul.mubr.msk.f32.vlgmr.msra.gmra.mrb[2].mxu1 %vm1565_vm6, %v2517_v11  ;;  %5436 = vmatpush1.bf16.msra.mxu0 %v5435_v8  ;;  %v5469_v8 = vpack.c.bf16 %v10859_v20, %v10858_v18  ;;  %v10892_v29 = vld [vmem:[#allocation311_spill] sm:$0xff]  ;;  %v10902_v25 = vld [vmem:[#allocation284_spill] sm:$0xff] }
 0x297   :  { %5452 = vmatpush1.bf16.msra.mxu1 %v5451_v5  ;;  %5438 = vmatprep.subr.bf16.mxu0 %v5437_v28  ;;  %v5485_v5 = vpack.c.bf16 %v10861_v24, %v10860_v22  ;;  %v10865_v28 = vld [vmem:[#allocation273_spill] sm:$0xff]  ;;  %v10898_v18 = vld [vmem:[#allocation267_spill] sm:$0xff]  ;;  %v10903_v26 = vld [vmem:[#allocation292_spill] sm:$0xff] }
 0x298   :  { %5454 = vmatprep.subr.bf16.mxu1 %v5453_v13  ;;  %2800 = vmatprep.mubr.f32.mxu0 %v10611_v35  ;;  %v5487_v30 = vpack.c.bf16 %v10865_v28, %v10864_v27  ;;  %v10867_v13 = vld [vmem:[#allocation288_spill] sm:$0xff]  ;;  %v10899_v20 = vld [vmem:[#allocation275_spill] sm:$0xff]  ;;  %v10900_v22 = vld [vmem:[#allocation269_spill] sm:$0xff] }
 0x299   :  { %2871 = vmatprep.mubr.f32.mxu1 %v10611_v35  ;;  %v5473_v38 = vpack.c.bf16 %v10867_v13, %v10866_v34  ;;  %v10901_v24 = vld [vmem:[#allocation277_spill] sm:$0xff]  ;;  %v10904_v27 = vld [vmem:[#allocation286_spill] sm:$0xff]  ;;  %v10906_v34 = vld [vmem:[#allocation283_spill] sm:$0xff] }
 0x29a   :  { %5440 = vmatpush1.bf16.msra.mxu0 %v5439_v42  ;;  %v10869_v42 = vld [vmem:[#allocation290_spill] sm:$0xff]  ;;  %v10907_v13 = vld [vmem:[#allocation291_spill] sm:$0xff] }
 0x29b   :  { %5456 = vmatpush1.bf16.msra.mxu1 %v5455_v46  ;;  %5442 = vmatprep.subr.bf16.mxu0 %v5441_v50  ;;  %v5489_v44 = vpack.c.bf16 %v10869_v42, %v10868_v40  ;;  %v5491_v50 = vpack.c.bf16 %v10873_v48, %v10872_v47  ;;  %v10905_v28 = vld [vmem:[#allocation294_spill] sm:$0xff]  ;;  %v10908_v40 = vld [vmem:[#allocation285_spill] sm:$0xff] }
 0x29c   :  { %5458 = vmatprep.subr.bf16.mxu1 %v5457_v54  ;;  %v5477_v54 = vpack.c.bf16 %v10875_v53, %v10874_v52  ;;  %v10909_v42 = vld [vmem:[#allocation293_spill] sm:$0xff]  ;;  %v10912_v47 = vld [vmem:[#allocation302_spill] sm:$0xff]  ;;  %v10914_v52 = vld [vmem:[#allocation299_spill] sm:$0xff] }
 0x29d   :  { %v10913_v48 = vld [vmem:[#allocation310_spill] sm:$0xff]  ;;  %v10915_v53 = vld [vmem:[#allocation307_spill] sm:$0xff] }
 0x29e   :  { %5444 = vmatpush1.bf16.msra.mxu0 %v5443_v60  ;;  %v5493_v60 = vpack.c.bf16 %v10877_v56, %v10876_v55  ;;  %v10916_v55 = vld [vmem:[#allocation301_spill] sm:$0xff] }
 0x29f   :  { %5460 = vmatpush1.bf16.msra.mxu1 %v5459_v62  ;;  %5446 = vmatprep.subr.bf16.mxu0 %v5445_v33  ;;  %v5479_v62 = vpack.c.bf16 %v10879_v63, %v10878_v61  ;;  %v5495_v33 = vpack.c.bf16 %v10881_v1, %v10880_v36  ;;  %v10917_v56 = vld [vmem:[#allocation309_spill] sm:$0xff]  ;;  %v10918_v61 = vld [vmem:[#allocation316_spill] sm:$0xff]  ;;  %v10919_v63 = vld [vmem:[#allocation318_spill] sm:$0xff] }
 0x2a0   :  { %5462 = vmatprep.subr.bf16.mxu1 %v5461_v49  ;;  %v10882_v49 = vld [vmem:[#allocation312_spill] sm:$0xff] }
 0x2a1   :  { %v10921_v36 = vld [vmem:[#allocation328_spill] sm:$0xff] }
 0x2a2   :  { %5448 = vmatpush1.bf16.msra.mxu0 %v5447_v57  ;;  %v10885_v57 = vld [vmem:[#allocation260_spill] sm:$0xff] }
 0x2a3   :  { %5464 = vmatpush1.bf16.msra.mxu1 %v5463_v37  ;;  %2752 = vmatprep.subr.mxu0 %v10846_v39  ;;  %v5497_v19 = vpack.c.bf16 %v10885_v57, %v10884_v17  ;;  %v10887_v37 = vld [vmem:[#allocation262_spill] sm:$0xff]  ;;  %v10926_v57 = vld [vmem:[#allocation321_spill] sm:$0xff] }
 0x2a4   :  { %2823 = vmatprep.subr.mxu1 %v10847_v4  ;;  %v5513_v39 = vpack.c.bf16 %v10887_v37, %v10886_v51  ;;  %v2890_v4 = vsel %vm1414_vm5, %v2886_v41, %v2888_v43  ;;  %v10923_v41 = vld [vmem:[#allocation330_spill] sm:$0xff]  ;;  %v10928_v37 = vld [vmem:[#allocation315_spill] sm:$0xff] }
 0x2a6   :  { %2753 = vmatpush1.msra.mxu0 %v10856_v16  ;;  %v10897_v16 = vld [vmem:[#allocation278_spill] sm:$0xff] }
 0x2a7   :  { %2824 = vmatpush1.msra.mxu1 %v10857_v9  ;;  %5466 = vmatprep.subr.bf16.mxu0 %v5465_v21  ;;  %v5499_v21 = vpack.c.bf16 %v10889_v58, %v10888_v7  ;;  %v10930_v7 = vld [vmem:[#allocation336_spill] sm:$0xff] }
 0x2a8   :  { %5482 = vmatprep.subr.bf16.mxu1 %v5481_v15  ;;  %4913 = vmatmul.mubr.msk.f32.vlgmr.msra.gmra.mrb[4].mxu0 %vm1565_vm6, %v2517_v11  ;;  %v5515_v15 = vpack.c.bf16 %v10891_v12, %v10890_v23  ;;  %v10931_v58 = vld [vmem:[#allocation344_spill] sm:$0xff]  ;;  %v10932_v23 = vld [vmem:[#allocation338_spill] sm:$0xff] }
 0x2a9   :  { %4914 = vmatmul.mubr.msk.f32.vlgmr.msra.gmra.mrb[4].mxu1 %vm1565_vm6, %v2517_v11  ;;  %5468 = vmatpush1.bf16.msra.mxu0 %v5467_v32  ;;  %v10870_v11 = vld [vmem:[#allocation279_spill] sm:$0xff]  ;;  %v10894_v32 = vld [vmem:[#allocation268_spill] sm:$0xff]  ;;  %v10933_v12 = vld [vmem:[#allocation346_spill] sm:$0xff] }
 0x2aa   :  { %5484 = vmatpush1.bf16.msra.mxu1 %v5483_v10  ;;  %5470 = vmatprep.subr.bf16.mxu0 %v5469_v8  ;;  %v5475_v46 = vpack.c.bf16 %v10871_v45, %v10870_v11  ;;  %v5501_v2 = vpack.c.bf16 %v10895_v0, %v10894_v32  ;;  %v10896_v10 = vld [vmem:[#allocation270_spill] sm:$0xff]  ;;  %v5503_v8 = vpack.c.bf16 %v10899_v20, %v10898_v18  ;;  %v10910_v11 = vld [vmem:[#allocation300_spill] sm:$0xff]  ;;  %v10936_v0 = vld [vmem:[#allocation337_spill] sm:$0xff] }
 0x2ab   :  { %5486 = vmatprep.subr.bf16.mxu1 %v5485_v5  ;;  %3031 = vmatprep.mubr.f32.mxu0 %v10611_v35  ;;  %v5517_v9 = vpack.c.bf16 %v10897_v16, %v10896_v10  ;;  %v5519_v5 = vpack.c.bf16 %v10901_v24, %v10900_v22  ;;  %v10911_v45 = vld [vmem:[#allocation308_spill] sm:$0xff]  ;;  %v10940_v20 = vld [vmem:[#allocation354_spill] sm:$0xff]  ;;  %v10943_v24 = vld [vmem:[#allocation359_spill] sm:$0xff] }
 0x2ac   :  { %3102 = vmatprep.mubr.f32.mxu1 %v10611_v35  ;;  %v10938_v16 = vld [vmem:[#allocation352_spill] sm:$0xff] }
 0x2ad   :  { %5472 = vmatpush1.bf16.msra.mxu0 %v5471_v6  ;;  %v5505_v6 = vpack.c.bf16 %v10903_v26, %v10902_v25  ;;  %v10944_v25 = vld [vmem:[#allocation353_spill] sm:$0xff] }
 0x2ae   :  { %5488 = vmatpush1.bf16.msra.mxu1 %v5487_v30  ;;  %5474 = vmatprep.subr.bf16.mxu0 %v5473_v38  ;;  %v5521_v30 = vpack.c.bf16 %v10905_v28, %v10904_v27  ;;  %v5507_v38 = vpack.c.bf16 %v10907_v13, %v10906_v34  ;;  %v10945_v26 = vld [vmem:[#allocation361_spill] sm:$0xff]  ;;  %v10946_v27 = vld [vmem:[#allocation368_spill] sm:$0xff]  ;;  %v10948_v34 = vld [vmem:[#allocation370_spill] sm:$0xff] }
 0x2af   :  { %5490 = vmatprep.subr.bf16.mxu1 %v5489_v44  ;;  %v5523_v44 = vpack.c.bf16 %v10909_v42, %v10908_v40  ;;  %v10947_v28 = vld [vmem:[#allocation376_spill] sm:$0xff]  ;;  %v10949_v13 = vld [vmem:[#allocation378_spill] sm:$0xff]  ;;  %v10950_v40 = vld [vmem:[#allocation367_spill] sm:$0xff] }
 0x2b0   :  { %v10951_v42 = vld [vmem:[#allocation375_spill] sm:$0xff] }
 0x2b1   :  { %5476 = vmatpush1.bf16.msra.mxu0 %v5475_v46  ;;  %v5509_v46 = vpack.c.bf16 %v10911_v45, %v10910_v11  ;;  %v10952_v11 = vld [vmem:[#allocation369_spill] sm:$0xff] }
 0x2b2   :  { %5492 = vmatpush1.bf16.msra.mxu1 %v5491_v50  ;;  %5478 = vmatprep.subr.bf16.mxu0 %v5477_v54  ;;  %v5525_v50 = vpack.c.bf16 %v10913_v48, %v10912_v47  ;;  %v5511_v54 = vpack.c.bf16 %v10915_v53, %v10914_v52  ;;  %v10953_v45 = vld [vmem:[#allocation377_spill] sm:$0xff]  ;;  %v3259_v47 = vrot.slane %v8970_v14, 5  ;;  %v3261_v48 = vrot.slane %v8972_v59, 4  ;;  %v10955_v52 = vld [vmem:[#allocation386_spill] sm:$0xff]  ;;  %v10956_v53 = vld [vmem:[#allocation324_spill] sm:$0xff] }
 0x2b3   :  { %5494 = vmatprep.subr.bf16.mxu1 %v5493_v60  ;;  %v5527_v60 = vpack.c.bf16 %v10917_v56, %v10916_v55  ;;  %v10958_v56 = vld [vmem:[#allocation326_spill] sm:$0xff] }
 0x2b5   :  { %5480 = vmatpush1.bf16.msra.mxu0 %v5479_v62  ;;  %v10920_v62 = vld [vmem:[#allocation320_spill] sm:$0xff] }
 0x2b6   :  { %5496 = vmatpush1.bf16.msra.mxu1 %v5495_v33  ;;  %2983 = vmatprep.subr.mxu0 %v10882_v49  ;;  %v5529_v1 = vpack.c.bf16 %v10921_v36, %v10920_v62  ;;  %v10922_v33 = vld [vmem:[#allocation322_spill] sm:$0xff]  ;;  %v10924_v49 = vld [vmem:[#allocation319_spill] sm:$0xff] }
 0x2b7   :  { %3054 = vmatprep.subr.mxu1 %v10883_v3  ;;  %v5545_v43 = vpack.c.bf16 %v10923_v41, %v10922_v33  ;;  %v10925_v3 = vld [vmem:[#allocation327_spill] sm:$0xff]  ;;  %v10962_v33 = vld [vmem:[#allocation325_spill] sm:$0xff] }
 0x2b8   :  { %v5531_v17 = vpack.c.bf16 %v10925_v3, %v10924_v49  ;;  %v10960_v62 = vld [vmem:[#allocation323_spill] sm:$0xff]  ;;  %v10963_v41 = vld [vmem:[#allocation333_spill] sm:$0xff] }
 0x2b9   :  { %2984 = vmatpush1.msra.mxu0 %v10892_v29  ;;  %v10934_v29 = vld [vmem:[#allocation335_spill] sm:$0xff]  ;;  %v10965_v3 = vld [vmem:[#allocation385_spill] sm:$0xff] }
 0x2ba   :  { %3055 = vmatpush1.msra.mxu1 %v10893_v31  ;;  %5498 = vmatprep.subr.bf16.mxu0 %v5497_v19  ;;  %v10927_v19 = vld [vmem:[#allocation329_spill] sm:$0xff]  ;;  %v10935_v31 = vld [vmem:[#allocation343_spill] sm:$0xff] }
 0x2bb   :  { %5514 = vmatprep.subr.bf16.mxu1 %v5513_v39  ;;  %4915 = vmatmul.mubr.msk.f32.vlgmr.msra.gmra.mrb[2].mxu0 %vm1565_vm6, %v2890_v4  ;;  %v5547_v51 = vpack.c.bf16 %v10927_v19, %v10926_v57  ;;  %v10929_v39 = vld [vmem:[#allocation317_spill] sm:$0xff]  ;;  %v5535_v32 = vpack.c.bf16 %v10935_v31, %v10934_v29  ;;  %v10961_v36 = vld [vmem:[#allocation331_spill] sm:$0xff]  ;;  %v10967_v57 = vld [vmem:[#allocation348_spill] sm:$0xff] }
 0x2bc   :  { %4916 = vmatmul.mubr.msk.f32.vlgmr.msra.gmra.mrb[2].mxu1 %vm1565_vm6, %v2890_v4  ;;  %5500 = vmatpush1.bf16.msra.mxu0 %v5499_v21  ;;  %v5533_v21 = vpack.c.bf16 %v10931_v58, %v10930_v7  ;;  %v10964_v49 = vld [vmem:[#allocation383_spill] sm:$0xff]  ;;  %v10974_v29 = vld [vmem:[#allocation356_spill] sm:$0xff] }
 0x2bd   :  { %5516 = vmatpush1.bf16.msra.mxu1 %v5515_v15  ;;  %5502 = vmatprep.subr.bf16.mxu0 %v5501_v2  ;;  %v5549_v15 = vpack.c.bf16 %v10933_v12, %v10932_v23  ;;  %v10937_v2 = vld [vmem:[#allocation345_spill] sm:$0xff]  ;;  %v10970_v7 = vld [vmem:[#allocation339_spill] sm:$0xff]  ;;  %v10975_v31 = vld [vmem:[#allocation364_spill] sm:$0xff] }
 0x2be   :  { %5518 = vmatprep.subr.bf16.mxu1 %v5517_v9  ;;  %3173 = vmatprep.mubr.f32.mxu0 %v10611_v35  ;;  %v5551_v10 = vpack.c.bf16 %v10937_v2, %v10936_v0  ;;  %v10939_v9 = vld [vmem:[#allocation360_spill] sm:$0xff]  ;;  %v10971_v58 = vld [vmem:[#allocation347_spill] sm:$0xff]  ;;  %v10972_v23 = vld [vmem:[#allocation341_spill] sm:$0xff] }
 0x2bf   :  { %3244 = vmatprep.mubr.f32.mxu1 %v10611_v35  ;;  %v5537_v18 = vpack.c.bf16 %v10939_v9, %v10938_v16  ;;  %v10973_v12 = vld [vmem:[#allocation349_spill] sm:$0xff]  ;;  %v10976_v0 = vld [vmem:[#allocation358_spill] sm:$0xff]  ;;  %v10978_v16 = vld [vmem:[#allocation355_spill] sm:$0xff] }
 0x2c0   :  { %5504 = vmatpush1.bf16.msra.mxu0 %v5503_v8  ;;  %v10941_v8 = vld [vmem:[#allocation362_spill] sm:$0xff]  ;;  %v10979_v9 = vld [vmem:[#allocation363_spill] sm:$0xff] }
 0x2c1   :  { %5520 = vmatpush1.bf16.msra.mxu1 %v5519_v5  ;;  %5506 = vmatprep.subr.bf16.mxu0 %v5505_v6  ;;  %v5553_v22 = vpack.c.bf16 %v10941_v8, %v10940_v20  ;;  %v5555_v6 = vpack.c.bf16 %v10945_v26, %v10944_v25  ;;  %v10977_v2 = vld [vmem:[#allocation366_spill] sm:$0xff]  ;;  %v10980_v20 = vld [vmem:[#allocation357_spill] sm:$0xff] }
 0x2c2   :  { %5522 = vmatprep.subr.bf16.mxu1 %v5521_v30  ;;  %v5541_v30 = vpack.c.bf16 %v10947_v28, %v10946_v27  ;;  %v10981_v8 = vld [vmem:[#allocation365_spill] sm:$0xff]  ;;  %v10984_v25 = vld [vmem:[#allocation374_spill] sm:$0xff]  ;;  %v10986_v27 = vld [vmem:[#allocation371_spill] sm:$0xff] }
 0x2c3   :  { %v10985_v26 = vld [vmem:[#allocation382_spill] sm:$0xff]  ;;  %v10987_v28 = vld [vmem:[#allocation379_spill] sm:$0xff] }
 0x2c4   :  { %5508 = vmatpush1.bf16.msra.mxu0 %v5507_v38  ;;  %v5557_v38 = vpack.c.bf16 %v10949_v13, %v10948_v34  ;;  %v10988_v34 = vld [vmem:[#allocation373_spill] sm:$0xff] }
 0x2c5   :  { %5524 = vmatpush1.bf16.msra.mxu1 %v5523_v44  ;;  %5510 = vmatprep.subr.bf16.mxu0 %v5509_v46  ;;  %v5543_v44 = vpack.c.bf16 %v10951_v42, %v10950_v40  ;;  %v5559_v46 = vpack.c.bf16 %v10953_v45, %v10952_v11  ;;  %v10989_v13 = vld [vmem:[#allocation381_spill] sm:$0xff]  ;;  %v10990_v40 = vld [vmem:[#allocation388_spill] sm:$0xff]  ;;  %v10991_v42 = vld [vmem:[#allocation390_spill] sm:$0xff] }
 0x2c6   :  { %5526 = vmatprep.subr.bf16.mxu1 %v5525_v50  ;;  %v10954_v50 = vld [vmem:[#allocation384_spill] sm:$0xff] }
 0x2c7   :  { %v10993_v11 = vld [vmem:[#allocation400_spill] sm:$0xff] }
 0x2c8   :  { %5512 = vmatpush1.bf16.msra.mxu0 %v5511_v54  ;;  %v10957_v54 = vld [vmem:[#allocation332_spill] sm:$0xff] }
 0x2c9   :  { %5528 = vmatpush1.bf16.msra.mxu1 %v5527_v60  ;;  %3125 = vmatprep.subr.mxu0 %v10918_v61  ;;  %v5561_v55 = vpack.c.bf16 %v10957_v54, %v10956_v53  ;;  %v10959_v60 = vld [vmem:[#allocation334_spill] sm:$0xff]  ;;  %v10998_v54 = vld [vmem:[#allocation393_spill] sm:$0xff] }
 0x2ca   :  { %3196 = vmatprep.subr.mxu1 %v10919_v63  ;;  %v5577_v61 = vpack.c.bf16 %v10959_v60, %v10958_v56  ;;  %v3263_v63 = vsel %vm1414_vm5, %v3259_v47, %v3261_v48  ;;  %v10995_v47 = vld [vmem:[#allocation402_spill] sm:$0xff]  ;;  %v11000_v60 = vld [vmem:[#allocation387_spill] sm:$0xff] }
 0x2cc   :  { %3126 = vmatpush1.msra.mxu0 %v10928_v37  ;;  %v10969_v37 = vld [vmem:[#allocation350_spill] sm:$0xff] }
 0x2cd   :  { %3197 = vmatpush1.msra.mxu1 %v10929_v39  ;;  %5530 = vmatprep.subr.bf16.mxu0 %v5529_v1  ;;  %v5563_v1 = vpack.c.bf16 %v10961_v36, %v10960_v62  ;;  %v11002_v62 = vld [vmem:[#allocation408_spill] sm:$0xff] }
 0x2ce   :  { %5546 = vmatprep.subr.bf16.mxu1 %v5545_v43  ;;  %4917 = vmatmul.mubr.msk.f32.vlgmr.msra.gmra.mrb[4].mxu0 %vm1565_vm6, %v2890_v4  ;;  %v5579_v43 = vpack.c.bf16 %v10963_v41, %v10962_v33  ;;  %v11003_v36 = vld [vmem:[#allocation416_spill] sm:$0xff]  ;;  %v11004_v33 = vld [vmem:[#allocation410_spill] sm:$0xff] }
 0x2cf   :  { %4918 = vmatmul.mubr.msk.f32.vlgmr.msra.gmra.mrb[4].mxu1 %vm1565_vm6, %v2890_v4  ;;  %5532 = vmatpush1.bf16.msra.mxu0 %v5531_v17  ;;  %v10942_v4 = vld [vmem:[#allocation351_spill] sm:$0xff]  ;;  %v10966_v17 = vld [vmem:[#allocation340_spill] sm:$0xff]  ;;  %v11005_v41 = vld [vmem:[#allocation418_spill] sm:$0xff] }
 0x2d0   :  { %5548 = vmatpush1.bf16.msra.mxu1 %v5547_v51  ;;  %5534 = vmatprep.subr.bf16.mxu0 %v5533_v21  ;;  %v5539_v5 = vpack.c.bf16 %v10943_v24, %v10942_v4  ;;  %v5565_v19 = vpack.c.bf16 %v10967_v57, %v10966_v17  ;;  %v10968_v51 = vld [vmem:[#allocation342_spill] sm:$0xff]  ;;  %v5567_v21 = vpack.c.bf16 %v10971_v58, %v10970_v7  ;;  %v10982_v4 = vld [vmem:[#allocation372_spill] sm:$0xff]  ;;  %v11008_v57 = vld [vmem:[#allocation409_spill] sm:$0xff] }
 0x2d1   :  { %5550 = vmatprep.subr.bf16.mxu1 %v5549_v15  ;;  %3404 = vmatprep.mubr.f32.mxu0 %v10611_v35  ;;  %v5581_v39 = vpack.c.bf16 %v10969_v37, %v10968_v51  ;;  %v5583_v15 = vpack.c.bf16 %v10973_v12, %v10972_v23  ;;  %v10983_v24 = vld [vmem:[#allocation380_spill] sm:$0xff]  ;;  %v11012_v58 = vld [vmem:[#allocation426_spill] sm:$0xff]  ;;  %v11015_v12 = vld [vmem:[#allocation431_spill] sm:$0xff] }
 0x2d2   :  { %3475 = vmatprep.mubr.f32.mxu1 %v10611_v35  ;;  %v11010_v37 = vld [vmem:[#allocation424_spill] sm:$0xff] }
 0x2d3   :  { %5536 = vmatpush1.bf16.msra.mxu0 %v5535_v32  ;;  %v5569_v32 = vpack.c.bf16 %v10975_v31, %v10974_v29  ;;  %v11016_v29 = vld [vmem:[#allocation425_spill] sm:$0xff] }
 0x2d4   :  { %5552 = vmatpush1.bf16.msra.mxu1 %v5551_v10  ;;  %5538 = vmatprep.subr.bf16.mxu0 %v5537_v18  ;;  %v5585_v10 = vpack.c.bf16 %v10977_v2, %v10976_v0  ;;  %v5571_v18 = vpack.c.bf16 %v10979_v9, %v10978_v16  ;;  %v11017_v31 = vld [vmem:[#allocation433_spill] sm:$0xff]  ;;  %v11018_v0 = vld [vmem:[#allocation440_spill] sm:$0xff]  ;;  %v11020_v16 = vld [vmem:[#allocation442_spill] sm:$0xff] }
 0x2d5   :  { %5554 = vmatprep.subr.bf16.mxu1 %v5553_v22  ;;  %v5587_v22 = vpack.c.bf16 %v10981_v8, %v10980_v20  ;;  %v11019_v2 = vld [vmem:[#allocation448_spill] sm:$0xff]  ;;  %v11021_v9 = vld [vmem:[#allocation450_spill] sm:$0xff]  ;;  %v11022_v20 = vld [vmem:[#allocation439_spill] sm:$0xff] }
 0x2d6   :  { %v11023_v8 = vld [vmem:[#allocation447_spill] sm:$0xff] }
 0x2d7   :  { %5540 = vmatpush1.bf16.msra.mxu0 %v5539_v5  ;;  %v5573_v5 = vpack.c.bf16 %v10983_v24, %v10982_v4  ;;  %v11024_v4 = vld [vmem:[#allocation441_spill] sm:$0xff] }
 0x2d8   :  { %5556 = vmatpush1.bf16.msra.mxu1 %v5555_v6  ;;  %5542 = vmatprep.subr.bf16.mxu0 %v5541_v30  ;;  %v5589_v6 = vpack.c.bf16 %v10985_v26, %v10984_v25  ;;  %v5575_v30 = vpack.c.bf16 %v10987_v28, %v10986_v27  ;;  %v11025_v24 = vld [vmem:[#allocation449_spill] sm:$0xff]  ;;  %v3632_v25 = vrot.slane %v8970_v14, 6  ;;  %v3634_v26 = vrot.slane %v8972_v59, 5  ;;  %v11027_v27 = vld [vmem:[#allocation458_spill] sm:$0xff]  ;;  %v11028_v28 = vld [vmem:[#allocation396_spill] sm:$0xff] }
 0x2d9   :  { %5558 = vmatprep.subr.bf16.mxu1 %v5557_v38  ;;  %v5591_v38 = vpack.c.bf16 %v10989_v13, %v10988_v34  ;;  %v11030_v13 = vld [vmem:[#allocation398_spill] sm:$0xff] }
 0x2db   :  { %5544 = vmatpush1.bf16.msra.mxu0 %v5543_v44  ;;  %v10992_v44 = vld [vmem:[#allocation392_spill] sm:$0xff] }
 0x2dc   :  { %5560 = vmatpush1.bf16.msra.mxu1 %v5559_v46  ;;  %3356 = vmatprep.subr.mxu0 %v10954_v50  ;;  %v5593_v45 = vpack.c.bf16 %v10993_v11, %v10992_v44  ;;  %v10994_v46 = vld [vmem:[#allocation394_spill] sm:$0xff]  ;;  %v10996_v50 = vld [vmem:[#allocation391_spill] sm:$0xff] }
 0x2dd   :  { %3427 = vmatprep.subr.mxu1 %v10955_v52  ;;  %v5609_v48 = vpack.c.bf16 %v10995_v47, %v10994_v46  ;;  %v10997_v52 = vld [vmem:[#allocation399_spill] sm:$0xff]  ;;  %v11034_v46 = vld [vmem:[#allocation397_spill] sm:$0xff] }
 0x2de   :  { %v5595_v53 = vpack.c.bf16 %v10997_v52, %v10996_v50  ;;  %v11032_v44 = vld [vmem:[#allocation395_spill] sm:$0xff]  ;;  %v11035_v47 = vld [vmem:[#allocation405_spill] sm:$0xff] }
 0x2df   :  { %3357 = vmatpush1.msra.mxu0 %v10964_v49  ;;  %v11006_v49 = vld [vmem:[#allocation407_spill] sm:$0xff]  ;;  %v11037_v52 = vld [vmem:[#allocation457_spill] sm:$0xff] }
 0x2e0   :  { %3428 = vmatpush1.msra.mxu1 %v10965_v3  ;;  %5562 = vmatprep.subr.bf16.mxu0 %v5561_v55  ;;  %v10999_v55 = vld [vmem:[#allocation401_spill] sm:$0xff]  ;;  %v11007_v3 = vld [vmem:[#allocation415_spill] sm:$0xff] }
 0x2e1   :  { %5578 = vmatprep.subr.bf16.mxu1 %v5577_v61  ;;  %4919 = vmatmul.mubr.msk.f32.vlgmr.msra.gmra.mrb[2].mxu0 %vm1565_vm6, %v3263_v63  ;;  %v5611_v56 = vpack.c.bf16 %v10999_v55, %v10998_v54  ;;  %v11001_v61 = vld [vmem:[#allocation389_spill] sm:$0xff]  ;;  %v5599_v17 = vpack.c.bf16 %v11007_v3, %v11006_v49  ;;  %v11033_v11 = vld [vmem:[#allocation403_spill] sm:$0xff]  ;;  %v11039_v54 = vld [vmem:[#allocation420_spill] sm:$0xff] }
 0x2e2   :  { %4920 = vmatmul.mubr.msk.f32.vlgmr.msra.gmra.mrb[2].mxu1 %vm1565_vm6, %v3263_v63  ;;  %5564 = vmatpush1.bf16.msra.mxu0 %v5563_v1  ;;  %v5597_v1 = vpack.c.bf16 %v11003_v36, %v11002_v62  ;;  %v11036_v50 = vld [vmem:[#allocation455_spill] sm:$0xff]  ;;  %v11046_v49 = vld [vmem:[#allocation428_spill] sm:$0xff] }
 0x2e3   :  { %5580 = vmatpush1.bf16.msra.mxu1 %v5579_v43  ;;  %5566 = vmatprep.subr.bf16.mxu0 %v5565_v19  ;;  %v5613_v43 = vpack.c.bf16 %v11005_v41, %v11004_v33  ;;  %v11009_v19 = vld [vmem:[#allocation417_spill] sm:$0xff]  ;;  %v11042_v62 = vld [vmem:[#allocation411_spill] sm:$0xff]  ;;  %v11047_v3 = vld [vmem:[#allocation436_spill] sm:$0xff] }
 0x2e4   :  { %5582 = vmatprep.subr.bf16.mxu1 %v5581_v39  ;;  %3546 = vmatprep.mubr.f32.mxu0 %v10611_v35  ;;  %v5615_v51 = vpack.c.bf16 %v11009_v19, %v11008_v57  ;;  %v11011_v39 = vld [vmem:[#allocation432_spill] sm:$0xff]  ;;  %v11043_v36 = vld [vmem:[#allocation419_spill] sm:$0xff]  ;;  %v11044_v33 = vld [vmem:[#allocation413_spill] sm:$0xff] }
 0x2e5   :  { %3617 = vmatprep.mubr.f32.mxu1 %v10611_v35  ;;  %v5601_v7 = vpack.c.bf16 %v11011_v39, %v11010_v37  ;;  %v11045_v41 = vld [vmem:[#allocation421_spill] sm:$0xff]  ;;  %v11048_v57 = vld [vmem:[#allocation430_spill] sm:$0xff]  ;;  %v11050_v37 = vld [vmem:[#allocation427_spill] sm:$0xff] }
 0x2e6   :  { %5568 = vmatpush1.bf16.msra.mxu0 %v5567_v21  ;;  %v11013_v21 = vld [vmem:[#allocation434_spill] sm:$0xff]  ;;  %v11051_v39 = vld [vmem:[#allocation435_spill] sm:$0xff] }
 0x2e7   :  { %5584 = vmatpush1.bf16.msra.mxu1 %v5583_v15  ;;  %5570 = vmatprep.subr.bf16.mxu0 %v5569_v32  ;;  %v5617_v23 = vpack.c.bf16 %v11013_v21, %v11012_v58  ;;  %v5619_v32 = vpack.c.bf16 %v11017_v31, %v11016_v29  ;;  %v11049_v19 = vld [vmem:[#allocation438_spill] sm:$0xff]  ;;  %v11052_v58 = vld [vmem:[#allocation429_spill] sm:$0xff] }
 0x2e8   :  { %5586 = vmatprep.subr.bf16.mxu1 %v5585_v10  ;;  %v5605_v10 = vpack.c.bf16 %v11019_v2, %v11018_v0  ;;  %v11053_v21 = vld [vmem:[#allocation437_spill] sm:$0xff]  ;;  %v11056_v29 = vld [vmem:[#allocation446_spill] sm:$0xff]  ;;  %v11058_v0 = vld [vmem:[#allocation443_spill] sm:$0xff] }
 0x2e9   :  { %v11057_v31 = vld [vmem:[#allocation454_spill] sm:$0xff]  ;;  %v11059_v2 = vld [vmem:[#allocation451_spill] sm:$0xff] }
 0x2ea   :  { %5572 = vmatpush1.bf16.msra.mxu0 %v5571_v18  ;;  %v5621_v18 = vpack.c.bf16 %v11021_v9, %v11020_v16  ;;  %v11060_v16 = vld [vmem:[#allocation445_spill] sm:$0xff] }
 0x2eb   :  { %5588 = vmatpush1.bf16.msra.mxu1 %v5587_v22  ;;  %5574 = vmatprep.subr.bf16.mxu0 %v5573_v5  ;;  %v5607_v22 = vpack.c.bf16 %v11023_v8, %v11022_v20  ;;  %v5623_v5 = vpack.c.bf16 %v11025_v24, %v11024_v4  ;;  %v11061_v9 = vld [vmem:[#allocation453_spill] sm:$0xff]  ;;  %v11062_v20 = vld [vmem:[#allocation460_spill] sm:$0xff]  ;;  %v11063_v8 = vld [vmem:[#allocation462_spill] sm:$0xff] }
 0x2ec   :  { %5590 = vmatprep.subr.bf16.mxu1 %v5589_v6  ;;  %v11026_v6 = vld [vmem:[#allocation456_spill] sm:$0xff] }
 0x2ed   :  { %v11065_v4 = vld [vmem:[#allocation472_spill] sm:$0xff] }
 0x2ee   :  { %5576 = vmatpush1.bf16.msra.mxu0 %v5575_v30  ;;  %v11029_v30 = vld [vmem:[#allocation404_spill] sm:$0xff] }
 0x2ef   :  { %5592 = vmatpush1.bf16.msra.mxu1 %v5591_v38  ;;  %3498 = vmatprep.subr.mxu0 %v10990_v40  ;;  %v5625_v34 = vpack.c.bf16 %v11029_v30, %v11028_v28  ;;  %v11031_v38 = vld [vmem:[#allocation406_spill] sm:$0xff]  ;;  %v11070_v30 = vld [vmem:[#allocation465_spill] sm:$0xff] }
 0x2f0   :  { %3569 = vmatprep.subr.mxu1 %v10991_v42  ;;  %v5641_v40 = vpack.c.bf16 %v11031_v38, %v11030_v13  ;;  %v3636_v42 = vsel %vm1414_vm5, %v3632_v25, %v3634_v26  ;;  %v11067_v25 = vld [vmem:[#allocation474_spill] sm:$0xff]  ;;  %v11072_v38 = vld [vmem:[#allocation459_spill] sm:$0xff] }
 0x2f2   :  { %3499 = vmatpush1.msra.mxu0 %v11000_v60  ;;  %v11041_v60 = vld [vmem:[#allocation422_spill] sm:$0xff] }
 0x2f3   :  { %3570 = vmatpush1.msra.mxu1 %v11001_v61  ;;  %5594 = vmatprep.subr.bf16.mxu0 %v5593_v45  ;;  %v5627_v45 = vpack.c.bf16 %v11033_v11, %v11032_v44  ;;  %v11074_v44 = vld [vmem:[#allocation480_spill] sm:$0xff] }
 0x2f4   :  { %5610 = vmatprep.subr.bf16.mxu1 %v5609_v48  ;;  %4921 = vmatmul.mubr.msk.f32.vlgmr.msra.gmra.mrb[4].mxu0 %vm1565_vm6, %v3263_v63  ;;  %v5643_v48 = vpack.c.bf16 %v11035_v47, %v11034_v46  ;;  %v11075_v11 = vld [vmem:[#allocation488_spill] sm:$0xff]  ;;  %v11076_v46 = vld [vmem:[#allocation482_spill] sm:$0xff] }
 0x2f5   :  { %4922 = vmatmul.mubr.msk.f32.vlgmr.msra.gmra.mrb[4].mxu1 %vm1565_vm6, %v3263_v63  ;;  %5596 = vmatpush1.bf16.msra.mxu0 %v5595_v53  ;;  %v11014_v63 = vld [vmem:[#allocation423_spill] sm:$0xff]  ;;  %v11038_v53 = vld [vmem:[#allocation412_spill] sm:$0xff]  ;;  %v11077_v47 = vld [vmem:[#allocation490_spill] sm:$0xff] }
 0x2f6   :  { %5612 = vmatpush1.bf16.msra.mxu1 %v5611_v56  ;;  %5598 = vmatprep.subr.bf16.mxu0 %v5597_v1  ;;  %v5603_v15 = vpack.c.bf16 %v11015_v12, %v11014_v63  ;;  %v5629_v55 = vpack.c.bf16 %v11039_v54, %v11038_v53  ;;  %v11040_v56 = vld [vmem:[#allocation414_spill] sm:$0xff]  ;;  %v5631_v1 = vpack.c.bf16 %v11043_v36, %v11042_v62  ;;  %v11054_v63 = vld [vmem:[#allocation444_spill] sm:$0xff]  ;;  %v11080_v54 = vld [vmem:[#allocation481_spill] sm:$0xff] }
 0x2f7   :  { %5614 = vmatprep.subr.bf16.mxu1 %v5613_v43  ;;  %3777 = vmatprep.mubr.f32.mxu0 %v10611_v35  ;;  %v5645_v61 = vpack.c.bf16 %v11041_v60, %v11040_v56  ;;  %v5647_v43 = vpack.c.bf16 %v11045_v41, %v11044_v33  ;;  %v11055_v12 = vld [vmem:[#allocation452_spill] sm:$0xff]  ;;  %v11084_v36 = vld [vmem:[#allocation498_spill] sm:$0xff]  ;;  %v11087_v41 = vld [vmem:[#allocation503_spill] sm:$0xff] }
 0x2f8   :  { %3848 = vmatprep.mubr.f32.mxu1 %v10611_v35  ;;  %v11082_v60 = vld [vmem:[#allocation496_spill] sm:$0xff] }
 0x2f9   :  { %5600 = vmatpush1.bf16.msra.mxu0 %v5599_v17  ;;  %v5633_v17 = vpack.c.bf16 %v11047_v3, %v11046_v49  ;;  %v11088_v49 = vld [vmem:[#allocation497_spill] sm:$0xff] }
 0x2fa   :  { %5616 = vmatpush1.bf16.msra.mxu1 %v5615_v51  ;;  %5602 = vmatprep.subr.bf16.mxu0 %v5601_v7  ;;  %v5649_v51 = vpack.c.bf16 %v11049_v19, %v11048_v57  ;;  %v5635_v7 = vpack.c.bf16 %v11051_v39, %v11050_v37  ;;  %v11089_v3 = vld [vmem:[#allocation505_spill] sm:$0xff]  ;;  %v11090_v57 = vld [vmem:[#allocation512_spill] sm:$0xff]  ;;  %v11092_v37 = vld [vmem:[#allocation514_spill] sm:$0xff] }
 0x2fb   :  { %5618 = vmatprep.subr.bf16.mxu1 %v5617_v23  ;;  %v5651_v23 = vpack.c.bf16 %v11053_v21, %v11052_v58  ;;  %v11091_v19 = vld [vmem:[#allocation520_spill] sm:$0xff]  ;;  %v11093_v39 = vld [vmem:[#allocation522_spill] sm:$0xff]  ;;  %v11094_v58 = vld [vmem:[#allocation511_spill] sm:$0xff] }
 0x2fc   :  { %v11095_v21 = vld [vmem:[#allocation519_spill] sm:$0xff] }
 0x2fd   :  { %5604 = vmatpush1.bf16.msra.mxu0 %v5603_v15  ;;  %v5637_v15 = vpack.c.bf16 %v11055_v12, %v11054_v63  ;;  %v11096_v63 = vld [vmem:[#allocation513_spill] sm:$0xff] }
 0x2fe   :  { %5620 = vmatpush1.bf16.msra.mxu1 %v5619_v32  ;;  %5606 = vmatprep.subr.bf16.mxu0 %v5605_v10  ;;  %v5653_v32 = vpack.c.bf16 %v11057_v31, %v11056_v29  ;;  %v5639_v10 = vpack.c.bf16 %v11059_v2, %v11058_v0  ;;  %v11097_v12 = vld [vmem:[#allocation521_spill] sm:$0xff]  ;;  %v4005_v29 = vrot.slane %v8970_v14, 7  ;;  %v4007_v31 = vrot.slane %v8972_v59, 6  ;;  %v11099_v0 = vld [vmem:[#allocation530_spill] sm:$0xff] }
 0x2ff   :  { %5622 = vmatprep.subr.bf16.mxu1 %v5621_v18  ;;  %v5655_v18 = vpack.c.bf16 %v11061_v9, %v11060_v16  ;;  %v11101_v16 = vld [vmem:[#allocation476_spill] sm:$0xff]  ;;  %v11107_v59 = vld [vmem:[#allocation477_spill] sm:$0xff] }
 0x300   :  { %v9594_v2 = vsel %vm1414_vm5, %v4005_v29, %v4007_v31  ;;  %v11134_v29 = vld [vmem:[#allocation532_spill] sm:$0xff]  ;;  %v11135_v31 = vld [vmem:[#allocation534_spill] sm:$0xff] }
 0x301   :  { %5608 = vmatpush1.bf16.msra.mxu0 %v5607_v22  ;;  %v11064_v22 = vld [vmem:[#allocation464_spill] sm:$0xff] }
 0x302   :  { %5624 = vmatpush1.bf16.msra.mxu1 %v5623_v5  ;;  %3729 = vmatprep.subr.mxu0 %v11026_v6  ;;  %v5657_v24 = vpack.c.bf16 %v11065_v4, %v11064_v22  ;;  %v11066_v5 = vld [vmem:[#allocation466_spill] sm:$0xff]  ;;  %v11068_v6 = vld [vmem:[#allocation463_spill] sm:$0xff] }
 0x303   :  { %3800 = vmatprep.subr.mxu1 %v11027_v27  ;;  %v5673_v26 = vpack.c.bf16 %v11067_v25, %v11066_v5  ;;  %v11069_v27 = vld [vmem:[#allocation471_spill] sm:$0xff] }
 0x304   :  { %v5659_v28 = vpack.c.bf16 %v11069_v27, %v11068_v6  ;;  %v11104_v22 = vld [vmem:[#allocation467_spill] sm:$0xff]  ;;  %v11110_v6 = vld [vmem:[#allocation484_spill] sm:$0xff] }
 0x305   :  { %3730 = vmatpush1.msra.mxu0 %v11036_v50  ;;  %v11078_v50 = vld [vmem:[#allocation479_spill] sm:$0xff]  ;;  %v11111_v27 = vld [vmem:[#allocation492_spill] sm:$0xff] }
 0x306   :  { %3801 = vmatpush1.msra.mxu1 %v11037_v52  ;;  %5626 = vmatprep.subr.bf16.mxu0 %v5625_v34  ;;  %v11071_v34 = vld [vmem:[#allocation473_spill] sm:$0xff]  ;;  %v11079_v52 = vld [vmem:[#allocation487_spill] sm:$0xff] }
 0x307   :  { %5642 = vmatprep.subr.bf16.mxu1 %v5641_v40  ;;  %4923 = vmatmul.mubr.msk.f32.vlgmr.msra.gmra.mrb[2].mxu0 %vm1565_vm6, %v3636_v42  ;;  %v5675_v13 = vpack.c.bf16 %v11071_v34, %v11070_v30  ;;  %v11073_v40 = vld [vmem:[#allocation461_spill] sm:$0xff]  ;;  %v5663_v53 = vpack.c.bf16 %v11079_v52, %v11078_v50  ;;  %v11105_v4 = vld [vmem:[#allocation475_spill] sm:$0xff]  ;;  %v11112_v30 = vld [vmem:[#allocation486_spill] sm:$0xff] }
 0x308   :  { %4924 = vmatmul.mubr.msk.f32.vlgmr.msra.gmra.mrb[2].mxu1 %vm1565_vm6, %v3636_v42  ;;  %5628 = vmatpush1.bf16.msra.mxu0 %v5627_v45  ;;  %v5661_v45 = vpack.c.bf16 %v11075_v11, %v11074_v44  ;;  %v5691_v14 = vpack.c.bf16 %v11105_v4, %v11104_v22  ;;  %v11108_v25 = vld [vmem:[#allocation527_spill] sm:$0xff]  ;;  %v11113_v34 = vld [vmem:[#allocation494_spill] sm:$0xff]  ;;  %v11116_v11 = vld [vmem:[#allocation485_spill] sm:$0xff] }
 0x309   :  { %5644 = vmatpush1.bf16.msra.mxu1 %v5643_v48  ;;  %5630 = vmatprep.subr.bf16.mxu0 %v5629_v55  ;;  %v5677_v48 = vpack.c.bf16 %v11077_v47, %v11076_v46  ;;  %v11081_v55 = vld [vmem:[#allocation489_spill] sm:$0xff]  ;;  %v11118_v47 = vld [vmem:[#allocation500_spill] sm:$0xff]  ;;  %v11120_v52 = vld [vmem:[#allocation502_spill] sm:$0xff] }
 0x30a   :  { %5646 = vmatprep.subr.bf16.mxu1 %v5645_v61  ;;  %3919 = vmatprep.mubr.f32.mxu0 %v10611_v35  ;;  %v5679_v56 = vpack.c.bf16 %v11081_v55, %v11080_v54  ;;  %v11083_v61 = vld [vmem:[#allocation504_spill] sm:$0xff]  ;;  %v11122_v55 = vld [vmem:[#allocation499_spill] sm:$0xff] }
 0x30b   :  { %3990 = vmatprep.mubr.f32.mxu1 %v10611_v35  ;;  %v5665_v62 = vpack.c.bf16 %v11083_v61, %v11082_v60  ;;  %v11124_v61 = vld [vmem:[#allocation501_spill] sm:$0xff]  ;;  %v4439_v22 = vld [vmem:[%s10077_s5 + $0x18] sm:$0xff] }
 0x30c   :  { %5632 = vmatpush1.bf16.msra.mxu0 %v5631_v1  ;;  %v11085_v1 = vld [vmem:[#allocation506_spill] sm:$0xff]  ;;  %v11136_v4 = vld [vmem:[#allocation531_spill] sm:$0xff] }
 0x30d   :  { %5648 = vmatpush1.bf16.msra.mxu1 %v5647_v43  ;;  %5634 = vmatprep.subr.bf16.mxu0 %v5633_v17  ;;  %v5681_v33 = vpack.c.bf16 %v11085_v1, %v11084_v36  ;;  %v5683_v17 = vpack.c.bf16 %v11089_v3, %v11088_v49  ;;  %v11126_v1 = vld [vmem:[#allocation516_spill] sm:$0xff]  ;;  %v11130_v3 = vld [vmem:[#allocation515_spill] sm:$0xff] }
 0x30e   :  { %5650 = vmatprep.subr.bf16.mxu1 %v5649_v51  ;;  %v5669_v51 = vpack.c.bf16 %v11091_v19, %v11090_v57  ;;  %v11132_v57 = vld [vmem:[#allocation517_spill] sm:$0xff] }
 0x30f   :  { %v11133_v19 = vld [vmem:[#allocation525_spill] sm:$0xff] }
 0x310   :  { %5636 = vmatpush1.bf16.msra.mxu0 %v5635_v7  ;;  %v5685_v7 = vpack.c.bf16 %v11093_v39, %v11092_v37  ;;  %v4452_v37 = vld [vmem:[%s10077_s5 + $0x80] sm:$0xff]  ;;  %v4453_v39 = vld [vmem:[%s10077_s5 + $0x88] sm:$0xff] }
 0x311   :  { %5652 = vmatpush1.bf16.msra.mxu1 %v5651_v23  ;;  %5638 = vmatprep.subr.bf16.mxu0 %v5637_v15  ;;  %v5671_v23 = vpack.c.bf16 %v11095_v21, %v11094_v58  ;;  %v5687_v15 = vpack.c.bf16 %v11097_v12, %v11096_v63  ;;  %v4485_v58 = vld [vmem:[%s10077_s5 + $0x188] sm:$0xff]  ;;  %v4436_v21 = vld [vmem:[%s10077_s5] sm:$0xff] }
 0x312   :  { %5654 = vmatprep.subr.bf16.mxu1 %v5653_v32  ;;  %v11098_v32 = vld [vmem:[#allocation528_spill] sm:$0xff]  ;;  %v4469_v12 = vld [vmem:[%s10077_s5 + $0x108] sm:$0xff] }
 0x313   :  { %v4468_v63 = vld [vmem:[%s10077_s5 + $0x100] sm:$0xff] }
 0x314   :  { %5640 = vmatpush1.bf16.msra.mxu0 %v5639_v10  ;;  %v11100_v10 = vld [vmem:[#allocation468_spill] sm:$0xff] }
 0x315   :  { %5656 = vmatpush1.bf16.msra.mxu1 %v5655_v18  ;;  %3871 = vmatprep.subr.mxu0 %v11062_v20  ;;  %v5689_v9 = vpack.c.bf16 %v11101_v16, %v11100_v10  ;;  %v11102_v18 = vld [vmem:[#allocation470_spill] sm:$0xff]  ;;  %v4487_v10 = vld [vmem:[%s10077_s5 + $0x198] sm:$0xff]  ;;  %v5721_v16 = vpack.c.bf16 %v4453_v39, %v4452_v37 }
 0x316   :  { %3942 = vmatprep.subr.mxu1 %v11063_v8  ;;  %v11103_v20 = vld [vmem:[#allocation478_spill] sm:$0xff]  ;;  %v4495_v39 = vld [vmem:[%s10077_s5 + $0x1d8] sm:$0xff] }
 0x317   :  { %v5705_v8 = vpack.c.bf16 %v11103_v20, %v11102_v18  ;;  %v5755_v20 = vpack.c.bf16 %v4469_v12, %v4468_v63  ;;  %v4494_v37 = vld [vmem:[%s10077_s5 + $0x1d0] sm:$0xff] }
 0x318   :  { %3872 = vmatpush1.msra.mxu0 %v11072_v38  ;;  %v11114_v38 = vld [vmem:[#allocation483_spill] sm:$0xff]  ;;  %v5773_v12 = vpack.c.bf16 %v4495_v39, %v4494_v37 }
 0x319   :  { %3943 = vmatpush1.msra.mxu1 %v11073_v40  ;;  %5658 = vmatprep.subr.bf16.mxu0 %v5657_v24  ;;  %v11106_v24 = vld [vmem:[#allocation469_spill] sm:$0xff]  ;;  %v11115_v40 = vld [vmem:[#allocation491_spill] sm:$0xff] }
 0x31a   :  { %5674 = vmatprep.subr.bf16.mxu1 %v5673_v26  ;;  %4925 = vmatmul.mubr.msk.f32.vlgmr.msra.gmra.mrb[4].mxu0 %vm1565_vm6, %v3636_v42  ;;  %v5707_v5 = vpack.c.bf16 %v11107_v59, %v11106_v24  ;;  %v11109_v26 = vld [vmem:[#allocation529_spill] sm:$0xff]  ;;  %v5695_v44 = vpack.c.bf16 %v11115_v40, %v11114_v38 }
 0x31b   :  { %4926 = vmatmul.mubr.msk.f32.vlgmr.msra.gmra.mrb[4].mxu1 %vm1565_vm6, %v3636_v42  ;;  %5660 = vmatpush1.bf16.msra.mxu0 %v5659_v28  ;;  %v11086_v42 = vld [vmem:[#allocation495_spill] sm:$0xff]  ;;  %v5693_v28 = vpack.c.bf16 %v11111_v27, %v11110_v6  ;;  %v4457_v6 = vld [vmem:[%s10077_s5 + $0xa8] sm:$0xff]  ;;  %v4488_v27 = vld [vmem:[%s10077_s5 + $0x1a0] sm:$0xff] }
 0x31c   :  { %5676 = vmatpush1.bf16.msra.mxu1 %v5675_v13  ;;  %5662 = vmatprep.subr.bf16.mxu0 %v5661_v45  ;;  %v5667_v43 = vpack.c.bf16 %v11087_v41, %v11086_v42  ;;  %v5709_v13 = vpack.c.bf16 %v11113_v34, %v11112_v30  ;;  %v11117_v45 = vld [vmem:[#allocation493_spill] sm:$0xff]  ;;  %v11128_v41 = vld [vmem:[#allocation518_spill] sm:$0xff] }
 0x31d   :  { %5678 = vmatprep.subr.bf16.mxu1 %v5677_v48  ;;  %4150 = vmatprep.mubr.f32.mxu0 %v10611_v35  ;;  %v5711_v46 = vpack.c.bf16 %v11117_v45, %v11116_v11  ;;  %v11119_v48 = vld [vmem:[#allocation508_spill] sm:$0xff]  ;;  %v4473_v11 = vld [vmem:[%s10077_s5 + $0x128] sm:$0xff]  ;;  %v4458_v45 = vld [vmem:[%s10077_s5 + $0xb0] sm:$0xff] }
 0x31e   :  { %4221 = vmatprep.mubr.f32.mxu1 %v10611_v35  ;;  %v5697_v50 = vpack.c.bf16 %v11119_v48, %v11118_v47  ;;  %v4490_v47 = vld [vmem:[%s10077_s5 + $0x1b0] sm:$0xff]  ;;  %v4491_v48 = vld [vmem:[%s10077_s5 + $0x1b8] sm:$0xff] }
 0x31f   :  { %5664 = vmatpush1.bf16.msra.mxu0 %v5663_v53  ;;  %v11121_v53 = vld [vmem:[#allocation510_spill] sm:$0xff] }
 0x320   :  { %5680 = vmatpush1.bf16.msra.mxu1 %v5679_v56  ;;  %5666 = vmatprep.subr.bf16.mxu0 %v5665_v62  ;;  %v5713_v54 = vpack.c.bf16 %v11121_v53, %v11120_v52  ;;  %v11123_v56 = vld [vmem:[#allocation507_spill] sm:$0xff]  ;;  %v11125_v62 = vld [vmem:[#allocation509_spill] sm:$0xff] }
 0x321   :  { %5682 = vmatprep.subr.bf16.mxu1 %v5681_v33  ;;  %v5699_v60 = vpack.c.bf16 %v11123_v56, %v11122_v55  ;;  %v5715_v36 = vpack.c.bf16 %v11125_v62, %v11124_v61  ;;  %v11127_v33 = vld [vmem:[#allocation524_spill] sm:$0xff]  ;;  %v4442_v53 = vld [vmem:[%s10077_s5 + $0x30] sm:$0xff]  ;;  %v5765_v56 = vpack.c.bf16 %v4491_v48, %v4490_v47  ;;  %v4549_v47 = vld [vmem:[%s10077_s5 + $0x388] sm:$0xff] }
 0x322   :  { %v5701_v42 = vpack.c.bf16 %v11127_v33, %v11126_v1  ;;  %v4475_v61 = vld [vmem:[%s10077_s5 + $0x138] sm:$0xff]  ;;  %v4460_v62 = vld [vmem:[%s10077_s5 + $0xc0] sm:$0xff]  ;;  %v4493_v33 = vld [vmem:[%s10077_s5 + $0x1c8] sm:$0xff] }
 0x323   :  { %5668 = vmatpush1.bf16.msra.mxu0 %v5667_v43  ;;  %v11129_v43 = vld [vmem:[#allocation526_spill] sm:$0xff]  ;;  %v4492_v1 = vld [vmem:[%s10077_s5 + $0x1c0] sm:$0xff] }
 0x324   :  { %5684 = vmatpush1.bf16.msra.mxu1 %v5683_v17  ;;  %5670 = vmatprep.subr.bf16.mxu0 %v5669_v51  ;;  %v5717_v49 = vpack.c.bf16 %v11129_v43, %v11128_v41  ;;  %v5719_v51 = vpack.c.bf16 %v11133_v19, %v11132_v57  ;;  %v4444_v43 = vld [vmem:[%s10077_s5 + $0x40] sm:$0xff]  ;;  %v4477_v57 = vld [vmem:[%s10077_s5 + $0x148] sm:$0xff]  ;;  %v4462_v19 = vld [vmem:[%s10077_s5 + $0xd0] sm:$0xff] }
 0x325   :  { %5686 = vmatprep.subr.bf16.mxu1 %v5685_v7  ;;  %v4484_v7 = vld [vmem:[%s10077_s5 + $0x180] sm:$0xff] }
 0x327   :  { %5672 = vmatpush1.bf16.msra.mxu0 %v5671_v23  ;;  %v4437_v23 = vld [vmem:[%s10077_s5 + $0x8] sm:$0xff] }
 0x328   :  { %5688 = vmatpush1.bf16.msra.mxu1 %v5687_v15  ;;  %4102 = vmatprep.subr.mxu0 %v11098_v32  ;;  %v4454_v15 = vld [vmem:[%s10077_s5 + $0x90] sm:$0xff]  ;;  %v4455_v32 = vld [vmem:[%s10077_s5 + $0x98] sm:$0xff]  ;;  %v5723_v18 = vpack.c.bf16 %v4437_v23, %v4436_v21 }
 0x329   :  { %4173 = vmatprep.subr.mxu1 %v11099_v0  ;;  %v4486_v0 = vld [vmem:[%s10077_s5 + $0x190] sm:$0xff]  ;;  %v5725_v24 = vpack.c.bf16 %v4455_v32, %v4454_v15  ;;  %v4447_v23 = vld [vmem:[%s10077_s5 + $0x58] sm:$0xff]  ;;  %v4465_v32 = vld [vmem:[%s10077_s5 + $0xe8] sm:$0xff] }
 0x32a   :  { %v5757_v59 = vpack.c.bf16 %v4487_v10, %v4486_v0  ;;  %v4446_v21 = vld [vmem:[%s10077_s5 + $0x50] sm:$0xff]  ;;  %v4496_v0 = vld [vmem:[%s10077_s5 + $0x1e0] sm:$0xff]  ;;  %v4497_v10 = vld [vmem:[%s10077_s5 + $0x1e8] sm:$0xff] }
 0x32b   :  { %4103 = vmatpush1.msra.mxu0 %v11108_v25  ;;  %v4471_v25 = vld [vmem:[%s10077_s5 + $0x118] sm:$0xff]  ;;  %v4478_v15 = vld [vmem:[%s10077_s5 + $0x150] sm:$0xff] }
 0x32c   :  { %4174 = vmatpush1.msra.mxu1 %v11109_v26  ;;  %4927 = vmatmul.mubr.msk.f32.vlgmr.msra.gmra.mrb[2].mxu0 %vm1565_vm6, %v9594_v2  ;;  %v4456_v26 = vld [vmem:[%s10077_s5 + $0xa0] sm:$0xff] }
 0x32d   :  { %4928 = vmatmul.mubr.msk.f32.vlgmr.msra.gmra.mrb[2].mxu1 %vm1565_vm6, %v9594_v2  ;;  %5690 = vmatprep.subr.bf16.mxu0 %v5689_v9  ;;  %v5753_v9 = vpack.c.bf16 %v4485_v58, %v4484_v7  ;;  %v5729_v38 = vpack.c.bf16 %v4457_v6, %v4456_v26  ;;  %v4498_v26 = vld [vmem:[%s10077_s5 + $0x1f0] sm:$0xff] }
 0x32e   :  { %5706 = vmatprep.subr.bf16.mxu1 %v5705_v8  ;;  %5692 = vmatpush1.bf16.msra.mxu0 %v5691_v14  ;;  %v4438_v8 = vld [vmem:[%s10077_s5 + $0x10] sm:$0xff]  ;;  %v11137_v14 = vld [vmem:[#allocation533_spill] sm:$0xff] }
 0x32f   :  { %5708 = vmatpush1.bf16.msra.mxu1 %v5707_v5  ;;  %5694 = vmatprep.subr.bf16.mxu0 %v5693_v28  ;;  %v4470_v5 = vld [vmem:[%s10077_s5 + $0x110] sm:$0xff]  ;;  %v4489_v28 = vld [vmem:[%s10077_s5 + $0x1a8] sm:$0xff]  ;;  %v5727_v30 = vpack.c.bf16 %v4439_v22, %v4438_v8  ;;  %v5777_v8 = vpack.c.bf16 %v4497_v10, %v4496_v0 }
 0x330   :  { %5710 = vmatprep.subr.bf16.mxu1 %v5709_v13  ;;  %4292 = vmatprep.mubr.f32.mxu0 %v10611_v35  ;;  %v5759_v34 = vpack.c.bf16 %v4471_v25, %v4470_v5  ;;  %v4441_v13 = vld [vmem:[%s10077_s5 + $0x28] sm:$0xff]  ;;  %v5761_v40 = vpack.c.bf16 %v4489_v28, %v4488_v27  ;;  %v4466_v5 = vld [vmem:[%s10077_s5 + $0xf0] sm:$0xff]  ;;  %v4467_v25 = vld [vmem:[%s10077_s5 + $0xf8] sm:$0xff] }
 0x331   :  { %4363 = vmatprep.mubr.f32.mxu1 %v10611_v35  ;;  %v11131_v35 = vld [vmem:[#allocation523_spill] sm:$0xff]  ;;  %v4449_v22 = vld [vmem:[%s10077_s5 + $0x68] sm:$0xff]  ;;  %v5749_v6 = vpack.c.bf16 %v4467_v25, %v4466_v5 }
 0x332   :  { %5696 = vmatpush1.bf16.msra.mxu0 %v5695_v44  ;;  %v5703_v17 = vpack.c.bf16 %v11131_v35, %v11130_v3  ;;  %v4472_v44 = vld [vmem:[%s10077_s5 + $0x120] sm:$0xff]  ;;  %v5769_v35 = vpack.c.bf16 %v4493_v33, %v4492_v1  ;;  %v4499_v27 = vld [vmem:[%s10077_s5 + $0x1f8] sm:$0xff]  ;;  %v4450_v28 = vld [vmem:[%s10077_s5 + $0x70] sm:$0xff] }
 0x333   :  { %5712 = vmatpush1.bf16.msra.mxu1 %v5711_v46  ;;  %5698 = vmatprep.subr.bf16.mxu0 %v5697_v50  ;;  %v4459_v46 = vld [vmem:[%s10077_s5 + $0xb8] sm:$0xff]  ;;  %v5763_v52 = vpack.c.bf16 %v4473_v11, %v4472_v44  ;;  %v4516_v44 = vld [vmem:[%s10077_s5 + $0x280] sm:$0xff]  ;;  %v4517_v11 = vld [vmem:[%s10077_s5 + $0x288] sm:$0xff] }
 0x334   :  { %5714 = vmatprep.subr.bf16.mxu1 %v5713_v54  ;;  %v4443_v54 = vld [vmem:[%s10077_s5 + $0x38] sm:$0xff]  ;;  %v5733_v55 = vpack.c.bf16 %v4459_v46, %v4458_v45  ;;  %v4548_v45 = vld [vmem:[%s10077_s5 + $0x380] sm:$0xff]  ;;  %v5785_v46 = vpack.c.bf16 %v4517_v11, %v4516_v44  ;;  %v4505_v5 = vld [vmem:[%s10077_s5 + $0x228] sm:$0xff] }
 0x335   :  { %v5817_v48 = vpack.c.bf16 %v4549_v47, %v4548_v45  ;;  %v4506_v44 = vld [vmem:[%s10077_s5 + $0x230] sm:$0xff]  ;;  %v4507_v11 = vld [vmem:[%s10077_s5 + $0x238] sm:$0xff] }
 0x336   :  { %5700 = vmatpush1.bf16.msra.mxu0 %v5699_v60  ;;  %v4474_v60 = vld [vmem:[%s10077_s5 + $0x130] sm:$0xff] }
 0x337   :  { %5716 = vmatpush1.bf16.msra.mxu1 %v5715_v36  ;;  %5702 = vmatprep.subr.bf16.mxu0 %v5701_v42  ;;  %v4461_v36 = vld [vmem:[%s10077_s5 + $0xc8] sm:$0xff]  ;;  %v5735_v42 = vpack.c.bf16 %v4443_v54, %v4442_v53  ;;  %v5767_v41 = vpack.c.bf16 %v4475_v61, %v4474_v60 }
 0x338   :  { %5718 = vmatprep.subr.bf16.mxu1 %v5717_v49  ;;  %v4445_v49 = vld [vmem:[%s10077_s5 + $0x48] sm:$0xff]  ;;  %v5737_v3 = vpack.c.bf16 %v4461_v36, %v4460_v62 }
 0x339   :  { %v5739_v7 = vpack.c.bf16 %v4445_v49, %v4444_v43  ;;  %v4501_v43 = vld [vmem:[%s10077_s5 + $0x208] sm:$0xff] }
 0x33a   :  { %5704 = vmatpush1.bf16.msra.mxu0 %v5703_v17  ;;  %v4476_v17 = vld [vmem:[%s10077_s5 + $0x140] sm:$0xff] }
 0x33b   :  { %5720 = vmatpush1.bf16.msra.mxu1 %v5719_v51  ;;  %4244 = vmatprep.subr.mxu0 %v11134_v29  ;;  %v4463_v51 = vld [vmem:[%s10077_s5 + $0xd8] sm:$0xff]  ;;  %v5771_v58 = vpack.c.bf16 %v4477_v57, %v4476_v17  ;;  %v4532_v57 = vld [vmem:[%s10077_s5 + $0x300] sm:$0xff] }
 0x33c   :  { %4315 = vmatprep.subr.mxu1 %v11135_v31  ;;  %v5741_v63 = vpack.c.bf16 %v4463_v51, %v4462_v19  ;;  %v4479_v29 = vld [vmem:[%s10077_s5 + $0x158] sm:$0xff]  ;;  %v4464_v31 = vld [vmem:[%s10077_s5 + $0xe0] sm:$0xff]  ;;  %v4533_v19 = vld [vmem:[%s10077_s5 + $0x308] sm:$0xff] }
 0x33d   :  { %v4518_v51 = vld [vmem:[%s10077_s5 + $0x290] sm:$0xff] }
 0x33e   :  { %4245 = vmatpush1.msra.mxu0 %v11136_v4  ;;  %v4480_v4 = vld [vmem:[%s10077_s5 + $0x160] sm:$0xff] }
 0x33f   :  { %4316 = vmatpush1.msra.mxu1 %v11137_v14  ;;  %4929 = vmatmul.mubr.msk.f32.vlgmr.msra.gmra.mrb[4].mxu0 %vm1565_vm6, %v9594_v2  ;;  %v4481_v14 = vld [vmem:[%s10077_s5 + $0x168] sm:$0xff] }
 0x340   :  { %4930 = vmatmul.mubr.msk.f32.vlgmr.msra.gmra.mrb[4].mxu1 %vm1565_vm6, %v9594_v2  ;;  %5722 = vmatprep.subr.bf16.mxu0 %v5721_v16  ;;  %v4440_v2 = vld [vmem:[%s10077_s5 + $0x20] sm:$0xff]  ;;  %v5743_v16 = vpack.c.bf16 %v4447_v23, %v4446_v21  ;;  %v4551_v21 = vld [vmem:[%s10077_s5 + $0x398] sm:$0xff] }
 0x341   :  { %5754 = vmatprep.subr.bf16.mxu1 %v5753_v9  ;;  %5724 = vmatpush3.bf16.msra.mxu0 %v5723_v18  ;;  %v5731_v50 = vpack.c.bf16 %v4441_v13, %v4440_v2  ;;  %v5775_v9 = vpack.c.bf16 %v4479_v29, %v4478_v15  ;;  %v4448_v18 = vld [vmem:[%s10077_s5 + $0x60] sm:$0xff]  ;;  %v4482_v13 = vld [vmem:[%s10077_s5 + $0x170] sm:$0xff]  ;;  %v5819_v15 = vpack.c.bf16 %v4533_v19, %v4532_v57  ;;  %v4527_v19 = vld [vmem:[%s10077_s5 + $0x2d8] sm:$0xff] }
 0x342   :  { %5756 = vmatpush3.bf16.msra.mxu1 %v5755_v20  ;;  %5726 = vmatprep.subr.bf16.mxu0 %v5725_v24  ;;  %v5745_v20 = vpack.c.bf16 %v4465_v32, %v4464_v31  ;;  %v5747_v24 = vpack.c.bf16 %v4449_v22, %v4448_v18  ;;  %v4502_v29 = vld [vmem:[%s10077_s5 + $0x210] sm:$0xff]  ;;  %v4503_v31 = vld [vmem:[%s10077_s5 + $0x218] sm:$0xff]  ;;  %v4552_v22 = vld [vmem:[%s10077_s5 + $0x3a0] sm:$0xff] }
 0x343   :  { %5758 = vmatprep.subr.bf16.mxu1 %v5757_v59  ;;  %v5779_v59 = vpack.c.bf16 %v4481_v14, %v4480_v4  ;;  %v4535_v18 = vld [vmem:[%s10077_s5 + $0x318] sm:$0xff]  ;;  %v4553_v4 = vld [vmem:[%s10077_s5 + $0x3a8] sm:$0xff]  ;;  %v5791_v14 = vpack.c.bf16 %v4503_v31, %v4502_v29  ;;  %v4542_v29 = vld [vmem:[%s10077_s5 + $0x350] sm:$0xff] }
 0x344   :  { %v4543_v31 = vld [vmem:[%s10077_s5 + $0x358] sm:$0xff] }
 0x345   :  { %5728 = vmatpush3.bf16.msra.mxu0 %v5727_v30  ;;  %v4451_v30 = vld [vmem:[%s10077_s5 + $0x78] sm:$0xff] }
 0x346   :  { %5760 = vmatpush3.bf16.msra.mxu1 %v5759_v34  ;;  %5730 = vmatprep.subr.bf16.mxu0 %v5729_v38  ;;  %v5781_v34 = vpack.c.bf16 %v4499_v27, %v4498_v26  ;;  %v5751_v2 = vpack.c.bf16 %v4451_v30, %v4450_v28  ;;  %v4483_v38 = vld [vmem:[%s10077_s5 + $0x178] sm:$0xff]  ;;  %v5825_v26 = vpack.c.bf16 %v4553_v4, %v4552_v22  ;;  %v4537_v27 = vld [vmem:[%s10077_s5 + $0x328] sm:$0xff]  ;;  %v4522_v28 = vld [vmem:[%s10077_s5 + $0x2b0] sm:$0xff] }
 0x347   :  { %5762 = vmatprep.subr.bf16.mxu1 %v5761_v40  ;;  %v5783_v40 = vpack.c.bf16 %v4483_v38, %v4482_v13  ;;  %v4523_v30 = vld [vmem:[%s10077_s5 + $0x2b8] sm:$0xff] }
 0x348   :  { %v5797_v45 = vpack.c.bf16 %v4523_v30, %v4522_v28  ;;  %v4530_v28 = vld [vmem:[%s10077_s5 + $0x2f0] sm:$0xff] }
 0x349   :  { %5732 = vmatpush3.bf16.msra.mxu0 %v5731_v50  ;;  %v4380_v50 = vlaneseq  ;;  %v4562_v30 = vld [vmem:[%s10077_s5 + $0x3f0] sm:$0xff] }
 0x34a   :  { %5764 = vmatpush3.bf16.msra.mxu1 %v5763_v52  ;;  %5734 = vmatprep.subr.bf16.mxu0 %v5733_v55  ;;  %v9855_v55 = vld [vmem:[%s10076_s4] sm:$0xff] }
 0x34b   :  { %5766 = vmatprep.subr.bf16.mxu1 %v5765_v56  ;;  %v9848_v52 = vshrl.u32 %v4380_v50, 7  ;;  %v4539_v50 = vld [vmem:[%s10077_s5 + $0x338] sm:$0xff] }
 0x34d   :  { %5736 = vmatpush3.bf16.msra.mxu0 %v5735_v42  ;;  %v4382_v53 = vsub.s32 0, %v9848_v52  ;;  %v4390_v54 = vsub.s32 2, %v9848_v52  ;;  %v4386_v56 = vsub.s32 1, %v9848_v52  ;;  %v4394_v60 = vsub.s32 3, %v9848_v52 }
 0x34e   :  { %5768 = vmatpush3.bf16.msra.mxu1 %v5767_v41  ;;  %5738 = vmatprep.subr.bf16.mxu0 %v5737_v3  ;;  %v4500_v41 = vld [vmem:[%s10077_s5 + $0x200] sm:$0xff]  ;;  %v4410_v47 = vsub.s32 7, %v9848_v52  ;;  %v4398_v22 = vsub.s32 4, %v9848_v52 }
 0x34f   :  { %5770 = vmatprep.subr.bf16.mxu1 %v5769_v35  ;;  %v4383_v61 = vrot.slane %v9855_v55, %v4382_v53  ;;  %v4391_v62 = vrot.slane %v9855_v55, %v4390_v54  ;;  %v4387_v36 = vrot.slane %v9855_v55, %v4386_v56  ;;  %v4395_v1 = vrot.slane %v9855_v55, %v4394_v60  ;;  %v4524_v53 = vld [vmem:[%s10077_s5 + $0x2c0] sm:$0xff]  ;;  %v4525_v54 = vld [vmem:[%s10077_s5 + $0x2c8] sm:$0xff] }
 0x350   :  { %v4556_v56 = vld [vmem:[%s10077_s5 + $0x3c0] sm:$0xff]  ;;  %v4557_v60 = vld [vmem:[%s10077_s5 + $0x3c8] sm:$0xff] }
 0x351   :  { %5740 = vmatpush3.bf16.msra.mxu0 %v5739_v7  ;;  %v4519_v7 = vld [vmem:[%s10077_s5 + $0x298] sm:$0xff] }
 0x352   :  { %5772 = vmatpush3.bf16.msra.mxu1 %v5771_v58  ;;  %5742 = vmatprep.subr.bf16.mxu0 %v5741_v63  ;;  %v4550_v58 = vld [vmem:[%s10077_s5 + $0x390] sm:$0xff]  ;;  %v5789_v10 = vpack.c.bf16 %v4519_v7, %v4518_v51 }
 0x353   :  { %5774 = vmatprep.subr.bf16.mxu1 %v5773_v12  ;;  %v5787_v12 = vpack.c.bf16 %v4501_v43, %v4500_v41  ;;  %v5833_v41 = vpack.c.bf16 %v4557_v60, %v4556_v56  ;;  %v4509_v43 = vld [vmem:[%s10077_s5 + $0x248] sm:$0xff]  ;;  %v4558_v51 = vld [vmem:[%s10077_s5 + $0x3d0] sm:$0xff] }
 0x355   :  { %5744 = vmatpush3.bf16.msra.mxu0 %v5743_v16  ;;  %v5821_v16 = vpack.c.bf16 %v4551_v21, %v4550_v58 }
 0x356   :  { %5776 = vmatpush3.bf16.msra.mxu1 %v5775_v9  ;;  %5746 = vmatprep.subr.bf16.mxu0 %v5745_v20  ;;  %v4534_v9 = vld [vmem:[%s10077_s5 + $0x310] sm:$0xff]  ;;  %v4520_v20 = vld [vmem:[%s10077_s5 + $0x2a0] sm:$0xff] }
 0x357   :  { %5778 = vmatprep.subr.bf16.mxu1 %v5777_v8  ;;  %v4521_v8 = vld [vmem:[%s10077_s5 + $0x2a8] sm:$0xff] }
 0x358   :  { %v5793_v25 = vpack.c.bf16 %v4521_v8, %v4520_v20 }
 0x359   :  { %5748 = vmatpush3.bf16.msra.mxu0 %v5747_v24  ;;  %v5823_v24 = vpack.c.bf16 %v4535_v18, %v4534_v9  ;;  %v4560_v9 = vld [vmem:[%s10077_s5 + $0x3e0] sm:$0xff]  ;;  %v4561_v18 = vld [vmem:[%s10077_s5 + $0x3e8] sm:$0xff] }
 0x35a   :  { %5780 = vmatpush3.bf16.msra.mxu1 %v5779_v59  ;;  %5750 = vmatprep.subr.bf16.mxu0 %v5749_v6  ;;  %v4504_v59 = vld [vmem:[%s10077_s5 + $0x220] sm:$0xff] }
 0x35b   :  { %5782 = vmatprep.subr.bf16.mxu1 %v5781_v34  ;;  %v4536_v6 = vld [vmem:[%s10077_s5 + $0x320] sm:$0xff]  ;;  %v4554_v34 = vld [vmem:[%s10077_s5 + $0x3b0] sm:$0xff]  ;;  %v5795_v13 = vpack.c.bf16 %v4505_v5, %v4504_v59  ;;  %v4513_v59 = vld [vmem:[%s10077_s5 + $0x268] sm:$0xff]  ;;  %v4406_v5 = vsub.s32 6, %v9848_v52 }
 0x35c   :  { %v5827_v38 = vpack.c.bf16 %v4537_v27, %v4536_v6  ;;  %v4544_v6 = vld [vmem:[%s10077_s5 + $0x360] sm:$0xff]  ;;  %v4545_v27 = vld [vmem:[%s10077_s5 + $0x368] sm:$0xff] }
 0x35d   :  { %5752 = vmatpush3.bf16.msra.mxu0 %v5751_v2  ;;  %v4555_v2 = vld [vmem:[%s10077_s5 + $0x3b8] sm:$0xff] }
 0x35e   :  { %5784 = vmatpush3.bf16.msra.mxu1 %v5783_v40  ;;  %5786 = vmatprep.subr.bf16.mxu0 %v5785_v46  ;;  %v4402_v40 = vsub.s32 5, %v9848_v52  ;;  %v5829_v46 = vpack.c.bf16 %v4555_v2, %v4554_v34  ;;  %v4531_v52 = vld [vmem:[%s10077_s5 + $0x2f8] sm:$0xff]  ;;  %v4399_v2 = vrot.slane %v9855_v55, %v4398_v22 }
 0x35f   :  { %5818 = vmatprep.subr.bf16.mxu1 %v5817_v48  ;;  %v4538_v48 = vld [vmem:[%s10077_s5 + $0x330] sm:$0xff]  ;;  %v4563_v34 = vld [vmem:[%s10077_s5 + $0x3f8] sm:$0xff] }
 0x3ff   :  { %v4152_v33 = vpop.f32.mrb[2].mxu0 }
 0x400   :  { %v4223_v42 = vpop.f32.mrb[2].mxu1  ;;  %v4420_v49 = vadd.f32 %v4383_v61, %v4152_v33  ;;  %v4154_v35 = vpop.f32.mrb[3].mxu0  ;;  %v4403_v61 = vrot.slane %v9855_v55, %v4402_v40  ;;  %v4411_v33 = vrot.slane %v9855_v55, %v4410_v47  ;;  %v4514_v40 = vld [vmem:[%s10077_s5 + $0x270] sm:$0xff] }
 0x401   :  { %v4422_v3 = vadd.f32 %v4391_v62, %v4223_v42  ;;  %v4225_v17 = vpop.f32.mrb[3].mxu1  ;;  %v4421_v37 = vadd.f32 %v4387_v36, %v4154_v35  ;;  %v5799_v62 = vpack.c.bf16 %v4507_v11, %v4506_v44  ;;  %v5831_v36 = vpack.c.bf16 %v4539_v50, %v4538_v48  ;;  %v4526_v35 = vld [vmem:[%s10077_s5 + $0x2d0] sm:$0xff]  ;;  %v4547_v48 = vld [vmem:[%s10077_s5 + $0x378] sm:$0xff] }
 0x402   :  { %v4423_v39 = vadd.f32 %v4395_v1, %v4225_v17  ;;  %v4428_v32 = vmax.f32 %v4420_v49, 0.0  ;;  %v4508_v1 = vld [vmem:[%s10077_s5 + $0x240] sm:$0xff]  ;;  %v5801_v42 = vpack.c.bf16 %v4525_v54, %v4524_v53  ;;  %v4407_v44 = vrot.slane %v9855_v55, %v4406_v5  ;;  %v4546_v47 = vld [vmem:[%s10077_s5 + $0x370] sm:$0xff] }
 0x403   :  { %v4429_v23 = vmax.f32 %v4421_v37, 0.0  ;;  %v4430_v0 = vmax.f32 %v4422_v3, 0.0  ;;  %v4540_v49 = vld [vmem:[%s10077_s5 + $0x340] sm:$0xff]  ;;  %v4541_v3 = vld [vmem:[%s10077_s5 + $0x348] sm:$0xff]  ;;  %v4559_v37 = vld [vmem:[%s10077_s5 + $0x3d8] sm:$0xff]  ;;  %v5803_v58 = vpack.c.bf16 %v4509_v43, %v4508_v1  ;;  %v5813_v11 = vpack.c.bf16 %v4531_v52, %v4530_v28 }
 0x404   :  { %v4431_v63 = vmax.f32 %v4423_v39, 0.0  ;;  %v5835_v21 = vpack.c.bf16 %v4541_v3, %v4540_v49  ;;  %v5847_v55 = vpack.c.bf16 %v4547_v48, %v4546_v47 }
 0x405   :  { %4635 = vmatprep.mubr.f32.mxu0 %v4429_v23  ;;  %v4510_v23 = vld [vmem:[%s10077_s5 + $0x250] sm:$0xff] }
 0x406   :  { %4705 = vmatprep.mubr.f32.mxu1 %v4431_v63  ;;  %4636 = vmatmul.mubr.f32.vlgmr.msra.gmra.mrb[6].mxu0 %v4428_v32  ;;  %v4511_v63 = vld [vmem:[%s10077_s5 + $0x258] sm:$0xff]  ;;  %v4528_v32 = vld [vmem:[%s10077_s5 + $0x2e0] sm:$0xff] }
 0x407   :  { %4706 = vmatmul.mubr.f32.vlgmr.msra.gmra.mrb[6].mxu1 %v4430_v0  ;;  %5788 = vmatpush3.bf16.msra.mxu0 %v5787_v12  ;;  %v5805_v0 = vpack.c.bf16 %v4527_v19, %v4526_v35  ;;  %v5807_v4 = vpack.c.bf16 %v4511_v63, %v4510_v23 }
 0x408   :  { %5820 = vmatpush3.bf16.msra.mxu1 %v5819_v15  ;;  %5790 = vmatprep.subr.bf16.mxu0 %v5789_v10  ;;  %v5837_v10 = vpack.c.bf16 %v4559_v37, %v4558_v51 }
 0x409   :  { %5822 = vmatprep.subr.bf16.mxu1 %v5821_v16  ;;  %v4529_v16 = vld [vmem:[%s10077_s5 + $0x2e8] sm:$0xff] }
 0x40b   :  { %5792 = vmatpush3.bf16.msra.mxu0 %v5791_v14  ;;  %v5839_v14 = vpack.c.bf16 %v4543_v31, %v4542_v29 }
 0x40c   :  { %5824 = vmatpush3.bf16.msra.mxu1 %v5823_v24  ;;  %5794 = vmatprep.subr.bf16.mxu0 %v5793_v25  ;;  %v4512_v24 = vld [vmem:[%s10077_s5 + $0x260] sm:$0xff]  ;;  %v5809_v25 = vpack.c.bf16 %v4529_v16, %v4528_v32 }
 0x40d   :  { %5826 = vmatprep.subr.bf16.mxu1 %v5825_v26  ;;  %v5841_v26 = vpack.c.bf16 %v4561_v18, %v4560_v9 }
 0x40f   :  { %5796 = vmatpush3.bf16.msra.mxu0 %v5795_v13  ;;  %v5811_v13 = vpack.c.bf16 %v4513_v59, %v4512_v24 }
 0x410   :  { %5828 = vmatpush3.bf16.msra.mxu1 %v5827_v38  ;;  %5798 = vmatprep.subr.bf16.mxu0 %v5797_v45  ;;  %v5843_v38 = vpack.c.bf16 %v4545_v27, %v4544_v6  ;;  %v5845_v45 = vpack.c.bf16 %v4563_v34, %v4562_v30 }
 0x411   :  { %5830 = vmatprep.subr.bf16.mxu1 %v5829_v46  ;;  %v4515_v46 = vld [vmem:[%s10077_s5 + $0x278] sm:$0xff] }
 0x412   :  { %v9978_v17 = vpop.f32.mrb[4].mxu0  ;;  %v5815_v50 = vpack.c.bf16 %v4515_v46, %v4514_v40 }
 0x413   :  { %v9980_v57 = vpop.f32.mrb[4].mxu1  ;;  %v4296_v39 = vpop.f32.mrb[5].mxu0  ;;  %5800 = vmatpush3.bf16.msra.mxu0 %v5799_v62  ;;  %v4424_v53 = vadd.f32 %v4399_v2, %v9978_v17 }
 0x414   :  { %v4367_v7 = vpop.f32.mrb[5].mxu1  ;;  %5832 = vmatpush3.bf16.msra.mxu1 %v5831_v36  ;;  %v4425_v12 = vadd.f32 %v4403_v61, %v4296_v39  ;;  %5802 = vmatprep.subr.bf16.mxu0 %v5801_v42  ;;  %v4426_v54 = vadd.f32 %v4407_v44, %v9980_v57  ;;  %v4931_v36 = vld [vmem:[%s10078_s6] ss:$0 sm:$0xff]  ;;  %s5912_s6 = scalar_lea.vmem %s4860_s22, 32 }
 0x415   :  { %v4427_v15 = vadd.f32 %v4411_v33, %v4367_v7  ;;  %5834 = vmatprep.subr.bf16.mxu1 %v5833_v41  ;;  %v4432_v56 = vmax.f32 %v4424_v53, 0.0  ;;  %p5913_p0 = scmp.ne.s32.totalorder %s4860_s22, %s5912_s6  ;;  %p5918_p2 = scmp.lt.s32.totalorder %s5912_s6, %s5912_s6 }
 0x416   :  { %v4433_v20 = vmax.f32 %v4425_v12, 0.0  ;;  %v4434_v60 = vmax.f32 %v4426_v54, 0.0 }
 0x417   :  { %v4435_v8 = vmax.f32 %v4427_v15, 0.0  ;;  %5804 = vmatpush3.bf16.msra.mxu0 %v5803_v58  ;;  %p5919_p3 = por %p5918_p2, %p5917_p1 }
 0x418   :  { %5836 = vmatpush3.bf16.msra.mxu1 %v5835_v21  ;;  %4775 = vmatprep.mubr.f32.mxu0 %v4433_v20 }
 0x419   :  { %4845 = vmatprep.mubr.f32.mxu1 %v4435_v8  ;;  %5806 = vmatprep.subr.bf16.mxu0 %v5805_v0  ;;  %p5920_p4 = pnand %p5919_p3, %p5913_p0 }
 0x41a   :  { %5838 = vmatprep.subr.bf16.mxu1 %v5837_v10 }
 0x41b   :  { %5808 = vmatpush3.bf16.msra.mxu0 %v5807_v4 }
 0x41c   :  { %5840 = vmatpush3.bf16.msra.mxu1 %v5839_v14  ;;  %5810 = vmatprep.subr.bf16.mxu0 %v5809_v25 }
 0x41d   :  { %5842 = vmatprep.subr.bf16.mxu1 %v5841_v26 }
 0x41f   :  { %5812 = vmatpush3.bf16.msra.mxu0 %v5811_v13 }
 0x420   :  { %5844 = vmatpush3.bf16.msra.mxu1 %v5843_v38  ;;  %5814 = vmatprep.subr.bf16.mxu0 %v5813_v11 }
 0x421   :  { %5846 = vmatprep.subr.bf16.mxu1 %v5845_v45 }
 0x423   :  { %5816 = vmatpush3.bf16.msra.mxu0 %v5815_v50 }
 0x424   :  { %5848 = vmatpush3.bf16.msra.mxu1 %v5847_v55 }
 0x426   :  { %4776 = vmatmul.mubr.f32.vlgmr.msra.gmra.mrb[8].mxu0 %v4432_v56 }
 0x427   :  { %4846 = vmatmul.mubr.f32.vlgmr.msra.gmra.mrb[8].mxu1 %v4434_v60 }
 0x4d9   :  { %v4995_v61 = vpop.f32.mrb[6].mxu0 }
 0x4da   :  { %v5030_v62 = vpop.f32.mrb[6].mxu1  ;;  %v4996_v1 = vpop.f32.mrb[7].mxu0 }
 0x4db   :  { %v5031_v33 = vpop.f32.mrb[7].mxu1  ;;  %v4997_v42 = vadd.f32 %v4996_v1, %v4995_v61 }
 0x4dc   :  { %v5032_v41 = vadd.f32 %v5031_v33, %v5030_v62 }
 0x4dd   :  { %v4638_v43 = vadd.f32 %v4997_v42, %v4931_v36 }
 0x4df   :  { %v4708_v49 = vadd.f32 %v5032_v41, %v4638_v43 }
 0x4f9   :  { %v5065_v3 = vpop.f32.mrb[8].mxu0 }
 0x4fa   :  { %v5100_v35 = vpop.f32.mrb[8].mxu1  ;;  %v5066_v17 = vpop.f32.mrb[9].mxu0 }
 0x4fb   :  { %v5101_v57 = vpop.f32.mrb[9].mxu1  ;;  %v5067_v19 = vadd.f32 %v5066_v17, %v5065_v3 }
 0x4fc   :  { %v5102_v51 = vadd.f32 %v5101_v57, %v5100_v35 }
 0x4fd   :  { %v4778_v37 = vadd.f32 %v5067_v19, %v4708_v49 }
 0x4ff   :  { %v4848_v39 = vadd.f32 %v5102_v51, %v4778_v37 }
 0x501   :  { %4852 = vst.msk [vmem:[#allocation4] sm:$0x3] %vm4851_vm7, %v4848_v39 }
 0x502   :  { %5923 = shalt.err (!%p5920_p4)
}
 0x503   :  { %s5924_s25 = scalar_lea.hbm %s10079_s7, 32 }
 0x504   :  { %p5925_p5 = scmp.ne.s32.totalorder %s10079_s7, %s5924_s25  ;;  %p5928_p6 = scmp.lt.u32.totalorder %s5924_s25, %s10079_s7 }
 0x506   :  { %p5930_p7 = pnand %p5928_p6, %p5925_p5 }
 0x508   :  { %5933 = shalt.err (!%p5930_p7)
}
 0x509   :  { %4862 = dma.vmem_to_hbm [thread:$0]  %s4860_s22, 32, %s10079_s7, [#allocation5]  }
 0x50a   :  { %5936 = dma.done.wait [#allocation5], 32  }
 0x50b   :  { %5937 = vsyncadd [#allocation5], 4294967264 }
 0x50c   :  { %4866 = vsyncpa [#allocation5], 1 }
 0x50d   :  { %4867 = vsyncmov [#allocation3] }
 0x510   :  { %s4868_s3 = vpop.sfrf %4867 }
 0x511   :  { %p4932_p8 = scmp.ne.s32.totalorder %s4868_s3, 0 }
 0x513   :  { %4872 = shalt.err (%p4932_p8)  }

</bundles_post_ra>
